<compile_context>
chip_gen: v7x
topology: tpu7x:2x2x1
jax: 0.10.0
libtpu: 0.0.40
codegen_flags: <defaults>
</compile_context>

<pallas_src>
import jax
import jax.numpy as jnp
from jax.experimental import pallas as pl
from jax.experimental.pallas import tpu as pltpu

LANE = 128


def _make_kernel(num_cols, pad_dims, col_offsets, tile_b):
    def kernel(gidx_ref, *refs):
        # gidx_ref : SMEM (B_pad * num_cols,) int32    -- scalar prefetch
        tab_refs = refs[:num_cols]           # HBM refs, each (V_c, Dpad_c)
        out_ref = refs[num_cols]              # VMEM (tile_b, sum(Dpad)) output tile
        scratch = refs[num_cols + 1]           # VMEM (2, tile_b, sum(Dpad)) gather slots
        sems = refs[num_cols + 2]              # DMA sems (2, num_cols)

        step = pl.program_id(0)
        n_steps = pl.num_programs(0)
        slot = step % 2
        nslot = 1 - slot

        def issue(tile_idx, s):
            # Issue ALL row-gather DMAs for batch tile `tile_idx` into slot `s`
            # so they overlap each other (and the previous tile's wait/store).
            base = tile_idx * tile_b
            for r in range(tile_b):
                for c in range(num_cols):
                    row = gidx_ref[(base + r) * num_cols + c]
                    pltpu.make_async_copy(
                        tab_refs[c].at[pl.ds(row, 1), :],
                        scratch.at[s, pl.ds(r, 1),
                                   pl.ds(col_offsets[c], pad_dims[c])],
                        sems.at[s, c],
                    ).start()

        def wait_all(s):
            # Reconstruct descriptors only for their byte counts / semaphores.
            for r in range(tile_b):
                for c in range(num_cols):
                    pltpu.make_async_copy(
                        tab_refs[c].at[pl.ds(0, 1), :],
                        scratch.at[s, pl.ds(r, 1),
                                   pl.ds(col_offsets[c], pad_dims[c])],
                        sems.at[s, c],
                    ).wait()

        # Prologue: first grid step must gather its own tile.
        @pl.when(step == 0)
        def _():
            issue(step, slot)

        # Wait for this tile's gathers (issued one step earlier in steady state).
        wait_all(slot)

        # Prefetch the next tile's rows into the other slot while we finish
        # this tile -> hides the HBM gather latency across grid steps.
        @pl.when(step + 1 < n_steps)
        def _():
            issue(step + 1, nslot)

        # One lane-dense (width is a multiple of 128) unmasked store per tile.
        out_ref[...] = scratch[slot]

    return kernel


def categorical_embeddings(indices, tables, *, tile_b=8):
    """indices: list of (B,) int arrays; tables: list of (V_c, D_c) float arrays."""
    assert len(indices) == len(tables) and len(tables) > 0
    num_cols = len(tables)
    batch = int(indices[0].shape[0])
    dtype = tables[0].dtype
    dims = [int(t.shape[1]) for t in tables]
    vocabs = [int(t.shape[0]) for t in tables]

    # Pad every column's embedding width to a multiple of 128 lanes so the
    # gather DMAs and the output stores are lane-aligned / unmasked.
    pad_dims = [LANE * pl.cdiv(d, LANE) for d in dims]
    col_offsets = [0]
    for d in pad_dims[:-1]:
        col_offsets.append(col_offsets[-1] + d)
    out_w = sum(pad_dims)

    # In a real model the padded tables would be stored like this once; padding
    # per call keeps this example self-contained.
    tabs_padded = [
        jnp.pad(t, ((0, 0), (0, pd - d)))
        for t, d, pd in zip(tables, dims, pad_dims)
    ]

    num_tiles = pl.cdiv(batch, tile_b)
    b_pad = num_tiles * tile_b

    # Flat int32 index array for SMEM scalar prefetch: gidx[b * num_cols + c].
    # Clamp defensively (an OOB index would turn into an OOB HBM DMA).
    idx = jnp.stack(
        [jnp.clip(jnp.asarray(i, jnp.int32), 0, v - 1)
         for i, v in zip(indices, vocabs)], axis=1)            # (B, num_cols)
    if b_pad != batch:
        idx = jnp.pad(idx, ((0, b_pad - batch), (0, 0)))       # pad rows -> row 0
    gidx = idx.reshape(-1)

    grid_spec = pltpu.PrefetchScalarGridSpec(
        num_scalar_prefetch=1,
        grid=(num_tiles,),
        in_specs=[pl.BlockSpec(memory_space=pl.ANY)] * num_cols,  # tables in HBM
        out_specs=pl.BlockSpec((tile_b, out_w), lambda i, _gidx: (i, 0)),
        scratch_shapes=[
            pltpu.VMEM((2, tile_b, out_w), dtype),      # double-buffered gather slots
            pltpu.SemaphoreType.DMA((2, num_cols)),     # per-slot, per-column sems
        ],
    )

    out_padded = pl.pallas_call(
        _make_kernel(num_cols, pad_dims, col_offsets, tile_b),
        out_shape=jax.ShapeDtypeStruct((b_pad, out_w), dtype),
        grid_spec=grid_spec,
        compiler_params=pltpu.CompilerParams(
            # "arbitrary": cross-iteration DMA prefetch carries state between
            # grid steps, so the axis must execute sequentially on one core.
            dimension_semantics=("arbitrary",),
            vmem_limit_bytes=32 * 1024 * 1024,
        ),
    )(gidx, *tabs_padded)

    # Strip batch padding and per-column lane padding; static slices + concat
    # are pure layout ops handled by XLA outside the kernel.
    return jnp.concatenate(
        [out_padded[:batch, off:off + d]
         for off, d in zip(col_offsets, dims)],
        axis=1)


if __name__ == "__main__":
    key = jax.random.PRNGKey(0)

    # Synthetic column config (mirrors __init__: len(col_encoders[col]) vocab,
    # col_to_emb_dim[col] embedding dim per column).
    col_order = ["col_a", "col_b", "col_c"]
    vocab_sizes = {"col_a": 5, "col_b": 7, "col_c": 11}
    emb_dims = {"col_a": 8, "col_b": 16, "col_c": 4}
    batch = 32  # 4 batch tiles of 8 -> exercises the cross-step DMA prefetch

    keys = jax.random.split(key, 2 * len(col_order))
    tables, indices = [], []
    for i, col in enumerate(col_order):
        tables.append(jax.random.normal(keys[2 * i],
                                        (vocab_sizes[col], emb_dims[col]),
                                        dtype=jnp.float32))
        indices.append(jax.random.randint(keys[2 * i + 1], (batch,),
                                          0, vocab_sizes[col], dtype=jnp.int32))

    out = categorical_embeddings(indices, tables)
    out = jax.block_until_ready(out)

    # Pure-JAX reference: gather + concat.
    ref = jnp.concatenate(
        [jnp.take(t, idx, axis=0) for t, idx in zip(tables, indices)], axis=1)
    assert out.shape == (batch, sum(emb_dims.values())), out.shape
    assert jnp.allclose(out, ref, atol=1e-6), "mismatch vs reference"

    print("KERNEL_OK")
</pallas_src>

<mosaic_0001>
module attributes {stable_mosaic.version = 11 : i64} {
  func.func @kernel(%arg0: i32, %arg1: memref<96xi32, #tpu.memory_space<smem>>, %arg2: memref<5x128xf32, #tpu.memory_space<any>>, %arg3: memref<7x128xf32, #tpu.memory_space<any>>, %arg4: memref<11x128xf32, #tpu.memory_space<any>>, %arg5: memref<8x384xf32, #tpu.memory_space<vmem>>, %arg6: memref<2x8x384xf32, #tpu.memory_space<vmem>>, %arg7: memref<2x3x!tpu.dma_semaphore, #tpu.memory_space<semaphore_mem>>) attributes {dimension_semantics = [#tpu.dimension_semantics<arbitrary>], iteration_bounds = array<i64: 4>, scalar_prefetch = 1 : i64, scratch_operands = 2 : i64, tpu.core_type = #tpu.core_type<tc>, window_params = [{}, {}, {}, {transform_indices = @transform_3, window_bounds = array<i64: 8, 384>}]} {
    %c2_i32 = arith.constant 2 : i32
    %c0_i32 = arith.constant 0 : i32
    %0 = arith.cmpi eq, %c2_i32, %c0_i32 : i32
    %c1_i32 = arith.constant 1 : i32
    %1 = arith.select %0, %c1_i32, %c2_i32 : i32
    %2 = arith.remsi %arg0, %1 : i32
    %c0_i32_0 = arith.constant 0 : i32
    %3 = arith.cmpi ne, %2, %c0_i32_0 : i32
    %c0_i32_1 = arith.constant 0 : i32
    %4 = arith.cmpi slt, %2, %c0_i32_1 : i32
    %c0_i32_2 = arith.constant 0 : i32
    %5 = arith.cmpi slt, %1, %c0_i32_2 : i32
    %6 = arith.xori %4, %5 : i1
    %7 = arith.andi %6, %3 : i1
    %8 = arith.addi %2, %1 : i32
    %9 = arith.select %7, %8, %2 : i32
    %c1_i32_3 = arith.constant 1 : i32
    %10 = arith.subi %c1_i32_3, %9 : i32
    %c0_i32_4 = arith.constant 0 : i32
    %11 = arith.cmpi eq, %arg0, %c0_i32_4 : i32
    %12 = arith.extui %11 : i1 to i32
    %c0_i32_5 = arith.constant 0 : i32
    %13 = arith.cmpi ne, %12, %c0_i32_5 : i32
    scf.if %13 {
      %c8_i32 = arith.constant 8 : i32
      %142 = arith.muli %arg0, %c8_i32 : i32
      %c0_i32_125 = arith.constant 0 : i32
      %143 = arith.addi %142, %c0_i32_125 : i32
      %c3_i32_126 = arith.constant 3 : i32
      %144 = arith.muli %143, %c3_i32_126 : i32
      %c0_i32_127 = arith.constant 0 : i32
      %145 = arith.addi %144, %c0_i32_127 : i32
      %146 = arith.index_cast %145 : i32 to index
      %147 = memref.load %arg1[%146] : memref<96xi32, #tpu.memory_space<smem>>
      %c0_i32_128 = arith.constant 0 : i32
      %c0_i32_129 = arith.constant 0 : i32
      %148 = tpu.memref_slice %arg2[%147, %c0_i32_129] : memref<5x128xf32, #tpu.memory_space<any>> -> memref<1x128xf32, #tpu.memory_space<any>>
      %c0_i32_130 = arith.constant 0 : i32
      %c0_i32_131 = arith.constant 0 : i32
      %149 = tpu.memref_slice %arg6[%9, %c0_i32_130, %c0_i32_131] : memref<2x8x384xf32, #tpu.memory_space<vmem>> -> memref<1x1x128xf32, #tpu.memory_space<vmem>>
      %150 = tpu.memref_squeeze %149 : memref<1x1x128xf32, #tpu.memory_space<vmem>> -> memref<1x128xf32, #tpu.memory_space<vmem>>
      %151 = tpu.memref_slice %arg7[%9, %c0_i32_128] : memref<2x3x!tpu.dma_semaphore, #tpu.memory_space<semaphore_mem>> -> memref<1x1x!tpu.dma_semaphore, #tpu.memory_space<semaphore_mem>>
      %152 = tpu.memref_squeeze %151 : memref<1x1x!tpu.dma_semaphore, #tpu.memory_space<semaphore_mem>> -> memref<!tpu.dma_semaphore, #tpu.memory_space<semaphore_mem>>
      tpu.enqueue_dma source(%148 : memref<1x128xf32, #tpu.memory_space<any>>) target(%150 : memref<1x128xf32, #tpu.memory_space<vmem>>) target_semaphore(%152 : memref<!tpu.dma_semaphore, #tpu.memory_space<semaphore_mem>>)
      %c0_i32_132 = arith.constant 0 : i32
      %153 = arith.addi %142, %c0_i32_132 : i32
      %c3_i32_133 = arith.constant 3 : i32
      %154 = arith.muli %153, %c3_i32_133 : i32
      %c1_i32_134 = arith.constant 1 : i32
      %155 = arith.addi %154, %c1_i32_134 : i32
      %156 = arith.index_cast %155 : i32 to index
      %157 = memref.load %arg1[%156] : memref<96xi32, #tpu.memory_space<smem>>
      %c1_i32_135 = arith.constant 1 : i32
      %c0_i32_136 = arith.constant 0 : i32
      %158 = tpu.memref_slice %arg3[%157, %c0_i32_136] : memref<7x128xf32, #tpu.memory_space<any>> -> memref<1x128xf32, #tpu.memory_space<any>>
      %c0_i32_137 = arith.constant 0 : i32
      %c128_i32_138 = arith.constant 128 : i32
      %159 = tpu.memref_slice %arg6[%9, %c0_i32_137, %c128_i32_138] : memref<2x8x384xf32, #tpu.memory_space<vmem>> -> memref<1x1x128xf32, #tpu.memory_space<vmem>>
      %160 = tpu.memref_squeeze %159 : memref<1x1x128xf32, #tpu.memory_space<vmem>> -> memref<1x128xf32, #tpu.memory_space<vmem>>
      %161 = tpu.memref_slice %arg7[%9, %c1_i32_135] : memref<2x3x!tpu.dma_semaphore, #tpu.memory_space<semaphore_mem>> -> memref<1x1x!tpu.dma_semaphore, #tpu.memory_space<semaphore_mem>>
      %162 = tpu.memref_squeeze %161 : memref<1x1x!tpu.dma_semaphore, #tpu.memory_space<semaphore_mem>> -> memref<!tpu.dma_semaphore, #tpu.memory_space<semaphore_mem>>
      tpu.enqueue_dma source(%158 : memref<1x128xf32, #tpu.memory_space<any>>) target(%160 : memref<1x128xf32, #tpu.memory_space<vmem>>) target_semaphore(%162 : memref<!tpu.dma_semaphore, #tpu.memory_space<semaphore_mem>>)
      %c0_i32_139 = arith.constant 0 : i32
      %163 = arith.addi %142, %c0_i32_139 : i32
      %c3_i32_140 = arith.constant 3 : i32
      %164 = arith.muli %163, %c3_i32_140 : i32
      %c2_i32_141 = arith.constant 2 : i32
      %165 = arith.addi %164, %c2_i32_141 : i32
      %166 = arith.index_cast %165 : i32 to index
      %167 = memref.load %arg1[%166] : memref<96xi32, #tpu.memory_space<smem>>
      %c2_i32_142 = arith.constant 2 : i32
      %c0_i32_143 = arith.constant 0 : i32
      %168 = tpu.memref_slice %arg4[%167, %c0_i32_143] : memref<11x128xf32, #tpu.memory_space<any>> -> memref<1x128xf32, #tpu.memory_space<any>>
      %c0_i32_144 = arith.constant 0 : i32
      %c256_i32_145 = arith.constant 256 : i32
      %169 = tpu.memref_slice %arg6[%9, %c0_i32_144, %c256_i32_145] : memref<2x8x384xf32, #tpu.memory_space<vmem>> -> memref<1x1x128xf32, #tpu.memory_space<vmem>>
      %170 = tpu.memref_squeeze %169 : memref<1x1x128xf32, #tpu.memory_space<vmem>> -> memref<1x128xf32, #tpu.memory_space<vmem>>
      %171 = tpu.memref_slice %arg7[%9, %c2_i32_142] : memref<2x3x!tpu.dma_semaphore, #tpu.memory_space<semaphore_mem>> -> memref<1x1x!tpu.dma_semaphore, #tpu.memory_space<semaphore_mem>>
      %172 = tpu.memref_squeeze %171 : memref<1x1x!tpu.dma_semaphore, #tpu.memory_space<semaphore_mem>> -> memref<!tpu.dma_semaphore, #tpu.memory_space<semaphore_mem>>
      tpu.enqueue_dma source(%168 : memref<1x128xf32, #tpu.memory_space<any>>) target(%170 : memref<1x128xf32, #tpu.memory_space<vmem>>) target_semaphore(%172 : memref<!tpu.dma_semaphore, #tpu.memory_space<semaphore_mem>>)
      %c1_i32_146 = arith.constant 1 : i32
      %173 = arith.addi %142, %c1_i32_146 : i32
      %c3_i32_147 = arith.constant 3 : i32
      %174 = arith.muli %173, %c3_i32_147 : i32
      %c0_i32_148 = arith.constant 0 : i32
      %175 = arith.addi %174, %c0_i32_148 : i32
      %176 = arith.index_cast %175 : i32 to index
      %177 = memref.load %arg1[%176] : memref<96xi32, #tpu.memory_space<smem>>
      %c0_i32_149 = arith.constant 0 : i32
      %c0_i32_150 = arith.constant 0 : i32
      %178 = tpu.memref_slice %arg2[%177, %c0_i32_150] : memref<5x128xf32, #tpu.memory_space<any>> -> memref<1x128xf32, #tpu.memory_space<any>>
      %c1_i32_151 = arith.constant 1 : i32
      %c0_i32_152 = arith.constant 0 : i32
      %179 = tpu.memref_slice %arg6[%9, %c1_i32_151, %c0_i32_152] : memref<2x8x384xf32, #tpu.memory_space<vmem>> -> memref<1x1x128xf32, #tpu.memory_space<vmem>>
      %180 = tpu.memref_squeeze %179 : memref<1x1x128xf32, #tpu.memory_space<vmem>> -> memref<1x128xf32, #tpu.memory_space<vmem>>
      %181 = tpu.memref_slice %arg7[%9, %c0_i32_149] : memref<2x3x!tpu.dma_semaphore, #tpu.memory_space<semaphore_mem>> -> memref<1x1x!tpu.dma_semaphore, #tpu.memory_space<semaphore_mem>>
      %182 = tpu.memref_squeeze %181 : memref<1x1x!tpu.dma_semaphore, #tpu.memory_space<semaphore_mem>> -> memref<!tpu.dma_semaphore, #tpu.memory_space<semaphore_mem>>
      tpu.enqueue_dma source(%178 : memref<1x128xf32, #tpu.memory_space<any>>) target(%180 : memref<1x128xf32, #tpu.memory_space<vmem>>) target_semaphore(%182 : memref<!tpu.dma_semaphore, #tpu.memory_space<semaphore_mem>>)
      %c1_i32_153 = arith.constant 1 : i32
      %183 = arith.addi %142, %c1_i32_153 : i32
      %c3_i32_154 = arith.constant 3 : i32
      %184 = arith.muli %183, %c3_i32_154 : i32
      %c1_i32_155 = arith.constant 1 : i32
      %185 = arith.addi %184, %c1_i32_155 : i32
      %186 = arith.index_cast %185 : i32 to index
      %187 = memref.load %arg1[%186] : memref<96xi32, #tpu.memory_space<smem>>
      %c1_i32_156 = arith.constant 1 : i32
      %c0_i32_157 = arith.constant 0 : i32
      %188 = tpu.memref_slice %arg3[%187, %c0_i32_157] : memref<7x128xf32, #tpu.memory_space<any>> -> memref<1x128xf32, #tpu.memory_space<any>>
      %c1_i32_158 = arith.constant 1 : i32
      %c128_i32_159 = arith.constant 128 : i32
      %189 = tpu.memref_slice %arg6[%9, %c1_i32_158, %c128_i32_159] : memref<2x8x384xf32, #tpu.memory_space<vmem>> -> memref<1x1x128xf32, #tpu.memory_space<vmem>>
      %190 = tpu.memref_squeeze %189 : memref<1x1x128xf32, #tpu.memory_space<vmem>> -> memref<1x128xf32, #tpu.memory_space<vmem>>
      %191 = tpu.memref_slice %arg7[%9, %c1_i32_156] : memref<2x3x!tpu.dma_semaphore, #tpu.memory_space<semaphore_mem>> -> memref<1x1x!tpu.dma_semaphore, #tpu.memory_space<semaphore_mem>>
      %192 = tpu.memref_squeeze %191 : memref<1x1x!tpu.dma_semaphore, #tpu.memory_space<semaphore_mem>> -> memref<!tpu.dma_semaphore, #tpu.memory_space<semaphore_mem>>
      tpu.enqueue_dma source(%188 : memref<1x128xf32, #tpu.memory_space<any>>) target(%190 : memref<1x128xf32, #tpu.memory_space<vmem>>) target_semaphore(%192 : memref<!tpu.dma_semaphore, #tpu.memory_space<semaphore_mem>>)
      %c1_i32_160 = arith.constant 1 : i32
      %193 = arith.addi %142, %c1_i32_160 : i32
      %c3_i32_161 = arith.constant 3 : i32
      %194 = arith.muli %193, %c3_i32_161 : i32
      %c2_i32_162 = arith.constant 2 : i32
      %195 = arith.addi %194, %c2_i32_162 : i32
      %196 = arith.index_cast %195 : i32 to index
      %197 = memref.load %arg1[%196] : memref<96xi32, #tpu.memory_space<smem>>
      %c2_i32_163 = arith.constant 2 : i32
      %c0_i32_164 = arith.constant 0 : i32
      %198 = tpu.memref_slice %arg4[%197, %c0_i32_164] : memref<11x128xf32, #tpu.memory_space<any>> -> memref<1x128xf32, #tpu.memory_space<any>>
      %c1_i32_165 = arith.constant 1 : i32
      %c256_i32_166 = arith.constant 256 : i32
      %199 = tpu.memref_slice %arg6[%9, %c1_i32_165, %c256_i32_166] : memref<2x8x384xf32, #tpu.memory_space<vmem>> -> memref<1x1x128xf32, #tpu.memory_space<vmem>>
      %200 = tpu.memref_squeeze %199 : memref<1x1x128xf32, #tpu.memory_space<vmem>> -> memref<1x128xf32, #tpu.memory_space<vmem>>
      %201 = tpu.memref_slice %arg7[%9, %c2_i32_163] : memref<2x3x!tpu.dma_semaphore, #tpu.memory_space<semaphore_mem>> -> memref<1x1x!tpu.dma_semaphore, #tpu.memory_space<semaphore_mem>>
      %202 = tpu.memref_squeeze %201 : memref<1x1x!tpu.dma_semaphore, #tpu.memory_space<semaphore_mem>> -> memref<!tpu.dma_semaphore, #tpu.memory_space<semaphore_mem>>
      tpu.enqueue_dma source(%198 : memref<1x128xf32, #tpu.memory_space<any>>) target(%200 : memref<1x128xf32, #tpu.memory_space<vmem>>) target_semaphore(%202 : memref<!tpu.dma_semaphore, #tpu.memory_space<semaphore_mem>>)
      %c2_i32_167 = arith.constant 2 : i32
      %203 = arith.addi %142, %c2_i32_167 : i32
      %c3_i32_168 = arith.constant 3 : i32
      %204 = arith.muli %203, %c3_i32_168 : i32
      %c0_i32_169 = arith.constant 0 : i32
      %205 = arith.addi %204, %c0_i32_169 : i32
      %206 = arith.index_cast %205 : i32 to index
      %207 = memref.load %arg1[%206] : memref<96xi32, #tpu.memory_space<smem>>
      %c0_i32_170 = arith.constant 0 : i32
      %c0_i32_171 = arith.constant 0 : i32
      %208 = tpu.memref_slice %arg2[%207, %c0_i32_171] : memref<5x128xf32, #tpu.memory_space<any>> -> memref<1x128xf32, #tpu.memory_space<any>>
      %c2_i32_172 = arith.constant 2 : i32
      %c0_i32_173 = arith.constant 0 : i32
      %209 = tpu.memref_slice %arg6[%9, %c2_i32_172, %c0_i32_173] : memref<2x8x384xf32, #tpu.memory_space<vmem>> -> memref<1x1x128xf32, #tpu.memory_space<vmem>>
      %210 = tpu.memref_squeeze %209 : memref<1x1x128xf32, #tpu.memory_space<vmem>> -> memref<1x128xf32, #tpu.memory_space<vmem>>
      %211 = tpu.memref_slice %arg7[%9, %c0_i32_170] : memref<2x3x!tpu.dma_semaphore, #tpu.memory_space<semaphore_mem>> -> memref<1x1x!tpu.dma_semaphore, #tpu.memory_space<semaphore_mem>>
      %212 = tpu.memref_squeeze %211 : memref<1x1x!tpu.dma_semaphore, #tpu.memory_space<semaphore_mem>> -> memref<!tpu.dma_semaphore, #tpu.memory_space<semaphore_mem>>
      tpu.enqueue_dma source(%208 : memref<1x128xf32, #tpu.memory_space<any>>) target(%210 : memref<1x128xf32, #tpu.memory_space<vmem>>) target_semaphore(%212 : memref<!tpu.dma_semaphore, #tpu.memory_space<semaphore_mem>>)
      %c2_i32_174 = arith.constant 2 : i32
      %213 = arith.addi %142, %c2_i32_174 : i32
      %c3_i32_175 = arith.constant 3 : i32
      %214 = arith.muli %213, %c3_i32_175 : i32
      %c1_i32_176 = arith.constant 1 : i32
      %215 = arith.addi %214, %c1_i32_176 : i32
      %216 = arith.index_cast %215 : i32 to index
      %217 = memref.load %arg1[%216] : memref<96xi32, #tpu.memory_space<smem>>
      %c1_i32_177 = arith.constant 1 : i32
      %c0_i32_178 = arith.constant 0 : i32
      %218 = tpu.memref_slice %arg3[%217, %c0_i32_178] : memref<7x128xf32, #tpu.memory_space<any>> -> memref<1x128xf32, #tpu.memory_space<any>>
      %c2_i32_179 = arith.constant 2 : i32
      %c128_i32_180 = arith.constant 128 : i32
      %219 = tpu.memref_slice %arg6[%9, %c2_i32_179, %c128_i32_180] : memref<2x8x384xf32, #tpu.memory_space<vmem>> -> memref<1x1x128xf32, #tpu.memory_space<vmem>>
      %220 = tpu.memref_squeeze %219 : memref<1x1x128xf32, #tpu.memory_space<vmem>> -> memref<1x128xf32, #tpu.memory_space<vmem>>
      %221 = tpu.memref_slice %arg7[%9, %c1_i32_177] : memref<2x3x!tpu.dma_semaphore, #tpu.memory_space<semaphore_mem>> -> memref<1x1x!tpu.dma_semaphore, #tpu.memory_space<semaphore_mem>>
      %222 = tpu.memref_squeeze %221 : memref<1x1x!tpu.dma_semaphore, #tpu.memory_space<semaphore_mem>> -> memref<!tpu.dma_semaphore, #tpu.memory_space<semaphore_mem>>
      tpu.enqueue_dma source(%218 : memref<1x128xf32, #tpu.memory_space<any>>) target(%220 : memref<1x128xf32, #tpu.memory_space<vmem>>) target_semaphore(%222 : memref<!tpu.dma_semaphore, #tpu.memory_space<semaphore_mem>>)
      %c2_i32_181 = arith.constant 2 : i32
      %223 = arith.addi %142, %c2_i32_181 : i32
      %c3_i32_182 = arith.constant 3 : i32
      %224 = arith.muli %223, %c3_i32_182 : i32
      %c2_i32_183 = arith.constant 2 : i32
      %225 = arith.addi %224, %c2_i32_183 : i32
      %226 = arith.index_cast %225 : i32 to index
      %227 = memref.load %arg1[%226] : memref<96xi32, #tpu.memory_space<smem>>
      %c2_i32_184 = arith.constant 2 : i32
      %c0_i32_185 = arith.constant 0 : i32
      %228 = tpu.memref_slice %arg4[%227, %c0_i32_185] : memref<11x128xf32, #tpu.memory_space<any>> -> memref<1x128xf32, #tpu.memory_space<any>>
      %c2_i32_186 = arith.constant 2 : i32
      %c256_i32_187 = arith.constant 256 : i32
      %229 = tpu.memref_slice %arg6[%9, %c2_i32_186, %c256_i32_187] : memref<2x8x384xf32, #tpu.memory_space<vmem>> -> memref<1x1x128xf32, #tpu.memory_space<vmem>>
      %230 = tpu.memref_squeeze %229 : memref<1x1x128xf32, #tpu.memory_space<vmem>> -> memref<1x128xf32, #tpu.memory_space<vmem>>
      %231 = tpu.memref_slice %arg7[%9, %c2_i32_184] : memref<2x3x!tpu.dma_semaphore, #tpu.memory_space<semaphore_mem>> -> memref<1x1x!tpu.dma_semaphore, #tpu.memory_space<semaphore_mem>>
      %232 = tpu.memref_squeeze %231 : memref<1x1x!tpu.dma_semaphore, #tpu.memory_space<semaphore_mem>> -> memref<!tpu.dma_semaphore, #tpu.memory_space<semaphore_mem>>
      tpu.enqueue_dma source(%228 : memref<1x128xf32, #tpu.memory_space<any>>) target(%230 : memref<1x128xf32, #tpu.memory_space<vmem>>) target_semaphore(%232 : memref<!tpu.dma_semaphore, #tpu.memory_space<semaphore_mem>>)
      %c3_i32_188 = arith.constant 3 : i32
      %233 = arith.addi %142, %c3_i32_188 : i32
      %c3_i32_189 = arith.constant 3 : i32
      %234 = arith.muli %233, %c3_i32_189 : i32
      %c0_i32_190 = arith.constant 0 : i32
      %235 = arith.addi %234, %c0_i32_190 : i32
      %236 = arith.index_cast %235 : i32 to index
      %237 = memref.load %arg1[%236] : memref<96xi32, #tpu.memory_space<smem>>
      %c0_i32_191 = arith.constant 0 : i32
      %c0_i32_192 = arith.constant 0 : i32
      %238 = tpu.memref_slice %arg2[%237, %c0_i32_192] : memref<5x128xf32, #tpu.memory_space<any>> -> memref<1x128xf32, #tpu.memory_space<any>>
      %c3_i32_193 = arith.constant 3 : i32
      %c0_i32_194 = arith.constant 0 : i32
      %239 = tpu.memref_slice %arg6[%9, %c3_i32_193, %c0_i32_194] : memref<2x8x384xf32, #tpu.memory_space<vmem>> -> memref<1x1x128xf32, #tpu.memory_space<vmem>>
      %240 = tpu.memref_squeeze %239 : memref<1x1x128xf32, #tpu.memory_space<vmem>> -> memref<1x128xf32, #tpu.memory_space<vmem>>
      %241 = tpu.memref_slice %arg7[%9, %c0_i32_191] : memref<2x3x!tpu.dma_semaphore, #tpu.memory_space<semaphore_mem>> -> memref<1x1x!tpu.dma_semaphore, #tpu.memory_space<semaphore_mem>>
      %242 = tpu.memref_squeeze %241 : memref<1x1x!tpu.dma_semaphore, #tpu.memory_space<semaphore_mem>> -> memref<!tpu.dma_semaphore, #tpu.memory_space<semaphore_mem>>
      tpu.enqueue_dma source(%238 : memref<1x128xf32, #tpu.memory_space<any>>) target(%240 : memref<1x128xf32, #tpu.memory_space<vmem>>) target_semaphore(%242 : memref<!tpu.dma_semaphore, #tpu.memory_space<semaphore_mem>>)
      %c3_i32_195 = arith.constant 3 : i32
      %243 = arith.addi %142, %c3_i32_195 : i32
      %c3_i32_196 = arith.constant 3 : i32
      %244 = arith.muli %243, %c3_i32_196 : i32
      %c1_i32_197 = arith.constant 1 : i32
      %245 = arith.addi %244, %c1_i32_197 : i32
      %246 = arith.index_cast %245 : i32 to index
      %247 = memref.load %arg1[%246] : memref<96xi32, #tpu.memory_space<smem>>
      %c1_i32_198 = arith.constant 1 : i32
      %c0_i32_199 = arith.constant 0 : i32
      %248 = tpu.memref_slice %arg3[%247, %c0_i32_199] : memref<7x128xf32, #tpu.memory_space<any>> -> memref<1x128xf32, #tpu.memory_space<any>>
      %c3_i32_200 = arith.constant 3 : i32
      %c128_i32_201 = arith.constant 128 : i32
      %249 = tpu.memref_slice %arg6[%9, %c3_i32_200, %c128_i32_201] : memref<2x8x384xf32, #tpu.memory_space<vmem>> -> memref<1x1x128xf32, #tpu.memory_space<vmem>>
      %250 = tpu.memref_squeeze %249 : memref<1x1x128xf32, #tpu.memory_space<vmem>> -> memref<1x128xf32, #tpu.memory_space<vmem>>
      %251 = tpu.memref_slice %arg7[%9, %c1_i32_198] : memref<2x3x!tpu.dma_semaphore, #tpu.memory_space<semaphore_mem>> -> memref<1x1x!tpu.dma_semaphore, #tpu.memory_space<semaphore_mem>>
      %252 = tpu.memref_squeeze %251 : memref<1x1x!tpu.dma_semaphore, #tpu.memory_space<semaphore_mem>> -> memref<!tpu.dma_semaphore, #tpu.memory_space<semaphore_mem>>
      tpu.enqueue_dma source(%248 : memref<1x128xf32, #tpu.memory_space<any>>) target(%250 : memref<1x128xf32, #tpu.memory_space<vmem>>) target_semaphore(%252 : memref<!tpu.dma_semaphore, #tpu.memory_space<semaphore_mem>>)
      %c3_i32_202 = arith.constant 3 : i32
      %253 = arith.addi %142, %c3_i32_202 : i32
      %c3_i32_203 = arith.constant 3 : i32
      %254 = arith.muli %253, %c3_i32_203 : i32
      %c2_i32_204 = arith.constant 2 : i32
      %255 = arith.addi %254, %c2_i32_204 : i32
      %256 = arith.index_cast %255 : i32 to index
      %257 = memref.load %arg1[%256] : memref<96xi32, #tpu.memory_space<smem>>
      %c2_i32_205 = arith.constant 2 : i32
      %c0_i32_206 = arith.constant 0 : i32
      %258 = tpu.memref_slice %arg4[%257, %c0_i32_206] : memref<11x128xf32, #tpu.memory_space<any>> -> memref<1x128xf32, #tpu.memory_space<any>>
      %c3_i32_207 = arith.constant 3 : i32
      %c256_i32_208 = arith.constant 256 : i32
      %259 = tpu.memref_slice %arg6[%9, %c3_i32_207, %c256_i32_208] : memref<2x8x384xf32, #tpu.memory_space<vmem>> -> memref<1x1x128xf32, #tpu.memory_space<vmem>>
      %260 = tpu.memref_squeeze %259 : memref<1x1x128xf32, #tpu.memory_space<vmem>> -> memref<1x128xf32, #tpu.memory_space<vmem>>
      %261 = tpu.memref_slice %arg7[%9, %c2_i32_205] : memref<2x3x!tpu.dma_semaphore, #tpu.memory_space<semaphore_mem>> -> memref<1x1x!tpu.dma_semaphore, #tpu.memory_space<semaphore_mem>>
      %262 = tpu.memref_squeeze %261 : memref<1x1x!tpu.dma_semaphore, #tpu.memory_space<semaphore_mem>> -> memref<!tpu.dma_semaphore, #tpu.memory_space<semaphore_mem>>
      tpu.enqueue_dma source(%258 : memref<1x128xf32, #tpu.memory_space<any>>) target(%260 : memref<1x128xf32, #tpu.memory_space<vmem>>) target_semaphore(%262 : memref<!tpu.dma_semaphore, #tpu.memory_space<semaphore_mem>>)
      %c4_i32_209 = arith.constant 4 : i32
      %263 = arith.addi %142, %c4_i32_209 : i32
      %c3_i32_210 = arith.constant 3 : i32
      %264 = arith.muli %263, %c3_i32_210 : i32
      %c0_i32_211 = arith.constant 0 : i32
      %265 = arith.addi %264, %c0_i32_211 : i32
      %266 = arith.index_cast %265 : i32 to index
      %267 = memref.load %arg1[%266] : memref<96xi32, #tpu.memory_space<smem>>
      %c0_i32_212 = arith.constant 0 : i32
      %c0_i32_213 = arith.constant 0 : i32
      %268 = tpu.memref_slice %arg2[%267, %c0_i32_213] : memref<5x128xf32, #tpu.memory_space<any>> -> memref<1x128xf32, #tpu.memory_space<any>>
      %c4_i32_214 = arith.constant 4 : i32
      %c0_i32_215 = arith.constant 0 : i32
      %269 = tpu.memref_slice %arg6[%9, %c4_i32_214, %c0_i32_215] : memref<2x8x384xf32, #tpu.memory_space<vmem>> -> memref<1x1x128xf32, #tpu.memory_space<vmem>>
      %270 = tpu.memref_squeeze %269 : memref<1x1x128xf32, #tpu.memory_space<vmem>> -> memref<1x128xf32, #tpu.memory_space<vmem>>
      %271 = tpu.memref_slice %arg7[%9, %c0_i32_212] : memref<2x3x!tpu.dma_semaphore, #tpu.memory_space<semaphore_mem>> -> memref<1x1x!tpu.dma_semaphore, #tpu.memory_space<semaphore_mem>>
      %272 = tpu.memref_squeeze %271 : memref<1x1x!tpu.dma_semaphore, #tpu.memory_space<semaphore_mem>> -> memref<!tpu.dma_semaphore, #tpu.memory_space<semaphore_mem>>
      tpu.enqueue_dma source(%268 : memref<1x128xf32, #tpu.memory_space<any>>) target(%270 : memref<1x128xf32, #tpu.memory_space<vmem>>) target_semaphore(%272 : memref<!tpu.dma_semaphore, #tpu.memory_space<semaphore_mem>>)
      %c4_i32_216 = arith.constant 4 : i32
      %273 = arith.addi %142, %c4_i32_216 : i32
      %c3_i32_217 = arith.constant 3 : i32
      %274 = arith.muli %273, %c3_i32_217 : i32
      %c1_i32_218 = arith.constant 1 : i32
      %275 = arith.addi %274, %c1_i32_218 : i32
      %276 = arith.index_cast %275 : i32 to index
      %277 = memref.load %arg1[%276] : memref<96xi32, #tpu.memory_space<smem>>
      %c1_i32_219 = arith.constant 1 : i32
      %c0_i32_220 = arith.constant 0 : i32
      %278 = tpu.memref_slice %arg3[%277, %c0_i32_220] : memref<7x128xf32, #tpu.memory_space<any>> -> memref<1x128xf32, #tpu.memory_space<any>>
      %c4_i32_221 = arith.constant 4 : i32
      %c128_i32_222 = arith.constant 128 : i32
      %279 = tpu.memref_slice %arg6[%9, %c4_i32_221, %c128_i32_222] : memref<2x8x384xf32, #tpu.memory_space<vmem>> -> memref<1x1x128xf32, #tpu.memory_space<vmem>>
      %280 = tpu.memref_squeeze %279 : memref<1x1x128xf32, #tpu.memory_space<vmem>> -> memref<1x128xf32, #tpu.memory_space<vmem>>
      %281 = tpu.memref_slice %arg7[%9, %c1_i32_219] : memref<2x3x!tpu.dma_semaphore, #tpu.memory_space<semaphore_mem>> -> memref<1x1x!tpu.dma_semaphore, #tpu.memory_space<semaphore_mem>>
      %282 = tpu.memref_squeeze %281 : memref<1x1x!tpu.dma_semaphore, #tpu.memory_space<semaphore_mem>> -> memref<!tpu.dma_semaphore, #tpu.memory_space<semaphore_mem>>
      tpu.enqueue_dma source(%278 : memref<1x128xf32, #tpu.memory_space<any>>) target(%280 : memref<1x128xf32, #tpu.memory_space<vmem>>) target_semaphore(%282 : memref<!tpu.dma_semaphore, #tpu.memory_space<semaphore_mem>>)
      %c4_i32_223 = arith.constant 4 : i32
      %283 = arith.addi %142, %c4_i32_223 : i32
      %c3_i32_224 = arith.constant 3 : i32
      %284 = arith.muli %283, %c3_i32_224 : i32
      %c2_i32_225 = arith.constant 2 : i32
      %285 = arith.addi %284, %c2_i32_225 : i32
      %286 = arith.index_cast %285 : i32 to index
      %287 = memref.load %arg1[%286] : memref<96xi32, #tpu.memory_space<smem>>
      %c2_i32_226 = arith.constant 2 : i32
      %c0_i32_227 = arith.constant 0 : i32
      %288 = tpu.memref_slice %arg4[%287, %c0_i32_227] : memref<11x128xf32, #tpu.memory_space<any>> -> memref<1x128xf32, #tpu.memory_space<any>>
      %c4_i32_228 = arith.constant 4 : i32
      %c256_i32_229 = arith.constant 256 : i32
      %289 = tpu.memref_slice %arg6[%9, %c4_i32_228, %c256_i32_229] : memref<2x8x384xf32, #tpu.memory_space<vmem>> -> memref<1x1x128xf32, #tpu.memory_space<vmem>>
      %290 = tpu.memref_squeeze %289 : memref<1x1x128xf32, #tpu.memory_space<vmem>> -> memref<1x128xf32, #tpu.memory_space<vmem>>
      %291 = tpu.memref_slice %arg7[%9, %c2_i32_226] : memref<2x3x!tpu.dma_semaphore, #tpu.memory_space<semaphore_mem>> -> memref<1x1x!tpu.dma_semaphore, #tpu.memory_space<semaphore_mem>>
      %292 = tpu.memref_squeeze %291 : memref<1x1x!tpu.dma_semaphore, #tpu.memory_space<semaphore_mem>> -> memref<!tpu.dma_semaphore, #tpu.memory_space<semaphore_mem>>
      tpu.enqueue_dma source(%288 : memref<1x128xf32, #tpu.memory_space<any>>) target(%290 : memref<1x128xf32, #tpu.memory_space<vmem>>) target_semaphore(%292 : memref<!tpu.dma_semaphore, #tpu.memory_space<semaphore_mem>>)
      %c5_i32_230 = arith.constant 5 : i32
      %293 = arith.addi %142, %c5_i32_230 : i32
      %c3_i32_231 = arith.constant 3 : i32
      %294 = arith.muli %293, %c3_i32_231 : i32
      %c0_i32_232 = arith.constant 0 : i32
      %295 = arith.addi %294, %c0_i32_232 : i32
      %296 = arith.index_cast %295 : i32 to index
      %297 = memref.load %arg1[%296] : memref<96xi32, #tpu.memory_space<smem>>
      %c0_i32_233 = arith.constant 0 : i32
      %c0_i32_234 = arith.constant 0 : i32
      %298 = tpu.memref_slice %arg2[%297, %c0_i32_234] : memref<5x128xf32, #tpu.memory_space<any>> -> memref<1x128xf32, #tpu.memory_space<any>>
      %c5_i32_235 = arith.constant 5 : i32
      %c0_i32_236 = arith.constant 0 : i32
      %299 = tpu.memref_slice %arg6[%9, %c5_i32_235, %c0_i32_236] : memref<2x8x384xf32, #tpu.memory_space<vmem>> -> memref<1x1x128xf32, #tpu.memory_space<vmem>>
      %300 = tpu.memref_squeeze %299 : memref<1x1x128xf32, #tpu.memory_space<vmem>> -> memref<1x128xf32, #tpu.memory_space<vmem>>
      %301 = tpu.memref_slice %arg7[%9, %c0_i32_233] : memref<2x3x!tpu.dma_semaphore, #tpu.memory_space<semaphore_mem>> -> memref<1x1x!tpu.dma_semaphore, #tpu.memory_space<semaphore_mem>>
      %302 = tpu.memref_squeeze %301 : memref<1x1x!tpu.dma_semaphore, #tpu.memory_space<semaphore_mem>> -> memref<!tpu.dma_semaphore, #tpu.memory_space<semaphore_mem>>
      tpu.enqueue_dma source(%298 : memref<1x128xf32, #tpu.memory_space<any>>) target(%300 : memref<1x128xf32, #tpu.memory_space<vmem>>) target_semaphore(%302 : memref<!tpu.dma_semaphore, #tpu.memory_space<semaphore_mem>>)
      %c5_i32_237 = arith.constant 5 : i32
      %303 = arith.addi %142, %c5_i32_237 : i32
      %c3_i32_238 = arith.constant 3 : i32
      %304 = arith.muli %303, %c3_i32_238 : i32
      %c1_i32_239 = arith.constant 1 : i32
      %305 = arith.addi %304, %c1_i32_239 : i32
      %306 = arith.index_cast %305 : i32 to index
      %307 = memref.load %arg1[%306] : memref<96xi32, #tpu.memory_space<smem>>
      %c1_i32_240 = arith.constant 1 : i32
      %c0_i32_241 = arith.constant 0 : i32
      %308 = tpu.memref_slice %arg3[%307, %c0_i32_241] : memref<7x128xf32, #tpu.memory_space<any>> -> memref<1x128xf32, #tpu.memory_space<any>>
      %c5_i32_242 = arith.constant 5 : i32
      %c128_i32_243 = arith.constant 128 : i32
      %309 = tpu.memref_slice %arg6[%9, %c5_i32_242, %c128_i32_243] : memref<2x8x384xf32, #tpu.memory_space<vmem>> -> memref<1x1x128xf32, #tpu.memory_space<vmem>>
      %310 = tpu.memref_squeeze %309 : memref<1x1x128xf32, #tpu.memory_space<vmem>> -> memref<1x128xf32, #tpu.memory_space<vmem>>
      %311 = tpu.memref_slice %arg7[%9, %c1_i32_240] : memref<2x3x!tpu.dma_semaphore, #tpu.memory_space<semaphore_mem>> -> memref<1x1x!tpu.dma_semaphore, #tpu.memory_space<semaphore_mem>>
      %312 = tpu.memref_squeeze %311 : memref<1x1x!tpu.dma_semaphore, #tpu.memory_space<semaphore_mem>> -> memref<!tpu.dma_semaphore, #tpu.memory_space<semaphore_mem>>
      tpu.enqueue_dma source(%308 : memref<1x128xf32, #tpu.memory_space<any>>) target(%310 : memref<1x128xf32, #tpu.memory_space<vmem>>) target_semaphore(%312 : memref<!tpu.dma_semaphore, #tpu.memory_space<semaphore_mem>>)
      %c5_i32_244 = arith.constant 5 : i32
      %313 = arith.addi %142, %c5_i32_244 : i32
      %c3_i32_245 = arith.constant 3 : i32
      %314 = arith.muli %313, %c3_i32_245 : i32
      %c2_i32_246 = arith.constant 2 : i32
      %315 = arith.addi %314, %c2_i32_246 : i32
      %316 = arith.index_cast %315 : i32 to index
      %317 = memref.load %arg1[%316] : memref<96xi32, #tpu.memory_space<smem>>
      %c2_i32_247 = arith.constant 2 : i32
      %c0_i32_248 = arith.constant 0 : i32
      %318 = tpu.memref_slice %arg4[%317, %c0_i32_248] : memref<11x128xf32, #tpu.memory_space<any>> -> memref<1x128xf32, #tpu.memory_space<any>>
      %c5_i32_249 = arith.constant 5 : i32
      %c256_i32_250 = arith.constant 256 : i32
      %319 = tpu.memref_slice %arg6[%9, %c5_i32_249, %c256_i32_250] : memref<2x8x384xf32, #tpu.memory_space<vmem>> -> memref<1x1x128xf32, #tpu.memory_space<vmem>>
      %320 = tpu.memref_squeeze %319 : memref<1x1x128xf32, #tpu.memory_space<vmem>> -> memref<1x128xf32, #tpu.memory_space<vmem>>
      %321 = tpu.memref_slice %arg7[%9, %c2_i32_247] : memref<2x3x!tpu.dma_semaphore, #tpu.memory_space<semaphore_mem>> -> memref<1x1x!tpu.dma_semaphore, #tpu.memory_space<semaphore_mem>>
      %322 = tpu.memref_squeeze %321 : memref<1x1x!tpu.dma_semaphore, #tpu.memory_space<semaphore_mem>> -> memref<!tpu.dma_semaphore, #tpu.memory_space<semaphore_mem>>
      tpu.enqueue_dma source(%318 : memref<1x128xf32, #tpu.memory_space<any>>) target(%320 : memref<1x128xf32, #tpu.memory_space<vmem>>) target_semaphore(%322 : memref<!tpu.dma_semaphore, #tpu.memory_space<semaphore_mem>>)
      %c6_i32_251 = arith.constant 6 : i32
      %323 = arith.addi %142, %c6_i32_251 : i32
      %c3_i32_252 = arith.constant 3 : i32
      %324 = arith.muli %323, %c3_i32_252 : i32
      %c0_i32_253 = arith.constant 0 : i32
      %325 = arith.addi %324, %c0_i32_253 : i32
      %326 = arith.index_cast %325 : i32 to index
      %327 = memref.load %arg1[%326] : memref<96xi32, #tpu.memory_space<smem>>
      %c0_i32_254 = arith.constant 0 : i32
      %c0_i32_255 = arith.constant 0 : i32
      %328 = tpu.memref_slice %arg2[%327, %c0_i32_255] : memref<5x128xf32, #tpu.memory_space<any>> -> memref<1x128xf32, #tpu.memory_space<any>>
      %c6_i32_256 = arith.constant 6 : i32
      %c0_i32_257 = arith.constant 0 : i32
      %329 = tpu.memref_slice %arg6[%9, %c6_i32_256, %c0_i32_257] : memref<2x8x384xf32, #tpu.memory_space<vmem>> -> memref<1x1x128xf32, #tpu.memory_space<vmem>>
      %330 = tpu.memref_squeeze %329 : memref<1x1x128xf32, #tpu.memory_space<vmem>> -> memref<1x128xf32, #tpu.memory_space<vmem>>
      %331 = tpu.memref_slice %arg7[%9, %c0_i32_254] : memref<2x3x!tpu.dma_semaphore, #tpu.memory_space<semaphore_mem>> -> memref<1x1x!tpu.dma_semaphore, #tpu.memory_space<semaphore_mem>>
      %332 = tpu.memref_squeeze %331 : memref<1x1x!tpu.dma_semaphore, #tpu.memory_space<semaphore_mem>> -> memref<!tpu.dma_semaphore, #tpu.memory_space<semaphore_mem>>
      tpu.enqueue_dma source(%328 : memref<1x128xf32, #tpu.memory_space<any>>) target(%330 : memref<1x128xf32, #tpu.memory_space<vmem>>) target_semaphore(%332 : memref<!tpu.dma_semaphore, #tpu.memory_space<semaphore_mem>>)
      %c6_i32_258 = arith.constant 6 : i32
      %333 = arith.addi %142, %c6_i32_258 : i32
      %c3_i32_259 = arith.constant 3 : i32
      %334 = arith.muli %333, %c3_i32_259 : i32
      %c1_i32_260 = arith.constant 1 : i32
      %335 = arith.addi %334, %c1_i32_260 : i32
      %336 = arith.index_cast %335 : i32 to index
      %337 = memref.load %arg1[%336] : memref<96xi32, #tpu.memory_space<smem>>
      %c1_i32_261 = arith.constant 1 : i32
      %c0_i32_262 = arith.constant 0 : i32
      %338 = tpu.memref_slice %arg3[%337, %c0_i32_262] : memref<7x128xf32, #tpu.memory_space<any>> -> memref<1x128xf32, #tpu.memory_space<any>>
      %c6_i32_263 = arith.constant 6 : i32
      %c128_i32_264 = arith.constant 128 : i32
      %339 = tpu.memref_slice %arg6[%9, %c6_i32_263, %c128_i32_264] : memref<2x8x384xf32, #tpu.memory_space<vmem>> -> memref<1x1x128xf32, #tpu.memory_space<vmem>>
      %340 = tpu.memref_squeeze %339 : memref<1x1x128xf32, #tpu.memory_space<vmem>> -> memref<1x128xf32, #tpu.memory_space<vmem>>
      %341 = tpu.memref_slice %arg7[%9, %c1_i32_261] : memref<2x3x!tpu.dma_semaphore, #tpu.memory_space<semaphore_mem>> -> memref<1x1x!tpu.dma_semaphore, #tpu.memory_space<semaphore_mem>>
      %342 = tpu.memref_squeeze %341 : memref<1x1x!tpu.dma_semaphore, #tpu.memory_space<semaphore_mem>> -> memref<!tpu.dma_semaphore, #tpu.memory_space<semaphore_mem>>
      tpu.enqueue_dma source(%338 : memref<1x128xf32, #tpu.memory_space<any>>) target(%340 : memref<1x128xf32, #tpu.memory_space<vmem>>) target_semaphore(%342 : memref<!tpu.dma_semaphore, #tpu.memory_space<semaphore_mem>>)
      %c6_i32_265 = arith.constant 6 : i32
      %343 = arith.addi %142, %c6_i32_265 : i32
      %c3_i32_266 = arith.constant 3 : i32
      %344 = arith.muli %343, %c3_i32_266 : i32
      %c2_i32_267 = arith.constant 2 : i32
      %345 = arith.addi %344, %c2_i32_267 : i32
      %346 = arith.index_cast %345 : i32 to index
      %347 = memref.load %arg1[%346] : memref<96xi32, #tpu.memory_space<smem>>
      %c2_i32_268 = arith.constant 2 : i32
      %c0_i32_269 = arith.constant 0 : i32
      %348 = tpu.memref_slice %arg4[%347, %c0_i32_269] : memref<11x128xf32, #tpu.memory_space<any>> -> memref<1x128xf32, #tpu.memory_space<any>>
      %c6_i32_270 = arith.constant 6 : i32
      %c256_i32_271 = arith.constant 256 : i32
      %349 = tpu.memref_slice %arg6[%9, %c6_i32_270, %c256_i32_271] : memref<2x8x384xf32, #tpu.memory_space<vmem>> -> memref<1x1x128xf32, #tpu.memory_space<vmem>>
      %350 = tpu.memref_squeeze %349 : memref<1x1x128xf32, #tpu.memory_space<vmem>> -> memref<1x128xf32, #tpu.memory_space<vmem>>
      %351 = tpu.memref_slice %arg7[%9, %c2_i32_268] : memref<2x3x!tpu.dma_semaphore, #tpu.memory_space<semaphore_mem>> -> memref<1x1x!tpu.dma_semaphore, #tpu.memory_space<semaphore_mem>>
      %352 = tpu.memref_squeeze %351 : memref<1x1x!tpu.dma_semaphore, #tpu.memory_space<semaphore_mem>> -> memref<!tpu.dma_semaphore, #tpu.memory_space<semaphore_mem>>
      tpu.enqueue_dma source(%348 : memref<1x128xf32, #tpu.memory_space<any>>) target(%350 : memref<1x128xf32, #tpu.memory_space<vmem>>) target_semaphore(%352 : memref<!tpu.dma_semaphore, #tpu.memory_space<semaphore_mem>>)
      %c7_i32_272 = arith.constant 7 : i32
      %353 = arith.addi %142, %c7_i32_272 : i32
      %c3_i32_273 = arith.constant 3 : i32
      %354 = arith.muli %353, %c3_i32_273 : i32
      %c0_i32_274 = arith.constant 0 : i32
      %355 = arith.addi %354, %c0_i32_274 : i32
      %356 = arith.index_cast %355 : i32 to index
      %357 = memref.load %arg1[%356] : memref<96xi32, #tpu.memory_space<smem>>
      %c0_i32_275 = arith.constant 0 : i32
      %c0_i32_276 = arith.constant 0 : i32
      %358 = tpu.memref_slice %arg2[%357, %c0_i32_276] : memref<5x128xf32, #tpu.memory_space<any>> -> memref<1x128xf32, #tpu.memory_space<any>>
      %c7_i32_277 = arith.constant 7 : i32
      %c0_i32_278 = arith.constant 0 : i32
      %359 = tpu.memref_slice %arg6[%9, %c7_i32_277, %c0_i32_278] : memref<2x8x384xf32, #tpu.memory_space<vmem>> -> memref<1x1x128xf32, #tpu.memory_space<vmem>>
      %360 = tpu.memref_squeeze %359 : memref<1x1x128xf32, #tpu.memory_space<vmem>> -> memref<1x128xf32, #tpu.memory_space<vmem>>
      %361 = tpu.memref_slice %arg7[%9, %c0_i32_275] : memref<2x3x!tpu.dma_semaphore, #tpu.memory_space<semaphore_mem>> -> memref<1x1x!tpu.dma_semaphore, #tpu.memory_space<semaphore_mem>>
      %362 = tpu.memref_squeeze %361 : memref<1x1x!tpu.dma_semaphore, #tpu.memory_space<semaphore_mem>> -> memref<!tpu.dma_semaphore, #tpu.memory_space<semaphore_mem>>
      tpu.enqueue_dma source(%358 : memref<1x128xf32, #tpu.memory_space<any>>) target(%360 : memref<1x128xf32, #tpu.memory_space<vmem>>) target_semaphore(%362 : memref<!tpu.dma_semaphore, #tpu.memory_space<semaphore_mem>>)
      %c7_i32_279 = arith.constant 7 : i32
      %363 = arith.addi %142, %c7_i32_279 : i32
      %c3_i32_280 = arith.constant 3 : i32
      %364 = arith.muli %363, %c3_i32_280 : i32
      %c1_i32_281 = arith.constant 1 : i32
      %365 = arith.addi %364, %c1_i32_281 : i32
      %366 = arith.index_cast %365 : i32 to index
      %367 = memref.load %arg1[%366] : memref<96xi32, #tpu.memory_space<smem>>
      %c1_i32_282 = arith.constant 1 : i32
      %c0_i32_283 = arith.constant 0 : i32
      %368 = tpu.memref_slice %arg3[%367, %c0_i32_283] : memref<7x128xf32, #tpu.memory_space<any>> -> memref<1x128xf32, #tpu.memory_space<any>>
      %c7_i32_284 = arith.constant 7 : i32
      %c128_i32_285 = arith.constant 128 : i32
      %369 = tpu.memref_slice %arg6[%9, %c7_i32_284, %c128_i32_285] : memref<2x8x384xf32, #tpu.memory_space<vmem>> -> memref<1x1x128xf32, #tpu.memory_space<vmem>>
      %370 = tpu.memref_squeeze %369 : memref<1x1x128xf32, #tpu.memory_space<vmem>> -> memref<1x128xf32, #tpu.memory_space<vmem>>
      %371 = tpu.memref_slice %arg7[%9, %c1_i32_282] : memref<2x3x!tpu.dma_semaphore, #tpu.memory_space<semaphore_mem>> -> memref<1x1x!tpu.dma_semaphore, #tpu.memory_space<semaphore_mem>>
      %372 = tpu.memref_squeeze %371 : memref<1x1x!tpu.dma_semaphore, #tpu.memory_space<semaphore_mem>> -> memref<!tpu.dma_semaphore, #tpu.memory_space<semaphore_mem>>
      tpu.enqueue_dma source(%368 : memref<1x128xf32, #tpu.memory_space<any>>) target(%370 : memref<1x128xf32, #tpu.memory_space<vmem>>) target_semaphore(%372 : memref<!tpu.dma_semaphore, #tpu.memory_space<semaphore_mem>>)
      %c7_i32_286 = arith.constant 7 : i32
      %373 = arith.addi %142, %c7_i32_286 : i32
      %c3_i32_287 = arith.constant 3 : i32
      %374 = arith.muli %373, %c3_i32_287 : i32
      %c2_i32_288 = arith.constant 2 : i32
      %375 = arith.addi %374, %c2_i32_288 : i32
      %376 = arith.index_cast %375 : i32 to index
      %377 = memref.load %arg1[%376] : memref<96xi32, #tpu.memory_space<smem>>
      %c2_i32_289 = arith.constant 2 : i32
      %c0_i32_290 = arith.constant 0 : i32
      %378 = tpu.memref_slice %arg4[%377, %c0_i32_290] : memref<11x128xf32, #tpu.memory_space<any>> -> memref<1x128xf32, #tpu.memory_space<any>>
      %c7_i32_291 = arith.constant 7 : i32
      %c256_i32_292 = arith.constant 256 : i32
      %379 = tpu.memref_slice %arg6[%9, %c7_i32_291, %c256_i32_292] : memref<2x8x384xf32, #tpu.memory_space<vmem>> -> memref<1x1x128xf32, #tpu.memory_space<vmem>>
      %380 = tpu.memref_squeeze %379 : memref<1x1x128xf32, #tpu.memory_space<vmem>> -> memref<1x128xf32, #tpu.memory_space<vmem>>
      %381 = tpu.memref_slice %arg7[%9, %c2_i32_289] : memref<2x3x!tpu.dma_semaphore, #tpu.memory_space<semaphore_mem>> -> memref<1x1x!tpu.dma_semaphore, #tpu.memory_space<semaphore_mem>>
      %382 = tpu.memref_squeeze %381 : memref<1x1x!tpu.dma_semaphore, #tpu.memory_space<semaphore_mem>> -> memref<!tpu.dma_semaphore, #tpu.memory_space<semaphore_mem>>
      tpu.enqueue_dma source(%378 : memref<1x128xf32, #tpu.memory_space<any>>) target(%380 : memref<1x128xf32, #tpu.memory_space<vmem>>) target_semaphore(%382 : memref<!tpu.dma_semaphore, #tpu.memory_space<semaphore_mem>>)
    } else {
    }
    %c0_i32_6 = arith.constant 0 : i32
    %c0_i32_7 = arith.constant 0 : i32
    %c0_i32_8 = arith.constant 0 : i32
    %14 = tpu.memref_slice %arg2[%c0_i32_7, %c0_i32_8] : memref<5x128xf32, #tpu.memory_space<any>> -> memref<1x128xf32, #tpu.memory_space<any>>
    %c0_i32_9 = arith.constant 0 : i32
    %c0_i32_10 = arith.constant 0 : i32
    %15 = tpu.memref_slice %arg6[%9, %c0_i32_9, %c0_i32_10] : memref<2x8x384xf32, #tpu.memory_space<vmem>> -> memref<1x1x128xf32, #tpu.memory_space<vmem>>
    %16 = tpu.memref_squeeze %15 : memref<1x1x128xf32, #tpu.memory_space<vmem>> -> memref<1x128xf32, #tpu.memory_space<vmem>>
    %17 = tpu.memref_slice %arg7[%9, %c0_i32_6] : memref<2x3x!tpu.dma_semaphore, #tpu.memory_space<semaphore_mem>> -> memref<1x1x!tpu.dma_semaphore, #tpu.memory_space<semaphore_mem>>
    %18 = tpu.memref_squeeze %17 : memref<1x1x!tpu.dma_semaphore, #tpu.memory_space<semaphore_mem>> -> memref<!tpu.dma_semaphore, #tpu.memory_space<semaphore_mem>>
    tpu.wait_dma2 semaphore(%18 : memref<!tpu.dma_semaphore, #tpu.memory_space<semaphore_mem>>) src(%14 : memref<1x128xf32, #tpu.memory_space<any>>) dst(%16 : memref<1x128xf32, #tpu.memory_space<vmem>>)
    %c1_i32_11 = arith.constant 1 : i32
    %c0_i32_12 = arith.constant 0 : i32
    %c0_i32_13 = arith.constant 0 : i32
    %19 = tpu.memref_slice %arg3[%c0_i32_12, %c0_i32_13] : memref<7x128xf32, #tpu.memory_space<any>> -> memref<1x128xf32, #tpu.memory_space<any>>
    %c0_i32_14 = arith.constant 0 : i32
    %c128_i32 = arith.constant 128 : i32
    %20 = tpu.memref_slice %arg6[%9, %c0_i32_14, %c128_i32] : memref<2x8x384xf32, #tpu.memory_space<vmem>> -> memref<1x1x128xf32, #tpu.memory_space<vmem>>
    %21 = tpu.memref_squeeze %20 : memref<1x1x128xf32, #tpu.memory_space<vmem>> -> memref<1x128xf32, #tpu.memory_space<vmem>>
    %22 = tpu.memref_slice %arg7[%9, %c1_i32_11] : memref<2x3x!tpu.dma_semaphore, #tpu.memory_space<semaphore_mem>> -> memref<1x1x!tpu.dma_semaphore, #tpu.memory_space<semaphore_mem>>
    %23 = tpu.memref_squeeze %22 : memref<1x1x!tpu.dma_semaphore, #tpu.memory_space<semaphore_mem>> -> memref<!tpu.dma_semaphore, #tpu.memory_space<semaphore_mem>>
    tpu.wait_dma2 semaphore(%23 : memref<!tpu.dma_semaphore, #tpu.memory_space<semaphore_mem>>) src(%19 : memref<1x128xf32, #tpu.memory_space<any>>) dst(%21 : memref<1x128xf32, #tpu.memory_space<vmem>>)
    %c2_i32_15 = arith.constant 2 : i32
    %c0_i32_16 = arith.constant 0 : i32
    %c0_i32_17 = arith.constant 0 : i32
    %24 = tpu.memref_slice %arg4[%c0_i32_16, %c0_i32_17] : memref<11x128xf32, #tpu.memory_space<any>> -> memref<1x128xf32, #tpu.memory_space<any>>
    %c0_i32_18 = arith.constant 0 : i32
    %c256_i32 = arith.constant 256 : i32
    %25 = tpu.memref_slice %arg6[%9, %c0_i32_18, %c256_i32] : memref<2x8x384xf32, #tpu.memory_space<vmem>> -> memref<1x1x128xf32, #tpu.memory_space<vmem>>
    %26 = tpu.memref_squeeze %25 : memref<1x1x128xf32, #tpu.memory_space<vmem>> -> memref<1x128xf32, #tpu.memory_space<vmem>>
    %27 = tpu.memref_slice %arg7[%9, %c2_i32_15] : memref<2x3x!tpu.dma_semaphore, #tpu.memory_space<semaphore_mem>> -> memref<1x1x!tpu.dma_semaphore, #tpu.memory_space<semaphore_mem>>
    %28 = tpu.memref_squeeze %27 : memref<1x1x!tpu.dma_semaphore, #tpu.memory_space<semaphore_mem>> -> memref<!tpu.dma_semaphore, #tpu.memory_space<semaphore_mem>>
    tpu.wait_dma2 semaphore(%28 : memref<!tpu.dma_semaphore, #tpu.memory_space<semaphore_mem>>) src(%24 : memref<1x128xf32, #tpu.memory_space<any>>) dst(%26 : memref<1x128xf32, #tpu.memory_space<vmem>>)
    %c0_i32_19 = arith.constant 0 : i32
    %c0_i32_20 = arith.constant 0 : i32
    %c0_i32_21 = arith.constant 0 : i32
    %29 = tpu.memref_slice %arg2[%c0_i32_20, %c0_i32_21] : memref<5x128xf32, #tpu.memory_space<any>> -> memref<1x128xf32, #tpu.memory_space<any>>
    %c1_i32_22 = arith.constant 1 : i32
    %c0_i32_23 = arith.constant 0 : i32
    %30 = tpu.memref_slice %arg6[%9, %c1_i32_22, %c0_i32_23] : memref<2x8x384xf32, #tpu.memory_space<vmem>> -> memref<1x1x128xf32, #tpu.memory_space<vmem>>
    %31 = tpu.memref_squeeze %30 : memref<1x1x128xf32, #tpu.memory_space<vmem>> -> memref<1x128xf32, #tpu.memory_space<vmem>>
    %32 = tpu.memref_slice %arg7[%9, %c0_i32_19] : memref<2x3x!tpu.dma_semaphore, #tpu.memory_space<semaphore_mem>> -> memref<1x1x!tpu.dma_semaphore, #tpu.memory_space<semaphore_mem>>
    %33 = tpu.memref_squeeze %32 : memref<1x1x!tpu.dma_semaphore, #tpu.memory_space<semaphore_mem>> -> memref<!tpu.dma_semaphore, #tpu.memory_space<semaphore_mem>>
    tpu.wait_dma2 semaphore(%33 : memref<!tpu.dma_semaphore, #tpu.memory_space<semaphore_mem>>) src(%29 : memref<1x128xf32, #tpu.memory_space<any>>) dst(%31 : memref<1x128xf32, #tpu.memory_space<vmem>>)
    %c1_i32_24 = arith.constant 1 : i32
    %c0_i32_25 = arith.constant 0 : i32
    %c0_i32_26 = arith.constant 0 : i32
    %34 = tpu.memref_slice %arg3[%c0_i32_25, %c0_i32_26] : memref<7x128xf32, #tpu.memory_space<any>> -> memref<1x128xf32, #tpu.memory_space<any>>
    %c1_i32_27 = arith.constant 1 : i32
    %c128_i32_28 = arith.constant 128 : i32
    %35 = tpu.memref_slice %arg6[%9, %c1_i32_27, %c128_i32_28] : memref<2x8x384xf32, #tpu.memory_space<vmem>> -> memref<1x1x128xf32, #tpu.memory_space<vmem>>
    %36 = tpu.memref_squeeze %35 : memref<1x1x128xf32, #tpu.memory_space<vmem>> -> memref<1x128xf32, #tpu.memory_space<vmem>>
    %37 = tpu.memref_slice %arg7[%9, %c1_i32_24] : memref<2x3x!tpu.dma_semaphore, #tpu.memory_space<semaphore_mem>> -> memref<1x1x!tpu.dma_semaphore, #tpu.memory_space<semaphore_mem>>
    %38 = tpu.memref_squeeze %37 : memref<1x1x!tpu.dma_semaphore, #tpu.memory_space<semaphore_mem>> -> memref<!tpu.dma_semaphore, #tpu.memory_space<semaphore_mem>>
    tpu.wait_dma2 semaphore(%38 : memref<!tpu.dma_semaphore, #tpu.memory_space<semaphore_mem>>) src(%34 : memref<1x128xf32, #tpu.memory_space<any>>) dst(%36 : memref<1x128xf32, #tpu.memory_space<vmem>>)
    %c2_i32_29 = arith.constant 2 : i32
    %c0_i32_30 = arith.constant 0 : i32
    %c0_i32_31 = arith.constant 0 : i32
    %39 = tpu.memref_slice %arg4[%c0_i32_30, %c0_i32_31] : memref<11x128xf32, #tpu.memory_space<any>> -> memref<1x128xf32, #tpu.memory_space<any>>
    %c1_i32_32 = arith.constant 1 : i32
    %c256_i32_33 = arith.constant 256 : i32
    %40 = tpu.memref_slice %arg6[%9, %c1_i32_32, %c256_i32_33] : memref<2x8x384xf32, #tpu.memory_space<vmem>> -> memref<1x1x128xf32, #tpu.memory_space<vmem>>
    %41 = tpu.memref_squeeze %40 : memref<1x1x128xf32, #tpu.memory_space<vmem>> -> memref<1x128xf32, #tpu.memory_space<vmem>>
    %42 = tpu.memref_slice %arg7[%9, %c2_i32_29] : memref<2x3x!tpu.dma_semaphore, #tpu.memory_space<semaphore_mem>> -> memref<1x1x!tpu.dma_semaphore, #tpu.memory_space<semaphore_mem>>
    %43 = tpu.memref_squeeze %42 : memref<1x1x!tpu.dma_semaphore, #tpu.memory_space<semaphore_mem>> -> memref<!tpu.dma_semaphore, #tpu.memory_space<semaphore_mem>>
    tpu.wait_dma2 semaphore(%43 : memref<!tpu.dma_semaphore, #tpu.memory_space<semaphore_mem>>) src(%39 : memref<1x128xf32, #tpu.memory_space<any>>) dst(%41 : memref<1x128xf32, #tpu.memory_space<vmem>>)
    %c0_i32_34 = arith.constant 0 : i32
    %c0_i32_35 = arith.constant 0 : i32
    %c0_i32_36 = arith.constant 0 : i32
    %44 = tpu.memref_slice %arg2[%c0_i32_35, %c0_i32_36] : memref<5x128xf32, #tpu.memory_space<any>> -> memref<1x128xf32, #tpu.memory_space<any>>
    %c2_i32_37 = arith.constant 2 : i32
    %c0_i32_38 = arith.constant 0 : i32
    %45 = tpu.memref_slice %arg6[%9, %c2_i32_37, %c0_i32_38] : memref<2x8x384xf32, #tpu.memory_space<vmem>> -> memref<1x1x128xf32, #tpu.memory_space<vmem>>
    %46 = tpu.memref_squeeze %45 : memref<1x1x128xf32, #tpu.memory_space<vmem>> -> memref<1x128xf32, #tpu.memory_space<vmem>>
    %47 = tpu.memref_slice %arg7[%9, %c0_i32_34] : memref<2x3x!tpu.dma_semaphore, #tpu.memory_space<semaphore_mem>> -> memref<1x1x!tpu.dma_semaphore, #tpu.memory_space<semaphore_mem>>
    %48 = tpu.memref_squeeze %47 : memref<1x1x!tpu.dma_semaphore, #tpu.memory_space<semaphore_mem>> -> memref<!tpu.dma_semaphore, #tpu.memory_space<semaphore_mem>>
    tpu.wait_dma2 semaphore(%48 : memref<!tpu.dma_semaphore, #tpu.memory_space<semaphore_mem>>) src(%44 : memref<1x128xf32, #tpu.memory_space<any>>) dst(%46 : memref<1x128xf32, #tpu.memory_space<vmem>>)
    %c1_i32_39 = arith.constant 1 : i32
    %c0_i32_40 = arith.constant 0 : i32
    %c0_i32_41 = arith.constant 0 : i32
    %49 = tpu.memref_slice %arg3[%c0_i32_40, %c0_i32_41] : memref<7x128xf32, #tpu.memory_space<any>> -> memref<1x128xf32, #tpu.memory_space<any>>
    %c2_i32_42 = arith.constant 2 : i32
    %c128_i32_43 = arith.constant 128 : i32
    %50 = tpu.memref_slice %arg6[%9, %c2_i32_42, %c128_i32_43] : memref<2x8x384xf32, #tpu.memory_space<vmem>> -> memref<1x1x128xf32, #tpu.memory_space<vmem>>
    %51 = tpu.memref_squeeze %50 : memref<1x1x128xf32, #tpu.memory_space<vmem>> -> memref<1x128xf32, #tpu.memory_space<vmem>>
    %52 = tpu.memref_slice %arg7[%9, %c1_i32_39] : memref<2x3x!tpu.dma_semaphore, #tpu.memory_space<semaphore_mem>> -> memref<1x1x!tpu.dma_semaphore, #tpu.memory_space<semaphore_mem>>
    %53 = tpu.memref_squeeze %52 : memref<1x1x!tpu.dma_semaphore, #tpu.memory_space<semaphore_mem>> -> memref<!tpu.dma_semaphore, #tpu.memory_space<semaphore_mem>>
    tpu.wait_dma2 semaphore(%53 : memref<!tpu.dma_semaphore, #tpu.memory_space<semaphore_mem>>) src(%49 : memref<1x128xf32, #tpu.memory_space<any>>) dst(%51 : memref<1x128xf32, #tpu.memory_space<vmem>>)
    %c2_i32_44 = arith.constant 2 : i32
    %c0_i32_45 = arith.constant 0 : i32
    %c0_i32_46 = arith.constant 0 : i32
    %54 = tpu.memref_slice %arg4[%c0_i32_45, %c0_i32_46] : memref<11x128xf32, #tpu.memory_space<any>> -> memref<1x128xf32, #tpu.memory_space<any>>
    %c2_i32_47 = arith.constant 2 : i32
    %c256_i32_48 = arith.constant 256 : i32
    %55 = tpu.memref_slice %arg6[%9, %c2_i32_47, %c256_i32_48] : memref<2x8x384xf32, #tpu.memory_space<vmem>> -> memref<1x1x128xf32, #tpu.memory_space<vmem>>
    %56 = tpu.memref_squeeze %55 : memref<1x1x128xf32, #tpu.memory_space<vmem>> -> memref<1x128xf32, #tpu.memory_space<vmem>>
    %57 = tpu.memref_slice %arg7[%9, %c2_i32_44] : memref<2x3x!tpu.dma_semaphore, #tpu.memory_space<semaphore_mem>> -> memref<1x1x!tpu.dma_semaphore, #tpu.memory_space<semaphore_mem>>
    %58 = tpu.memref_squeeze %57 : memref<1x1x!tpu.dma_semaphore, #tpu.memory_space<semaphore_mem>> -> memref<!tpu.dma_semaphore, #tpu.memory_space<semaphore_mem>>
    tpu.wait_dma2 semaphore(%58 : memref<!tpu.dma_semaphore, #tpu.memory_space<semaphore_mem>>) src(%54 : memref<1x128xf32, #tpu.memory_space<any>>) dst(%56 : memref<1x128xf32, #tpu.memory_space<vmem>>)
    %c0_i32_49 = arith.constant 0 : i32
    %c0_i32_50 = arith.constant 0 : i32
    %c0_i32_51 = arith.constant 0 : i32
    %59 = tpu.memref_slice %arg2[%c0_i32_50, %c0_i32_51] : memref<5x128xf32, #tpu.memory_space<any>> -> memref<1x128xf32, #tpu.memory_space<any>>
    %c3_i32 = arith.constant 3 : i32
    %c0_i32_52 = arith.constant 0 : i32
    %60 = tpu.memref_slice %arg6[%9, %c3_i32, %c0_i32_52] : memref<2x8x384xf32, #tpu.memory_space<vmem>> -> memref<1x1x128xf32, #tpu.memory_space<vmem>>
    %61 = tpu.memref_squeeze %60 : memref<1x1x128xf32, #tpu.memory_space<vmem>> -> memref<1x128xf32, #tpu.memory_space<vmem>>
    %62 = tpu.memref_slice %arg7[%9, %c0_i32_49] : memref<2x3x!tpu.dma_semaphore, #tpu.memory_space<semaphore_mem>> -> memref<1x1x!tpu.dma_semaphore, #tpu.memory_space<semaphore_mem>>
    %63 = tpu.memref_squeeze %62 : memref<1x1x!tpu.dma_semaphore, #tpu.memory_space<semaphore_mem>> -> memref<!tpu.dma_semaphore, #tpu.memory_space<semaphore_mem>>
    tpu.wait_dma2 semaphore(%63 : memref<!tpu.dma_semaphore, #tpu.memory_space<semaphore_mem>>) src(%59 : memref<1x128xf32, #tpu.memory_space<any>>) dst(%61 : memref<1x128xf32, #tpu.memory_space<vmem>>)
    %c1_i32_53 = arith.constant 1 : i32
    %c0_i32_54 = arith.constant 0 : i32
    %c0_i32_55 = arith.constant 0 : i32
    %64 = tpu.memref_slice %arg3[%c0_i32_54, %c0_i32_55] : memref<7x128xf32, #tpu.memory_space<any>> -> memref<1x128xf32, #tpu.memory_space<any>>
    %c3_i32_56 = arith.constant 3 : i32
    %c128_i32_57 = arith.constant 128 : i32
    %65 = tpu.memref_slice %arg6[%9, %c3_i32_56, %c128_i32_57] : memref<2x8x384xf32, #tpu.memory_space<vmem>> -> memref<1x1x128xf32, #tpu.memory_space<vmem>>
    %66 = tpu.memref_squeeze %65 : memref<1x1x128xf32, #tpu.memory_space<vmem>> -> memref<1x128xf32, #tpu.memory_space<vmem>>
    %67 = tpu.memref_slice %arg7[%9, %c1_i32_53] : memref<2x3x!tpu.dma_semaphore, #tpu.memory_space<semaphore_mem>> -> memref<1x1x!tpu.dma_semaphore, #tpu.memory_space<semaphore_mem>>
    %68 = tpu.memref_squeeze %67 : memref<1x1x!tpu.dma_semaphore, #tpu.memory_space<semaphore_mem>> -> memref<!tpu.dma_semaphore, #tpu.memory_space<semaphore_mem>>
    tpu.wait_dma2 semaphore(%68 : memref<!tpu.dma_semaphore, #tpu.memory_space<semaphore_mem>>) src(%64 : memref<1x128xf32, #tpu.memory_space<any>>) dst(%66 : memref<1x128xf32, #tpu.memory_space<vmem>>)
    %c2_i32_58 = arith.constant 2 : i32
    %c0_i32_59 = arith.constant 0 : i32
    %c0_i32_60 = arith.constant 0 : i32
    %69 = tpu.memref_slice %arg4[%c0_i32_59, %c0_i32_60] : memref<11x128xf32, #tpu.memory_space<any>> -> memref<1x128xf32, #tpu.memory_space<any>>
    %c3_i32_61 = arith.constant 3 : i32
    %c256_i32_62 = arith.constant 256 : i32
    %70 = tpu.memref_slice %arg6[%9, %c3_i32_61, %c256_i32_62] : memref<2x8x384xf32, #tpu.memory_space<vmem>> -> memref<1x1x128xf32, #tpu.memory_space<vmem>>
    %71 = tpu.memref_squeeze %70 : memref<1x1x128xf32, #tpu.memory_space<vmem>> -> memref<1x128xf32, #tpu.memory_space<vmem>>
    %72 = tpu.memref_slice %arg7[%9, %c2_i32_58] : memref<2x3x!tpu.dma_semaphore, #tpu.memory_space<semaphore_mem>> -> memref<1x1x!tpu.dma_semaphore, #tpu.memory_space<semaphore_mem>>
    %73 = tpu.memref_squeeze %72 : memref<1x1x!tpu.dma_semaphore, #tpu.memory_space<semaphore_mem>> -> memref<!tpu.dma_semaphore, #tpu.memory_space<semaphore_mem>>
    tpu.wait_dma2 semaphore(%73 : memref<!tpu.dma_semaphore, #tpu.memory_space<semaphore_mem>>) src(%69 : memref<1x128xf32, #tpu.memory_space<any>>) dst(%71 : memref<1x128xf32, #tpu.memory_space<vmem>>)
    %c0_i32_63 = arith.constant 0 : i32
    %c0_i32_64 = arith.constant 0 : i32
    %c0_i32_65 = arith.constant 0 : i32
    %74 = tpu.memref_slice %arg2[%c0_i32_64, %c0_i32_65] : memref<5x128xf32, #tpu.memory_space<any>> -> memref<1x128xf32, #tpu.memory_space<any>>
    %c4_i32 = arith.constant 4 : i32
    %c0_i32_66 = arith.constant 0 : i32
    %75 = tpu.memref_slice %arg6[%9, %c4_i32, %c0_i32_66] : memref<2x8x384xf32, #tpu.memory_space<vmem>> -> memref<1x1x128xf32, #tpu.memory_space<vmem>>
    %76 = tpu.memref_squeeze %75 : memref<1x1x128xf32, #tpu.memory_space<vmem>> -> memref<1x128xf32, #tpu.memory_space<vmem>>
    %77 = tpu.memref_slice %arg7[%9, %c0_i32_63] : memref<2x3x!tpu.dma_semaphore, #tpu.memory_space<semaphore_mem>> -> memref<1x1x!tpu.dma_semaphore, #tpu.memory_space<semaphore_mem>>
    %78 = tpu.memref_squeeze %77 : memref<1x1x!tpu.dma_semaphore, #tpu.memory_space<semaphore_mem>> -> memref<!tpu.dma_semaphore, #tpu.memory_space<semaphore_mem>>
    tpu.wait_dma2 semaphore(%78 : memref<!tpu.dma_semaphore, #tpu.memory_space<semaphore_mem>>) src(%74 : memref<1x128xf32, #tpu.memory_space<any>>) dst(%76 : memref<1x128xf32, #tpu.memory_space<vmem>>)
    %c1_i32_67 = arith.constant 1 : i32
    %c0_i32_68 = arith.constant 0 : i32
    %c0_i32_69 = arith.constant 0 : i32
    %79 = tpu.memref_slice %arg3[%c0_i32_68, %c0_i32_69] : memref<7x128xf32, #tpu.memory_space<any>> -> memref<1x128xf32, #tpu.memory_space<any>>
    %c4_i32_70 = arith.constant 4 : i32
    %c128_i32_71 = arith.constant 128 : i32
    %80 = tpu.memref_slice %arg6[%9, %c4_i32_70, %c128_i32_71] : memref<2x8x384xf32, #tpu.memory_space<vmem>> -> memref<1x1x128xf32, #tpu.memory_space<vmem>>
    %81 = tpu.memref_squeeze %80 : memref<1x1x128xf32, #tpu.memory_space<vmem>> -> memref<1x128xf32, #tpu.memory_space<vmem>>
    %82 = tpu.memref_slice %arg7[%9, %c1_i32_67] : memref<2x3x!tpu.dma_semaphore, #tpu.memory_space<semaphore_mem>> -> memref<1x1x!tpu.dma_semaphore, #tpu.memory_space<semaphore_mem>>
    %83 = tpu.memref_squeeze %82 : memref<1x1x!tpu.dma_semaphore, #tpu.memory_space<semaphore_mem>> -> memref<!tpu.dma_semaphore, #tpu.memory_space<semaphore_mem>>
    tpu.wait_dma2 semaphore(%83 : memref<!tpu.dma_semaphore, #tpu.memory_space<semaphore_mem>>) src(%79 : memref<1x128xf32, #tpu.memory_space<any>>) dst(%81 : memref<1x128xf32, #tpu.memory_space<vmem>>)
    %c2_i32_72 = arith.constant 2 : i32
    %c0_i32_73 = arith.constant 0 : i32
    %c0_i32_74 = arith.constant 0 : i32
    %84 = tpu.memref_slice %arg4[%c0_i32_73, %c0_i32_74] : memref<11x128xf32, #tpu.memory_space<any>> -> memref<1x128xf32, #tpu.memory_space<any>>
    %c4_i32_75 = arith.constant 4 : i32
    %c256_i32_76 = arith.constant 256 : i32
    %85 = tpu.memref_slice %arg6[%9, %c4_i32_75, %c256_i32_76] : memref<2x8x384xf32, #tpu.memory_space<vmem>> -> memref<1x1x128xf32, #tpu.memory_space<vmem>>
    %86 = tpu.memref_squeeze %85 : memref<1x1x128xf32, #tpu.memory_space<vmem>> -> memref<1x128xf32, #tpu.memory_space<vmem>>
    %87 = tpu.memref_slice %arg7[%9, %c2_i32_72] : memref<2x3x!tpu.dma_semaphore, #tpu.memory_space<semaphore_mem>> -> memref<1x1x!tpu.dma_semaphore, #tpu.memory_space<semaphore_mem>>
    %88 = tpu.memref_squeeze %87 : memref<1x1x!tpu.dma_semaphore, #tpu.memory_space<semaphore_mem>> -> memref<!tpu.dma_semaphore, #tpu.memory_space<semaphore_mem>>
    tpu.wait_dma2 semaphore(%88 : memref<!tpu.dma_semaphore, #tpu.memory_space<semaphore_mem>>) src(%84 : memref<1x128xf32, #tpu.memory_space<any>>) dst(%86 : memref<1x128xf32, #tpu.memory_space<vmem>>)
    %c0_i32_77 = arith.constant 0 : i32
    %c0_i32_78 = arith.constant 0 : i32
    %c0_i32_79 = arith.constant 0 : i32
    %89 = tpu.memref_slice %arg2[%c0_i32_78, %c0_i32_79] : memref<5x128xf32, #tpu.memory_space<any>> -> memref<1x128xf32, #tpu.memory_space<any>>
    %c5_i32 = arith.constant 5 : i32
    %c0_i32_80 = arith.constant 0 : i32
    %90 = tpu.memref_slice %arg6[%9, %c5_i32, %c0_i32_80] : memref<2x8x384xf32, #tpu.memory_space<vmem>> -> memref<1x1x128xf32, #tpu.memory_space<vmem>>
    %91 = tpu.memref_squeeze %90 : memref<1x1x128xf32, #tpu.memory_space<vmem>> -> memref<1x128xf32, #tpu.memory_space<vmem>>
    %92 = tpu.memref_slice %arg7[%9, %c0_i32_77] : memref<2x3x!tpu.dma_semaphore, #tpu.memory_space<semaphore_mem>> -> memref<1x1x!tpu.dma_semaphore, #tpu.memory_space<semaphore_mem>>
    %93 = tpu.memref_squeeze %92 : memref<1x1x!tpu.dma_semaphore, #tpu.memory_space<semaphore_mem>> -> memref<!tpu.dma_semaphore, #tpu.memory_space<semaphore_mem>>
    tpu.wait_dma2 semaphore(%93 : memref<!tpu.dma_semaphore, #tpu.memory_space<semaphore_mem>>) src(%89 : memref<1x128xf32, #tpu.memory_space<any>>) dst(%91 : memref<1x128xf32, #tpu.memory_space<vmem>>)
    %c1_i32_81 = arith.constant 1 : i32
    %c0_i32_82 = arith.constant 0 : i32
    %c0_i32_83 = arith.constant 0 : i32
    %94 = tpu.memref_slice %arg3[%c0_i32_82, %c0_i32_83] : memref<7x128xf32, #tpu.memory_space<any>> -> memref<1x128xf32, #tpu.memory_space<any>>
    %c5_i32_84 = arith.constant 5 : i32
    %c128_i32_85 = arith.constant 128 : i32
    %95 = tpu.memref_slice %arg6[%9, %c5_i32_84, %c128_i32_85] : memref<2x8x384xf32, #tpu.memory_space<vmem>> -> memref<1x1x128xf32, #tpu.memory_space<vmem>>
    %96 = tpu.memref_squeeze %95 : memref<1x1x128xf32, #tpu.memory_space<vmem>> -> memref<1x128xf32, #tpu.memory_space<vmem>>
    %97 = tpu.memref_slice %arg7[%9, %c1_i32_81] : memref<2x3x!tpu.dma_semaphore, #tpu.memory_space<semaphore_mem>> -> memref<1x1x!tpu.dma_semaphore, #tpu.memory_space<semaphore_mem>>
    %98 = tpu.memref_squeeze %97 : memref<1x1x!tpu.dma_semaphore, #tpu.memory_space<semaphore_mem>> -> memref<!tpu.dma_semaphore, #tpu.memory_space<semaphore_mem>>
    tpu.wait_dma2 semaphore(%98 : memref<!tpu.dma_semaphore, #tpu.memory_space<semaphore_mem>>) src(%94 : memref<1x128xf32, #tpu.memory_space<any>>) dst(%96 : memref<1x128xf32, #tpu.memory_space<vmem>>)
    %c2_i32_86 = arith.constant 2 : i32
    %c0_i32_87 = arith.constant 0 : i32
    %c0_i32_88 = arith.constant 0 : i32
    %99 = tpu.memref_slice %arg4[%c0_i32_87, %c0_i32_88] : memref<11x128xf32, #tpu.memory_space<any>> -> memref<1x128xf32, #tpu.memory_space<any>>
    %c5_i32_89 = arith.constant 5 : i32
    %c256_i32_90 = arith.constant 256 : i32
    %100 = tpu.memref_slice %arg6[%9, %c5_i32_89, %c256_i32_90] : memref<2x8x384xf32, #tpu.memory_space<vmem>> -> memref<1x1x128xf32, #tpu.memory_space<vmem>>
    %101 = tpu.memref_squeeze %100 : memref<1x1x128xf32, #tpu.memory_space<vmem>> -> memref<1x128xf32, #tpu.memory_space<vmem>>
    %102 = tpu.memref_slice %arg7[%9, %c2_i32_86] : memref<2x3x!tpu.dma_semaphore, #tpu.memory_space<semaphore_mem>> -> memref<1x1x!tpu.dma_semaphore, #tpu.memory_space<semaphore_mem>>
    %103 = tpu.memref_squeeze %102 : memref<1x1x!tpu.dma_semaphore, #tpu.memory_space<semaphore_mem>> -> memref<!tpu.dma_semaphore, #tpu.memory_space<semaphore_mem>>
    tpu.wait_dma2 semaphore(%103 : memref<!tpu.dma_semaphore, #tpu.memory_space<semaphore_mem>>) src(%99 : memref<1x128xf32, #tpu.memory_space<any>>) dst(%101 : memref<1x128xf32, #tpu.memory_space<vmem>>)
    %c0_i32_91 = arith.constant 0 : i32
    %c0_i32_92 = arith.constant 0 : i32
    %c0_i32_93 = arith.constant 0 : i32
    %104 = tpu.memref_slice %arg2[%c0_i32_92, %c0_i32_93] : memref<5x128xf32, #tpu.memory_space<any>> -> memref<1x128xf32, #tpu.memory_space<any>>
    %c6_i32 = arith.constant 6 : i32
    %c0_i32_94 = arith.constant 0 : i32
    %105 = tpu.memref_slice %arg6[%9, %c6_i32, %c0_i32_94] : memref<2x8x384xf32, #tpu.memory_space<vmem>> -> memref<1x1x128xf32, #tpu.memory_space<vmem>>
    %106 = tpu.memref_squeeze %105 : memref<1x1x128xf32, #tpu.memory_space<vmem>> -> memref<1x128xf32, #tpu.memory_space<vmem>>
    %107 = tpu.memref_slice %arg7[%9, %c0_i32_91] : memref<2x3x!tpu.dma_semaphore, #tpu.memory_space<semaphore_mem>> -> memref<1x1x!tpu.dma_semaphore, #tpu.memory_space<semaphore_mem>>
    %108 = tpu.memref_squeeze %107 : memref<1x1x!tpu.dma_semaphore, #tpu.memory_space<semaphore_mem>> -> memref<!tpu.dma_semaphore, #tpu.memory_space<semaphore_mem>>
    tpu.wait_dma2 semaphore(%108 : memref<!tpu.dma_semaphore, #tpu.memory_space<semaphore_mem>>) src(%104 : memref<1x128xf32, #tpu.memory_space<any>>) dst(%106 : memref<1x128xf32, #tpu.memory_space<vmem>>)
    %c1_i32_95 = arith.constant 1 : i32
    %c0_i32_96 = arith.constant 0 : i32
    %c0_i32_97 = arith.constant 0 : i32
    %109 = tpu.memref_slice %arg3[%c0_i32_96, %c0_i32_97] : memref<7x128xf32, #tpu.memory_space<any>> -> memref<1x128xf32, #tpu.memory_space<any>>
    %c6_i32_98 = arith.constant 6 : i32
    %c128_i32_99 = arith.constant 128 : i32
    %110 = tpu.memref_slice %arg6[%9, %c6_i32_98, %c128_i32_99] : memref<2x8x384xf32, #tpu.memory_space<vmem>> -> memref<1x1x128xf32, #tpu.memory_space<vmem>>
    %111 = tpu.memref_squeeze %110 : memref<1x1x128xf32, #tpu.memory_space<vmem>> -> memref<1x128xf32, #tpu.memory_space<vmem>>
    %112 = tpu.memref_slice %arg7[%9, %c1_i32_95] : memref<2x3x!tpu.dma_semaphore, #tpu.memory_space<semaphore_mem>> -> memref<1x1x!tpu.dma_semaphore, #tpu.memory_space<semaphore_mem>>
    %113 = tpu.memref_squeeze %112 : memref<1x1x!tpu.dma_semaphore, #tpu.memory_space<semaphore_mem>> -> memref<!tpu.dma_semaphore, #tpu.memory_space<semaphore_mem>>
    tpu.wait_dma2 semaphore(%113 : memref<!tpu.dma_semaphore, #tpu.memory_space<semaphore_mem>>) src(%109 : memref<1x128xf32, #tpu.memory_space<any>>) dst(%111 : memref<1x128xf32, #tpu.memory_space<vmem>>)
    %c2_i32_100 = arith.constant 2 : i32
    %c0_i32_101 = arith.constant 0 : i32
    %c0_i32_102 = arith.constant 0 : i32
    %114 = tpu.memref_slice %arg4[%c0_i32_101, %c0_i32_102] : memref<11x128xf32, #tpu.memory_space<any>> -> memref<1x128xf32, #tpu.memory_space<any>>
    %c6_i32_103 = arith.constant 6 : i32
    %c256_i32_104 = arith.constant 256 : i32
    %115 = tpu.memref_slice %arg6[%9, %c6_i32_103, %c256_i32_104] : memref<2x8x384xf32, #tpu.memory_space<vmem>> -> memref<1x1x128xf32, #tpu.memory_space<vmem>>
    %116 = tpu.memref_squeeze %115 : memref<1x1x128xf32, #tpu.memory_space<vmem>> -> memref<1x128xf32, #tpu.memory_space<vmem>>
    %117 = tpu.memref_slice %arg7[%9, %c2_i32_100] : memref<2x3x!tpu.dma_semaphore, #tpu.memory_space<semaphore_mem>> -> memref<1x1x!tpu.dma_semaphore, #tpu.memory_space<semaphore_mem>>
    %118 = tpu.memref_squeeze %117 : memref<1x1x!tpu.dma_semaphore, #tpu.memory_space<semaphore_mem>> -> memref<!tpu.dma_semaphore, #tpu.memory_space<semaphore_mem>>
    tpu.wait_dma2 semaphore(%118 : memref<!tpu.dma_semaphore, #tpu.memory_space<semaphore_mem>>) src(%114 : memref<1x128xf32, #tpu.memory_space<any>>) dst(%116 : memref<1x128xf32, #tpu.memory_space<vmem>>)
    %c0_i32_105 = arith.constant 0 : i32
    %c0_i32_106 = arith.constant 0 : i32
    %c0_i32_107 = arith.constant 0 : i32
    %119 = tpu.memref_slice %arg2[%c0_i32_106, %c0_i32_107] : memref<5x128xf32, #tpu.memory_space<any>> -> memref<1x128xf32, #tpu.memory_space<any>>
    %c7_i32 = arith.constant 7 : i32
    %c0_i32_108 = arith.constant 0 : i32
    %120 = tpu.memref_slice %arg6[%9, %c7_i32, %c0_i32_108] : memref<2x8x384xf32, #tpu.memory_space<vmem>> -> memref<1x1x128xf32, #tpu.memory_space<vmem>>
    %121 = tpu.memref_squeeze %120 : memref<1x1x128xf32, #tpu.memory_space<vmem>> -> memref<1x128xf32, #tpu.memory_space<vmem>>
    %122 = tpu.memref_slice %arg7[%9, %c0_i32_105] : memref<2x3x!tpu.dma_semaphore, #tpu.memory_space<semaphore_mem>> -> memref<1x1x!tpu.dma_semaphore, #tpu.memory_space<semaphore_mem>>
    %123 = tpu.memref_squeeze %122 : memref<1x1x!tpu.dma_semaphore, #tpu.memory_space<semaphore_mem>> -> memref<!tpu.dma_semaphore, #tpu.memory_space<semaphore_mem>>
    tpu.wait_dma2 semaphore(%123 : memref<!tpu.dma_semaphore, #tpu.memory_space<semaphore_mem>>) src(%119 : memref<1x128xf32, #tpu.memory_space<any>>) dst(%121 : memref<1x128xf32, #tpu.memory_space<vmem>>)
    %c1_i32_109 = arith.constant 1 : i32
    %c0_i32_110 = arith.constant 0 : i32
    %c0_i32_111 = arith.constant 0 : i32
    %124 = tpu.memref_slice %arg3[%c0_i32_110, %c0_i32_111] : memref<7x128xf32, #tpu.memory_space<any>> -> memref<1x128xf32, #tpu.memory_space<any>>
    %c7_i32_112 = arith.constant 7 : i32
    %c128_i32_113 = arith.constant 128 : i32
    %125 = tpu.memref_slice %arg6[%9, %c7_i32_112, %c128_i32_113] : memref<2x8x384xf32, #tpu.memory_space<vmem>> -> memref<1x1x128xf32, #tpu.memory_space<vmem>>
    %126 = tpu.memref_squeeze %125 : memref<1x1x128xf32, #tpu.memory_space<vmem>> -> memref<1x128xf32, #tpu.memory_space<vmem>>
    %127 = tpu.memref_slice %arg7[%9, %c1_i32_109] : memref<2x3x!tpu.dma_semaphore, #tpu.memory_space<semaphore_mem>> -> memref<1x1x!tpu.dma_semaphore, #tpu.memory_space<semaphore_mem>>
    %128 = tpu.memref_squeeze %127 : memref<1x1x!tpu.dma_semaphore, #tpu.memory_space<semaphore_mem>> -> memref<!tpu.dma_semaphore, #tpu.memory_space<semaphore_mem>>
    tpu.wait_dma2 semaphore(%128 : memref<!tpu.dma_semaphore, #tpu.memory_space<semaphore_mem>>) src(%124 : memref<1x128xf32, #tpu.memory_space<any>>) dst(%126 : memref<1x128xf32, #tpu.memory_space<vmem>>)
    %c2_i32_114 = arith.constant 2 : i32
    %c0_i32_115 = arith.constant 0 : i32
    %c0_i32_116 = arith.constant 0 : i32
    %129 = tpu.memref_slice %arg4[%c0_i32_115, %c0_i32_116] : memref<11x128xf32, #tpu.memory_space<any>> -> memref<1x128xf32, #tpu.memory_space<any>>
    %c7_i32_117 = arith.constant 7 : i32
    %c256_i32_118 = arith.constant 256 : i32
    %130 = tpu.memref_slice %arg6[%9, %c7_i32_117, %c256_i32_118] : memref<2x8x384xf32, #tpu.memory_space<vmem>> -> memref<1x1x128xf32, #tpu.memory_space<vmem>>
    %131 = tpu.memref_squeeze %130 : memref<1x1x128xf32, #tpu.memory_space<vmem>> -> memref<1x128xf32, #tpu.memory_space<vmem>>
    %132 = tpu.memref_slice %arg7[%9, %c2_i32_114] : memref<2x3x!tpu.dma_semaphore, #tpu.memory_space<semaphore_mem>> -> memref<1x1x!tpu.dma_semaphore, #tpu.memory_space<semaphore_mem>>
    %133 = tpu.memref_squeeze %132 : memref<1x1x!tpu.dma_semaphore, #tpu.memory_space<semaphore_mem>> -> memref<!tpu.dma_semaphore, #tpu.memory_space<semaphore_mem>>
    tpu.wait_dma2 semaphore(%133 : memref<!tpu.dma_semaphore, #tpu.memory_space<semaphore_mem>>) src(%129 : memref<1x128xf32, #tpu.memory_space<any>>) dst(%131 : memref<1x128xf32, #tpu.memory_space<vmem>>)
    %c1_i32_119 = arith.constant 1 : i32
    %134 = arith.addi %arg0, %c1_i32_119 : i32
    %c4_i32_120 = arith.constant 4 : i32
    %135 = arith.cmpi slt, %134, %c4_i32_120 : i32
    %136 = arith.extui %135 : i1 to i32
    %c0_i32_121 = arith.constant 0 : i32
    %137 = arith.cmpi ne, %136, %c0_i32_121 : i32
    scf.if %137 {
      %c1_i32_125 = arith.constant 1 : i32
      %142 = arith.addi %arg0, %c1_i32_125 : i32
      %c8_i32 = arith.constant 8 : i32
      %143 = arith.muli %142, %c8_i32 : i32
      %c0_i32_126 = arith.constant 0 : i32
      %144 = arith.addi %143, %c0_i32_126 : i32
      %c3_i32_127 = arith.constant 3 : i32
      %145 = arith.muli %144, %c3_i32_127 : i32
      %c0_i32_128 = arith.constant 0 : i32
      %146 = arith.addi %145, %c0_i32_128 : i32
      %147 = arith.index_cast %146 : i32 to index
      %148 = memref.load %arg1[%147] : memref<96xi32, #tpu.memory_space<smem>>
      %c0_i32_129 = arith.constant 0 : i32
      %c0_i32_130 = arith.constant 0 : i32
      %149 = tpu.memref_slice %arg2[%148, %c0_i32_130] : memref<5x128xf32, #tpu.memory_space<any>> -> memref<1x128xf32, #tpu.memory_space<any>>
      %c0_i32_131 = arith.constant 0 : i32
      %c0_i32_132 = arith.constant 0 : i32
      %150 = tpu.memref_slice %arg6[%10, %c0_i32_131, %c0_i32_132] : memref<2x8x384xf32, #tpu.memory_space<vmem>> -> memref<1x1x128xf32, #tpu.memory_space<vmem>>
      %151 = tpu.memref_squeeze %150 : memref<1x1x128xf32, #tpu.memory_space<vmem>> -> memref<1x128xf32, #tpu.memory_space<vmem>>
      %152 = tpu.memref_slice %arg7[%10, %c0_i32_129] : memref<2x3x!tpu.dma_semaphore, #tpu.memory_space<semaphore_mem>> -> memref<1x1x!tpu.dma_semaphore, #tpu.memory_space<semaphore_mem>>
      %153 = tpu.memref_squeeze %152 : memref<1x1x!tpu.dma_semaphore, #tpu.memory_space<semaphore_mem>> -> memref<!tpu.dma_semaphore, #tpu.memory_space<semaphore_mem>>
      tpu.enqueue_dma source(%149 : memref<1x128xf32, #tpu.memory_space<any>>) target(%151 : memref<1x128xf32, #tpu.memory_space<vmem>>) target_semaphore(%153 : memref<!tpu.dma_semaphore, #tpu.memory_space<semaphore_mem>>)
      %c0_i32_133 = arith.constant 0 : i32
      %154 = arith.addi %143, %c0_i32_133 : i32
      %c3_i32_134 = arith.constant 3 : i32
      %155 = arith.muli %154, %c3_i32_134 : i32
      %c1_i32_135 = arith.constant 1 : i32
      %156 = arith.addi %155, %c1_i32_135 : i32
      %157 = arith.index_cast %156 : i32 to index
      %158 = memref.load %arg1[%157] : memref<96xi32, #tpu.memory_space<smem>>
      %c1_i32_136 = arith.constant 1 : i32
      %c0_i32_137 = arith.constant 0 : i32
      %159 = tpu.memref_slice %arg3[%158, %c0_i32_137] : memref<7x128xf32, #tpu.memory_space<any>> -> memref<1x128xf32, #tpu.memory_space<any>>
      %c0_i32_138 = arith.constant 0 : i32
      %c128_i32_139 = arith.constant 128 : i32
      %160 = tpu.memref_slice %arg6[%10, %c0_i32_138, %c128_i32_139] : memref<2x8x384xf32, #tpu.memory_space<vmem>> -> memref<1x1x128xf32, #tpu.memory_space<vmem>>
      %161 = tpu.memref_squeeze %160 : memref<1x1x128xf32, #tpu.memory_space<vmem>> -> memref<1x128xf32, #tpu.memory_space<vmem>>
      %162 = tpu.memref_slice %arg7[%10, %c1_i32_136] : memref<2x3x!tpu.dma_semaphore, #tpu.memory_space<semaphore_mem>> -> memref<1x1x!tpu.dma_semaphore, #tpu.memory_space<semaphore_mem>>
      %163 = tpu.memref_squeeze %162 : memref<1x1x!tpu.dma_semaphore, #tpu.memory_space<semaphore_mem>> -> memref<!tpu.dma_semaphore, #tpu.memory_space<semaphore_mem>>
      tpu.enqueue_dma source(%159 : memref<1x128xf32, #tpu.memory_space<any>>) target(%161 : memref<1x128xf32, #tpu.memory_space<vmem>>) target_semaphore(%163 : memref<!tpu.dma_semaphore, #tpu.memory_space<semaphore_mem>>)
      %c0_i32_140 = arith.constant 0 : i32
      %164 = arith.addi %143, %c0_i32_140 : i32
      %c3_i32_141 = arith.constant 3 : i32
      %165 = arith.muli %164, %c3_i32_141 : i32
      %c2_i32_142 = arith.constant 2 : i32
      %166 = arith.addi %165, %c2_i32_142 : i32
      %167 = arith.index_cast %166 : i32 to index
      %168 = memref.load %arg1[%167] : memref<96xi32, #tpu.memory_space<smem>>
      %c2_i32_143 = arith.constant 2 : i32
      %c0_i32_144 = arith.constant 0 : i32
      %169 = tpu.memref_slice %arg4[%168, %c0_i32_144] : memref<11x128xf32, #tpu.memory_space<any>> -> memref<1x128xf32, #tpu.memory_space<any>>
      %c0_i32_145 = arith.constant 0 : i32
      %c256_i32_146 = arith.constant 256 : i32
      %170 = tpu.memref_slice %arg6[%10, %c0_i32_145, %c256_i32_146] : memref<2x8x384xf32, #tpu.memory_space<vmem>> -> memref<1x1x128xf32, #tpu.memory_space<vmem>>
      %171 = tpu.memref_squeeze %170 : memref<1x1x128xf32, #tpu.memory_space<vmem>> -> memref<1x128xf32, #tpu.memory_space<vmem>>
      %172 = tpu.memref_slice %arg7[%10, %c2_i32_143] : memref<2x3x!tpu.dma_semaphore, #tpu.memory_space<semaphore_mem>> -> memref<1x1x!tpu.dma_semaphore, #tpu.memory_space<semaphore_mem>>
      %173 = tpu.memref_squeeze %172 : memref<1x1x!tpu.dma_semaphore, #tpu.memory_space<semaphore_mem>> -> memref<!tpu.dma_semaphore, #tpu.memory_space<semaphore_mem>>
      tpu.enqueue_dma source(%169 : memref<1x128xf32, #tpu.memory_space<any>>) target(%171 : memref<1x128xf32, #tpu.memory_space<vmem>>) target_semaphore(%173 : memref<!tpu.dma_semaphore, #tpu.memory_space<semaphore_mem>>)
      %c1_i32_147 = arith.constant 1 : i32
      %174 = arith.addi %143, %c1_i32_147 : i32
      %c3_i32_148 = arith.constant 3 : i32
      %175 = arith.muli %174, %c3_i32_148 : i32
      %c0_i32_149 = arith.constant 0 : i32
      %176 = arith.addi %175, %c0_i32_149 : i32
      %177 = arith.index_cast %176 : i32 to index
      %178 = memref.load %arg1[%177] : memref<96xi32, #tpu.memory_space<smem>>
      %c0_i32_150 = arith.constant 0 : i32
      %c0_i32_151 = arith.constant 0 : i32
      %179 = tpu.memref_slice %arg2[%178, %c0_i32_151] : memref<5x128xf32, #tpu.memory_space<any>> -> memref<1x128xf32, #tpu.memory_space<any>>
      %c1_i32_152 = arith.constant 1 : i32
      %c0_i32_153 = arith.constant 0 : i32
      %180 = tpu.memref_slice %arg6[%10, %c1_i32_152, %c0_i32_153] : memref<2x8x384xf32, #tpu.memory_space<vmem>> -> memref<1x1x128xf32, #tpu.memory_space<vmem>>
      %181 = tpu.memref_squeeze %180 : memref<1x1x128xf32, #tpu.memory_space<vmem>> -> memref<1x128xf32, #tpu.memory_space<vmem>>
      %182 = tpu.memref_slice %arg7[%10, %c0_i32_150] : memref<2x3x!tpu.dma_semaphore, #tpu.memory_space<semaphore_mem>> -> memref<1x1x!tpu.dma_semaphore, #tpu.memory_space<semaphore_mem>>
      %183 = tpu.memref_squeeze %182 : memref<1x1x!tpu.dma_semaphore, #tpu.memory_space<semaphore_mem>> -> memref<!tpu.dma_semaphore, #tpu.memory_space<semaphore_mem>>
      tpu.enqueue_dma source(%179 : memref<1x128xf32, #tpu.memory_space<any>>) target(%181 : memref<1x128xf32, #tpu.memory_space<vmem>>) target_semaphore(%183 : memref<!tpu.dma_semaphore, #tpu.memory_space<semaphore_mem>>)
      %c1_i32_154 = arith.constant 1 : i32
      %184 = arith.addi %143, %c1_i32_154 : i32
      %c3_i32_155 = arith.constant 3 : i32
      %185 = arith.muli %184, %c3_i32_155 : i32
      %c1_i32_156 = arith.constant 1 : i32
      %186 = arith.addi %185, %c1_i32_156 : i32
      %187 = arith.index_cast %186 : i32 to index
      %188 = memref.load %arg1[%187] : memref<96xi32, #tpu.memory_space<smem>>
      %c1_i32_157 = arith.constant 1 : i32
      %c0_i32_158 = arith.constant 0 : i32
      %189 = tpu.memref_slice %arg3[%188, %c0_i32_158] : memref<7x128xf32, #tpu.memory_space<any>> -> memref<1x128xf32, #tpu.memory_space<any>>
      %c1_i32_159 = arith.constant 1 : i32
      %c128_i32_160 = arith.constant 128 : i32
      %190 = tpu.memref_slice %arg6[%10, %c1_i32_159, %c128_i32_160] : memref<2x8x384xf32, #tpu.memory_space<vmem>> -> memref<1x1x128xf32, #tpu.memory_space<vmem>>
      %191 = tpu.memref_squeeze %190 : memref<1x1x128xf32, #tpu.memory_space<vmem>> -> memref<1x128xf32, #tpu.memory_space<vmem>>
      %192 = tpu.memref_slice %arg7[%10, %c1_i32_157] : memref<2x3x!tpu.dma_semaphore, #tpu.memory_space<semaphore_mem>> -> memref<1x1x!tpu.dma_semaphore, #tpu.memory_space<semaphore_mem>>
      %193 = tpu.memref_squeeze %192 : memref<1x1x!tpu.dma_semaphore, #tpu.memory_space<semaphore_mem>> -> memref<!tpu.dma_semaphore, #tpu.memory_space<semaphore_mem>>
      tpu.enqueue_dma source(%189 : memref<1x128xf32, #tpu.memory_space<any>>) target(%191 : memref<1x128xf32, #tpu.memory_space<vmem>>) target_semaphore(%193 : memref<!tpu.dma_semaphore, #tpu.memory_space<semaphore_mem>>)
      %c1_i32_161 = arith.constant 1 : i32
      %194 = arith.addi %143, %c1_i32_161 : i32
      %c3_i32_162 = arith.constant 3 : i32
      %195 = arith.muli %194, %c3_i32_162 : i32
      %c2_i32_163 = arith.constant 2 : i32
      %196 = arith.addi %195, %c2_i32_163 : i32
      %197 = arith.index_cast %196 : i32 to index
      %198 = memref.load %arg1[%197] : memref<96xi32, #tpu.memory_space<smem>>
      %c2_i32_164 = arith.constant 2 : i32
      %c0_i32_165 = arith.constant 0 : i32
      %199 = tpu.memref_slice %arg4[%198, %c0_i32_165] : memref<11x128xf32, #tpu.memory_space<any>> -> memref<1x128xf32, #tpu.memory_space<any>>
      %c1_i32_166 = arith.constant 1 : i32
      %c256_i32_167 = arith.constant 256 : i32
      %200 = tpu.memref_slice %arg6[%10, %c1_i32_166, %c256_i32_167] : memref<2x8x384xf32, #tpu.memory_space<vmem>> -> memref<1x1x128xf32, #tpu.memory_space<vmem>>
      %201 = tpu.memref_squeeze %200 : memref<1x1x128xf32, #tpu.memory_space<vmem>> -> memref<1x128xf32, #tpu.memory_space<vmem>>
      %202 = tpu.memref_slice %arg7[%10, %c2_i32_164] : memref<2x3x!tpu.dma_semaphore, #tpu.memory_space<semaphore_mem>> -> memref<1x1x!tpu.dma_semaphore, #tpu.memory_space<semaphore_mem>>
      %203 = tpu.memref_squeeze %202 : memref<1x1x!tpu.dma_semaphore, #tpu.memory_space<semaphore_mem>> -> memref<!tpu.dma_semaphore, #tpu.memory_space<semaphore_mem>>
      tpu.enqueue_dma source(%199 : memref<1x128xf32, #tpu.memory_space<any>>) target(%201 : memref<1x128xf32, #tpu.memory_space<vmem>>) target_semaphore(%203 : memref<!tpu.dma_semaphore, #tpu.memory_space<semaphore_mem>>)
      %c2_i32_168 = arith.constant 2 : i32
      %204 = arith.addi %143, %c2_i32_168 : i32
      %c3_i32_169 = arith.constant 3 : i32
      %205 = arith.muli %204, %c3_i32_169 : i32
      %c0_i32_170 = arith.constant 0 : i32
      %206 = arith.addi %205, %c0_i32_170 : i32
      %207 = arith.index_cast %206 : i32 to index
      %208 = memref.load %arg1[%207] : memref<96xi32, #tpu.memory_space<smem>>
      %c0_i32_171 = arith.constant 0 : i32
      %c0_i32_172 = arith.constant 0 : i32
      %209 = tpu.memref_slice %arg2[%208, %c0_i32_172] : memref<5x128xf32, #tpu.memory_space<any>> -> memref<1x128xf32, #tpu.memory_space<any>>
      %c2_i32_173 = arith.constant 2 : i32
      %c0_i32_174 = arith.constant 0 : i32
      %210 = tpu.memref_slice %arg6[%10, %c2_i32_173, %c0_i32_174] : memref<2x8x384xf32, #tpu.memory_space<vmem>> -> memref<1x1x128xf32, #tpu.memory_space<vmem>>
      %211 = tpu.memref_squeeze %210 : memref<1x1x128xf32, #tpu.memory_space<vmem>> -> memref<1x128xf32, #tpu.memory_space<vmem>>
      %212 = tpu.memref_slice %arg7[%10, %c0_i32_171] : memref<2x3x!tpu.dma_semaphore, #tpu.memory_space<semaphore_mem>> -> memref<1x1x!tpu.dma_semaphore, #tpu.memory_space<semaphore_mem>>
      %213 = tpu.memref_squeeze %212 : memref<1x1x!tpu.dma_semaphore, #tpu.memory_space<semaphore_mem>> -> memref<!tpu.dma_semaphore, #tpu.memory_space<semaphore_mem>>
      tpu.enqueue_dma source(%209 : memref<1x128xf32, #tpu.memory_space<any>>) target(%211 : memref<1x128xf32, #tpu.memory_space<vmem>>) target_semaphore(%213 : memref<!tpu.dma_semaphore, #tpu.memory_space<semaphore_mem>>)
      %c2_i32_175 = arith.constant 2 : i32
      %214 = arith.addi %143, %c2_i32_175 : i32
      %c3_i32_176 = arith.constant 3 : i32
      %215 = arith.muli %214, %c3_i32_176 : i32
      %c1_i32_177 = arith.constant 1 : i32
      %216 = arith.addi %215, %c1_i32_177 : i32
      %217 = arith.index_cast %216 : i32 to index
      %218 = memref.load %arg1[%217] : memref<96xi32, #tpu.memory_space<smem>>
      %c1_i32_178 = arith.constant 1 : i32
      %c0_i32_179 = arith.constant 0 : i32
      %219 = tpu.memref_slice %arg3[%218, %c0_i32_179] : memref<7x128xf32, #tpu.memory_space<any>> -> memref<1x128xf32, #tpu.memory_space<any>>
      %c2_i32_180 = arith.constant 2 : i32
      %c128_i32_181 = arith.constant 128 : i32
      %220 = tpu.memref_slice %arg6[%10, %c2_i32_180, %c128_i32_181] : memref<2x8x384xf32, #tpu.memory_space<vmem>> -> memref<1x1x128xf32, #tpu.memory_space<vmem>>
      %221 = tpu.memref_squeeze %220 : memref<1x1x128xf32, #tpu.memory_space<vmem>> -> memref<1x128xf32, #tpu.memory_space<vmem>>
      %222 = tpu.memref_slice %arg7[%10, %c1_i32_178] : memref<2x3x!tpu.dma_semaphore, #tpu.memory_space<semaphore_mem>> -> memref<1x1x!tpu.dma_semaphore, #tpu.memory_space<semaphore_mem>>
      %223 = tpu.memref_squeeze %222 : memref<1x1x!tpu.dma_semaphore, #tpu.memory_space<semaphore_mem>> -> memref<!tpu.dma_semaphore, #tpu.memory_space<semaphore_mem>>
      tpu.enqueue_dma source(%219 : memref<1x128xf32, #tpu.memory_space<any>>) target(%221 : memref<1x128xf32, #tpu.memory_space<vmem>>) target_semaphore(%223 : memref<!tpu.dma_semaphore, #tpu.memory_space<semaphore_mem>>)
      %c2_i32_182 = arith.constant 2 : i32
      %224 = arith.addi %143, %c2_i32_182 : i32
      %c3_i32_183 = arith.constant 3 : i32
      %225 = arith.muli %224, %c3_i32_183 : i32
      %c2_i32_184 = arith.constant 2 : i32
      %226 = arith.addi %225, %c2_i32_184 : i32
      %227 = arith.index_cast %226 : i32 to index
      %228 = memref.load %arg1[%227] : memref<96xi32, #tpu.memory_space<smem>>
      %c2_i32_185 = arith.constant 2 : i32
      %c0_i32_186 = arith.constant 0 : i32
      %229 = tpu.memref_slice %arg4[%228, %c0_i32_186] : memref<11x128xf32, #tpu.memory_space<any>> -> memref<1x128xf32, #tpu.memory_space<any>>
      %c2_i32_187 = arith.constant 2 : i32
      %c256_i32_188 = arith.constant 256 : i32
      %230 = tpu.memref_slice %arg6[%10, %c2_i32_187, %c256_i32_188] : memref<2x8x384xf32, #tpu.memory_space<vmem>> -> memref<1x1x128xf32, #tpu.memory_space<vmem>>
      %231 = tpu.memref_squeeze %230 : memref<1x1x128xf32, #tpu.memory_space<vmem>> -> memref<1x128xf32, #tpu.memory_space<vmem>>
      %232 = tpu.memref_slice %arg7[%10, %c2_i32_185] : memref<2x3x!tpu.dma_semaphore, #tpu.memory_space<semaphore_mem>> -> memref<1x1x!tpu.dma_semaphore, #tpu.memory_space<semaphore_mem>>
      %233 = tpu.memref_squeeze %232 : memref<1x1x!tpu.dma_semaphore, #tpu.memory_space<semaphore_mem>> -> memref<!tpu.dma_semaphore, #tpu.memory_space<semaphore_mem>>
      tpu.enqueue_dma source(%229 : memref<1x128xf32, #tpu.memory_space<any>>) target(%231 : memref<1x128xf32, #tpu.memory_space<vmem>>) target_semaphore(%233 : memref<!tpu.dma_semaphore, #tpu.memory_space<semaphore_mem>>)
      %c3_i32_189 = arith.constant 3 : i32
      %234 = arith.addi %143, %c3_i32_189 : i32
      %c3_i32_190 = arith.constant 3 : i32
      %235 = arith.muli %234, %c3_i32_190 : i32
      %c0_i32_191 = arith.constant 0 : i32
      %236 = arith.addi %235, %c0_i32_191 : i32
      %237 = arith.index_cast %236 : i32 to index
      %238 = memref.load %arg1[%237] : memref<96xi32, #tpu.memory_space<smem>>
      %c0_i32_192 = arith.constant 0 : i32
      %c0_i32_193 = arith.constant 0 : i32
      %239 = tpu.memref_slice %arg2[%238, %c0_i32_193] : memref<5x128xf32, #tpu.memory_space<any>> -> memref<1x128xf32, #tpu.memory_space<any>>
      %c3_i32_194 = arith.constant 3 : i32
      %c0_i32_195 = arith.constant 0 : i32
      %240 = tpu.memref_slice %arg6[%10, %c3_i32_194, %c0_i32_195] : memref<2x8x384xf32, #tpu.memory_space<vmem>> -> memref<1x1x128xf32, #tpu.memory_space<vmem>>
      %241 = tpu.memref_squeeze %240 : memref<1x1x128xf32, #tpu.memory_space<vmem>> -> memref<1x128xf32, #tpu.memory_space<vmem>>
      %242 = tpu.memref_slice %arg7[%10, %c0_i32_192] : memref<2x3x!tpu.dma_semaphore, #tpu.memory_space<semaphore_mem>> -> memref<1x1x!tpu.dma_semaphore, #tpu.memory_space<semaphore_mem>>
      %243 = tpu.memref_squeeze %242 : memref<1x1x!tpu.dma_semaphore, #tpu.memory_space<semaphore_mem>> -> memref<!tpu.dma_semaphore, #tpu.memory_space<semaphore_mem>>
      tpu.enqueue_dma source(%239 : memref<1x128xf32, #tpu.memory_space<any>>) target(%241 : memref<1x128xf32, #tpu.memory_space<vmem>>) target_semaphore(%243 : memref<!tpu.dma_semaphore, #tpu.memory_space<semaphore_mem>>)
      %c3_i32_196 = arith.constant 3 : i32
      %244 = arith.addi %143, %c3_i32_196 : i32
      %c3_i32_197 = arith.constant 3 : i32
      %245 = arith.muli %244, %c3_i32_197 : i32
      %c1_i32_198 = arith.constant 1 : i32
      %246 = arith.addi %245, %c1_i32_198 : i32
      %247 = arith.index_cast %246 : i32 to index
      %248 = memref.load %arg1[%247] : memref<96xi32, #tpu.memory_space<smem>>
      %c1_i32_199 = arith.constant 1 : i32
      %c0_i32_200 = arith.constant 0 : i32
      %249 = tpu.memref_slice %arg3[%248, %c0_i32_200] : memref<7x128xf32, #tpu.memory_space<any>> -> memref<1x128xf32, #tpu.memory_space<any>>
      %c3_i32_201 = arith.constant 3 : i32
      %c128_i32_202 = arith.constant 128 : i32
      %250 = tpu.memref_slice %arg6[%10, %c3_i32_201, %c128_i32_202] : memref<2x8x384xf32, #tpu.memory_space<vmem>> -> memref<1x1x128xf32, #tpu.memory_space<vmem>>
      %251 = tpu.memref_squeeze %250 : memref<1x1x128xf32, #tpu.memory_space<vmem>> -> memref<1x128xf32, #tpu.memory_space<vmem>>
      %252 = tpu.memref_slice %arg7[%10, %c1_i32_199] : memref<2x3x!tpu.dma_semaphore, #tpu.memory_space<semaphore_mem>> -> memref<1x1x!tpu.dma_semaphore, #tpu.memory_space<semaphore_mem>>
      %253 = tpu.memref_squeeze %252 : memref<1x1x!tpu.dma_semaphore, #tpu.memory_space<semaphore_mem>> -> memref<!tpu.dma_semaphore, #tpu.memory_space<semaphore_mem>>
      tpu.enqueue_dma source(%249 : memref<1x128xf32, #tpu.memory_space<any>>) target(%251 : memref<1x128xf32, #tpu.memory_space<vmem>>) target_semaphore(%253 : memref<!tpu.dma_semaphore, #tpu.memory_space<semaphore_mem>>)
      %c3_i32_203 = arith.constant 3 : i32
      %254 = arith.addi %143, %c3_i32_203 : i32
      %c3_i32_204 = arith.constant 3 : i32
      %255 = arith.muli %254, %c3_i32_204 : i32
      %c2_i32_205 = arith.constant 2 : i32
      %256 = arith.addi %255, %c2_i32_205 : i32
      %257 = arith.index_cast %256 : i32 to index
      %258 = memref.load %arg1[%257] : memref<96xi32, #tpu.memory_space<smem>>
      %c2_i32_206 = arith.constant 2 : i32
      %c0_i32_207 = arith.constant 0 : i32
      %259 = tpu.memref_slice %arg4[%258, %c0_i32_207] : memref<11x128xf32, #tpu.memory_space<any>> -> memref<1x128xf32, #tpu.memory_space<any>>
      %c3_i32_208 = arith.constant 3 : i32
      %c256_i32_209 = arith.constant 256 : i32
      %260 = tpu.memref_slice %arg6[%10, %c3_i32_208, %c256_i32_209] : memref<2x8x384xf32, #tpu.memory_space<vmem>> -> memref<1x1x128xf32, #tpu.memory_space<vmem>>
      %261 = tpu.memref_squeeze %260 : memref<1x1x128xf32, #tpu.memory_space<vmem>> -> memref<1x128xf32, #tpu.memory_space<vmem>>
      %262 = tpu.memref_slice %arg7[%10, %c2_i32_206] : memref<2x3x!tpu.dma_semaphore, #tpu.memory_space<semaphore_mem>> -> memref<1x1x!tpu.dma_semaphore, #tpu.memory_space<semaphore_mem>>
      %263 = tpu.memref_squeeze %262 : memref<1x1x!tpu.dma_semaphore, #tpu.memory_space<semaphore_mem>> -> memref<!tpu.dma_semaphore, #tpu.memory_space<semaphore_mem>>
      tpu.enqueue_dma source(%259 : memref<1x128xf32, #tpu.memory_space<any>>) target(%261 : memref<1x128xf32, #tpu.memory_space<vmem>>) target_semaphore(%263 : memref<!tpu.dma_semaphore, #tpu.memory_space<semaphore_mem>>)
      %c4_i32_210 = arith.constant 4 : i32
      %264 = arith.addi %143, %c4_i32_210 : i32
      %c3_i32_211 = arith.constant 3 : i32
      %265 = arith.muli %264, %c3_i32_211 : i32
      %c0_i32_212 = arith.constant 0 : i32
      %266 = arith.addi %265, %c0_i32_212 : i32
      %267 = arith.index_cast %266 : i32 to index
      %268 = memref.load %arg1[%267] : memref<96xi32, #tpu.memory_space<smem>>
      %c0_i32_213 = arith.constant 0 : i32
      %c0_i32_214 = arith.constant 0 : i32
      %269 = tpu.memref_slice %arg2[%268, %c0_i32_214] : memref<5x128xf32, #tpu.memory_space<any>> -> memref<1x128xf32, #tpu.memory_space<any>>
      %c4_i32_215 = arith.constant 4 : i32
      %c0_i32_216 = arith.constant 0 : i32
      %270 = tpu.memref_slice %arg6[%10, %c4_i32_215, %c0_i32_216] : memref<2x8x384xf32, #tpu.memory_space<vmem>> -> memref<1x1x128xf32, #tpu.memory_space<vmem>>
      %271 = tpu.memref_squeeze %270 : memref<1x1x128xf32, #tpu.memory_space<vmem>> -> memref<1x128xf32, #tpu.memory_space<vmem>>
      %272 = tpu.memref_slice %arg7[%10, %c0_i32_213] : memref<2x3x!tpu.dma_semaphore, #tpu.memory_space<semaphore_mem>> -> memref<1x1x!tpu.dma_semaphore, #tpu.memory_space<semaphore_mem>>
      %273 = tpu.memref_squeeze %272 : memref<1x1x!tpu.dma_semaphore, #tpu.memory_space<semaphore_mem>> -> memref<!tpu.dma_semaphore, #tpu.memory_space<semaphore_mem>>
      tpu.enqueue_dma source(%269 : memref<1x128xf32, #tpu.memory_space<any>>) target(%271 : memref<1x128xf32, #tpu.memory_space<vmem>>) target_semaphore(%273 : memref<!tpu.dma_semaphore, #tpu.memory_space<semaphore_mem>>)
      %c4_i32_217 = arith.constant 4 : i32
      %274 = arith.addi %143, %c4_i32_217 : i32
      %c3_i32_218 = arith.constant 3 : i32
      %275 = arith.muli %274, %c3_i32_218 : i32
      %c1_i32_219 = arith.constant 1 : i32
      %276 = arith.addi %275, %c1_i32_219 : i32
      %277 = arith.index_cast %276 : i32 to index
      %278 = memref.load %arg1[%277] : memref<96xi32, #tpu.memory_space<smem>>
      %c1_i32_220 = arith.constant 1 : i32
      %c0_i32_221 = arith.constant 0 : i32
      %279 = tpu.memref_slice %arg3[%278, %c0_i32_221] : memref<7x128xf32, #tpu.memory_space<any>> -> memref<1x128xf32, #tpu.memory_space<any>>
      %c4_i32_222 = arith.constant 4 : i32
      %c128_i32_223 = arith.constant 128 : i32
      %280 = tpu.memref_slice %arg6[%10, %c4_i32_222, %c128_i32_223] : memref<2x8x384xf32, #tpu.memory_space<vmem>> -> memref<1x1x128xf32, #tpu.memory_space<vmem>>
      %281 = tpu.memref_squeeze %280 : memref<1x1x128xf32, #tpu.memory_space<vmem>> -> memref<1x128xf32, #tpu.memory_space<vmem>>
      %282 = tpu.memref_slice %arg7[%10, %c1_i32_220] : memref<2x3x!tpu.dma_semaphore, #tpu.memory_space<semaphore_mem>> -> memref<1x1x!tpu.dma_semaphore, #tpu.memory_space<semaphore_mem>>
      %283 = tpu.memref_squeeze %282 : memref<1x1x!tpu.dma_semaphore, #tpu.memory_space<semaphore_mem>> -> memref<!tpu.dma_semaphore, #tpu.memory_space<semaphore_mem>>
      tpu.enqueue_dma source(%279 : memref<1x128xf32, #tpu.memory_space<any>>) target(%281 : memref<1x128xf32, #tpu.memory_space<vmem>>) target_semaphore(%283 : memref<!tpu.dma_semaphore, #tpu.memory_space<semaphore_mem>>)
      %c4_i32_224 = arith.constant 4 : i32
      %284 = arith.addi %143, %c4_i32_224 : i32
      %c3_i32_225 = arith.constant 3 : i32
      %285 = arith.muli %284, %c3_i32_225 : i32
      %c2_i32_226 = arith.constant 2 : i32
      %286 = arith.addi %285, %c2_i32_226 : i32
      %287 = arith.index_cast %286 : i32 to index
      %288 = memref.load %arg1[%287] : memref<96xi32, #tpu.memory_space<smem>>
      %c2_i32_227 = arith.constant 2 : i32
      %c0_i32_228 = arith.constant 0 : i32
      %289 = tpu.memref_slice %arg4[%288, %c0_i32_228] : memref<11x128xf32, #tpu.memory_space<any>> -> memref<1x128xf32, #tpu.memory_space<any>>
      %c4_i32_229 = arith.constant 4 : i32
      %c256_i32_230 = arith.constant 256 : i32
      %290 = tpu.memref_slice %arg6[%10, %c4_i32_229, %c256_i32_230] : memref<2x8x384xf32, #tpu.memory_space<vmem>> -> memref<1x1x128xf32, #tpu.memory_space<vmem>>
      %291 = tpu.memref_squeeze %290 : memref<1x1x128xf32, #tpu.memory_space<vmem>> -> memref<1x128xf32, #tpu.memory_space<vmem>>
      %292 = tpu.memref_slice %arg7[%10, %c2_i32_227] : memref<2x3x!tpu.dma_semaphore, #tpu.memory_space<semaphore_mem>> -> memref<1x1x!tpu.dma_semaphore, #tpu.memory_space<semaphore_mem>>
      %293 = tpu.memref_squeeze %292 : memref<1x1x!tpu.dma_semaphore, #tpu.memory_space<semaphore_mem>> -> memref<!tpu.dma_semaphore, #tpu.memory_space<semaphore_mem>>
      tpu.enqueue_dma source(%289 : memref<1x128xf32, #tpu.memory_space<any>>) target(%291 : memref<1x128xf32, #tpu.memory_space<vmem>>) target_semaphore(%293 : memref<!tpu.dma_semaphore, #tpu.memory_space<semaphore_mem>>)
      %c5_i32_231 = arith.constant 5 : i32
      %294 = arith.addi %143, %c5_i32_231 : i32
      %c3_i32_232 = arith.constant 3 : i32
      %295 = arith.muli %294, %c3_i32_232 : i32
      %c0_i32_233 = arith.constant 0 : i32
      %296 = arith.addi %295, %c0_i32_233 : i32
      %297 = arith.index_cast %296 : i32 to index
      %298 = memref.load %arg1[%297] : memref<96xi32, #tpu.memory_space<smem>>
      %c0_i32_234 = arith.constant 0 : i32
      %c0_i32_235 = arith.constant 0 : i32
      %299 = tpu.memref_slice %arg2[%298, %c0_i32_235] : memref<5x128xf32, #tpu.memory_space<any>> -> memref<1x128xf32, #tpu.memory_space<any>>
      %c5_i32_236 = arith.constant 5 : i32
      %c0_i32_237 = arith.constant 0 : i32
      %300 = tpu.memref_slice %arg6[%10, %c5_i32_236, %c0_i32_237] : memref<2x8x384xf32, #tpu.memory_space<vmem>> -> memref<1x1x128xf32, #tpu.memory_space<vmem>>
      %301 = tpu.memref_squeeze %300 : memref<1x1x128xf32, #tpu.memory_space<vmem>> -> memref<1x128xf32, #tpu.memory_space<vmem>>
      %302 = tpu.memref_slice %arg7[%10, %c0_i32_234] : memref<2x3x!tpu.dma_semaphore, #tpu.memory_space<semaphore_mem>> -> memref<1x1x!tpu.dma_semaphore, #tpu.memory_space<semaphore_mem>>
      %303 = tpu.memref_squeeze %302 : memref<1x1x!tpu.dma_semaphore, #tpu.memory_space<semaphore_mem>> -> memref<!tpu.dma_semaphore, #tpu.memory_space<semaphore_mem>>
      tpu.enqueue_dma source(%299 : memref<1x128xf32, #tpu.memory_space<any>>) target(%301 : memref<1x128xf32, #tpu.memory_space<vmem>>) target_semaphore(%303 : memref<!tpu.dma_semaphore, #tpu.memory_space<semaphore_mem>>)
      %c5_i32_238 = arith.constant 5 : i32
      %304 = arith.addi %143, %c5_i32_238 : i32
      %c3_i32_239 = arith.constant 3 : i32
      %305 = arith.muli %304, %c3_i32_239 : i32
      %c1_i32_240 = arith.constant 1 : i32
      %306 = arith.addi %305, %c1_i32_240 : i32
      %307 = arith.index_cast %306 : i32 to index
      %308 = memref.load %arg1[%307] : memref<96xi32, #tpu.memory_space<smem>>
      %c1_i32_241 = arith.constant 1 : i32
      %c0_i32_242 = arith.constant 0 : i32
      %309 = tpu.memref_slice %arg3[%308, %c0_i32_242] : memref<7x128xf32, #tpu.memory_space<any>> -> memref<1x128xf32, #tpu.memory_space<any>>
      %c5_i32_243 = arith.constant 5 : i32
      %c128_i32_244 = arith.constant 128 : i32
      %310 = tpu.memref_slice %arg6[%10, %c5_i32_243, %c128_i32_244] : memref<2x8x384xf32, #tpu.memory_space<vmem>> -> memref<1x1x128xf32, #tpu.memory_space<vmem>>
      %311 = tpu.memref_squeeze %310 : memref<1x1x128xf32, #tpu.memory_space<vmem>> -> memref<1x128xf32, #tpu.memory_space<vmem>>
      %312 = tpu.memref_slice %arg7[%10, %c1_i32_241] : memref<2x3x!tpu.dma_semaphore, #tpu.memory_space<semaphore_mem>> -> memref<1x1x!tpu.dma_semaphore, #tpu.memory_space<semaphore_mem>>
      %313 = tpu.memref_squeeze %312 : memref<1x1x!tpu.dma_semaphore, #tpu.memory_space<semaphore_mem>> -> memref<!tpu.dma_semaphore, #tpu.memory_space<semaphore_mem>>
      tpu.enqueue_dma source(%309 : memref<1x128xf32, #tpu.memory_space<any>>) target(%311 : memref<1x128xf32, #tpu.memory_space<vmem>>) target_semaphore(%313 : memref<!tpu.dma_semaphore, #tpu.memory_space<semaphore_mem>>)
      %c5_i32_245 = arith.constant 5 : i32
      %314 = arith.addi %143, %c5_i32_245 : i32
      %c3_i32_246 = arith.constant 3 : i32
      %315 = arith.muli %314, %c3_i32_246 : i32
      %c2_i32_247 = arith.constant 2 : i32
      %316 = arith.addi %315, %c2_i32_247 : i32
      %317 = arith.index_cast %316 : i32 to index
      %318 = memref.load %arg1[%317] : memref<96xi32, #tpu.memory_space<smem>>
      %c2_i32_248 = arith.constant 2 : i32
      %c0_i32_249 = arith.constant 0 : i32
      %319 = tpu.memref_slice %arg4[%318, %c0_i32_249] : memref<11x128xf32, #tpu.memory_space<any>> -> memref<1x128xf32, #tpu.memory_space<any>>
      %c5_i32_250 = arith.constant 5 : i32
      %c256_i32_251 = arith.constant 256 : i32
      %320 = tpu.memref_slice %arg6[%10, %c5_i32_250, %c256_i32_251] : memref<2x8x384xf32, #tpu.memory_space<vmem>> -> memref<1x1x128xf32, #tpu.memory_space<vmem>>
      %321 = tpu.memref_squeeze %320 : memref<1x1x128xf32, #tpu.memory_space<vmem>> -> memref<1x128xf32, #tpu.memory_space<vmem>>
      %322 = tpu.memref_slice %arg7[%10, %c2_i32_248] : memref<2x3x!tpu.dma_semaphore, #tpu.memory_space<semaphore_mem>> -> memref<1x1x!tpu.dma_semaphore, #tpu.memory_space<semaphore_mem>>
      %323 = tpu.memref_squeeze %322 : memref<1x1x!tpu.dma_semaphore, #tpu.memory_space<semaphore_mem>> -> memref<!tpu.dma_semaphore, #tpu.memory_space<semaphore_mem>>
      tpu.enqueue_dma source(%319 : memref<1x128xf32, #tpu.memory_space<any>>) target(%321 : memref<1x128xf32, #tpu.memory_space<vmem>>) target_semaphore(%323 : memref<!tpu.dma_semaphore, #tpu.memory_space<semaphore_mem>>)
      %c6_i32_252 = arith.constant 6 : i32
      %324 = arith.addi %143, %c6_i32_252 : i32
      %c3_i32_253 = arith.constant 3 : i32
      %325 = arith.muli %324, %c3_i32_253 : i32
      %c0_i32_254 = arith.constant 0 : i32
      %326 = arith.addi %325, %c0_i32_254 : i32
      %327 = arith.index_cast %326 : i32 to index
      %328 = memref.load %arg1[%327] : memref<96xi32, #tpu.memory_space<smem>>
      %c0_i32_255 = arith.constant 0 : i32
      %c0_i32_256 = arith.constant 0 : i32
      %329 = tpu.memref_slice %arg2[%328, %c0_i32_256] : memref<5x128xf32, #tpu.memory_space<any>> -> memref<1x128xf32, #tpu.memory_space<any>>
      %c6_i32_257 = arith.constant 6 : i32
      %c0_i32_258 = arith.constant 0 : i32
      %330 = tpu.memref_slice %arg6[%10, %c6_i32_257, %c0_i32_258] : memref<2x8x384xf32, #tpu.memory_space<vmem>> -> memref<1x1x128xf32, #tpu.memory_space<vmem>>
      %331 = tpu.memref_squeeze %330 : memref<1x1x128xf32, #tpu.memory_space<vmem>> -> memref<1x128xf32, #tpu.memory_space<vmem>>
      %332 = tpu.memref_slice %arg7[%10, %c0_i32_255] : memref<2x3x!tpu.dma_semaphore, #tpu.memory_space<semaphore_mem>> -> memref<1x1x!tpu.dma_semaphore, #tpu.memory_space<semaphore_mem>>
      %333 = tpu.memref_squeeze %332 : memref<1x1x!tpu.dma_semaphore, #tpu.memory_space<semaphore_mem>> -> memref<!tpu.dma_semaphore, #tpu.memory_space<semaphore_mem>>
      tpu.enqueue_dma source(%329 : memref<1x128xf32, #tpu.memory_space<any>>) target(%331 : memref<1x128xf32, #tpu.memory_space<vmem>>) target_semaphore(%333 : memref<!tpu.dma_semaphore, #tpu.memory_space<semaphore_mem>>)
      %c6_i32_259 = arith.constant 6 : i32
      %334 = arith.addi %143, %c6_i32_259 : i32
      %c3_i32_260 = arith.constant 3 : i32
      %335 = arith.muli %334, %c3_i32_260 : i32
      %c1_i32_261 = arith.constant 1 : i32
      %336 = arith.addi %335, %c1_i32_261 : i32
      %337 = arith.index_cast %336 : i32 to index
      %338 = memref.load %arg1[%337] : memref<96xi32, #tpu.memory_space<smem>>
      %c1_i32_262 = arith.constant 1 : i32
      %c0_i32_263 = arith.constant 0 : i32
      %339 = tpu.memref_slice %arg3[%338, %c0_i32_263] : memref<7x128xf32, #tpu.memory_space<any>> -> memref<1x128xf32, #tpu.memory_space<any>>
      %c6_i32_264 = arith.constant 6 : i32
      %c128_i32_265 = arith.constant 128 : i32
      %340 = tpu.memref_slice %arg6[%10, %c6_i32_264, %c128_i32_265] : memref<2x8x384xf32, #tpu.memory_space<vmem>> -> memref<1x1x128xf32, #tpu.memory_space<vmem>>
      %341 = tpu.memref_squeeze %340 : memref<1x1x128xf32, #tpu.memory_space<vmem>> -> memref<1x128xf32, #tpu.memory_space<vmem>>
      %342 = tpu.memref_slice %arg7[%10, %c1_i32_262] : memref<2x3x!tpu.dma_semaphore, #tpu.memory_space<semaphore_mem>> -> memref<1x1x!tpu.dma_semaphore, #tpu.memory_space<semaphore_mem>>
      %343 = tpu.memref_squeeze %342 : memref<1x1x!tpu.dma_semaphore, #tpu.memory_space<semaphore_mem>> -> memref<!tpu.dma_semaphore, #tpu.memory_space<semaphore_mem>>
      tpu.enqueue_dma source(%339 : memref<1x128xf32, #tpu.memory_space<any>>) target(%341 : memref<1x128xf32, #tpu.memory_space<vmem>>) target_semaphore(%343 : memref<!tpu.dma_semaphore, #tpu.memory_space<semaphore_mem>>)
      %c6_i32_266 = arith.constant 6 : i32
      %344 = arith.addi %143, %c6_i32_266 : i32
      %c3_i32_267 = arith.constant 3 : i32
      %345 = arith.muli %344, %c3_i32_267 : i32
      %c2_i32_268 = arith.constant 2 : i32
      %346 = arith.addi %345, %c2_i32_268 : i32
      %347 = arith.index_cast %346 : i32 to index
      %348 = memref.load %arg1[%347] : memref<96xi32, #tpu.memory_space<smem>>
      %c2_i32_269 = arith.constant 2 : i32
      %c0_i32_270 = arith.constant 0 : i32
      %349 = tpu.memref_slice %arg4[%348, %c0_i32_270] : memref<11x128xf32, #tpu.memory_space<any>> -> memref<1x128xf32, #tpu.memory_space<any>>
      %c6_i32_271 = arith.constant 6 : i32
      %c256_i32_272 = arith.constant 256 : i32
      %350 = tpu.memref_slice %arg6[%10, %c6_i32_271, %c256_i32_272] : memref<2x8x384xf32, #tpu.memory_space<vmem>> -> memref<1x1x128xf32, #tpu.memory_space<vmem>>
      %351 = tpu.memref_squeeze %350 : memref<1x1x128xf32, #tpu.memory_space<vmem>> -> memref<1x128xf32, #tpu.memory_space<vmem>>
      %352 = tpu.memref_slice %arg7[%10, %c2_i32_269] : memref<2x3x!tpu.dma_semaphore, #tpu.memory_space<semaphore_mem>> -> memref<1x1x!tpu.dma_semaphore, #tpu.memory_space<semaphore_mem>>
      %353 = tpu.memref_squeeze %352 : memref<1x1x!tpu.dma_semaphore, #tpu.memory_space<semaphore_mem>> -> memref<!tpu.dma_semaphore, #tpu.memory_space<semaphore_mem>>
      tpu.enqueue_dma source(%349 : memref<1x128xf32, #tpu.memory_space<any>>) target(%351 : memref<1x128xf32, #tpu.memory_space<vmem>>) target_semaphore(%353 : memref<!tpu.dma_semaphore, #tpu.memory_space<semaphore_mem>>)
      %c7_i32_273 = arith.constant 7 : i32
      %354 = arith.addi %143, %c7_i32_273 : i32
      %c3_i32_274 = arith.constant 3 : i32
      %355 = arith.muli %354, %c3_i32_274 : i32
      %c0_i32_275 = arith.constant 0 : i32
      %356 = arith.addi %355, %c0_i32_275 : i32
      %357 = arith.index_cast %356 : i32 to index
      %358 = memref.load %arg1[%357] : memref<96xi32, #tpu.memory_space<smem>>
      %c0_i32_276 = arith.constant 0 : i32
      %c0_i32_277 = arith.constant 0 : i32
      %359 = tpu.memref_slice %arg2[%358, %c0_i32_277] : memref<5x128xf32, #tpu.memory_space<any>> -> memref<1x128xf32, #tpu.memory_space<any>>
      %c7_i32_278 = arith.constant 7 : i32
      %c0_i32_279 = arith.constant 0 : i32
      %360 = tpu.memref_slice %arg6[%10, %c7_i32_278, %c0_i32_279] : memref<2x8x384xf32, #tpu.memory_space<vmem>> -> memref<1x1x128xf32, #tpu.memory_space<vmem>>
      %361 = tpu.memref_squeeze %360 : memref<1x1x128xf32, #tpu.memory_space<vmem>> -> memref<1x128xf32, #tpu.memory_space<vmem>>
      %362 = tpu.memref_slice %arg7[%10, %c0_i32_276] : memref<2x3x!tpu.dma_semaphore, #tpu.memory_space<semaphore_mem>> -> memref<1x1x!tpu.dma_semaphore, #tpu.memory_space<semaphore_mem>>
      %363 = tpu.memref_squeeze %362 : memref<1x1x!tpu.dma_semaphore, #tpu.memory_space<semaphore_mem>> -> memref<!tpu.dma_semaphore, #tpu.memory_space<semaphore_mem>>
      tpu.enqueue_dma source(%359 : memref<1x128xf32, #tpu.memory_space<any>>) target(%361 : memref<1x128xf32, #tpu.memory_space<vmem>>) target_semaphore(%363 : memref<!tpu.dma_semaphore, #tpu.memory_space<semaphore_mem>>)
      %c7_i32_280 = arith.constant 7 : i32
      %364 = arith.addi %143, %c7_i32_280 : i32
      %c3_i32_281 = arith.constant 3 : i32
      %365 = arith.muli %364, %c3_i32_281 : i32
      %c1_i32_282 = arith.constant 1 : i32
      %366 = arith.addi %365, %c1_i32_282 : i32
      %367 = arith.index_cast %366 : i32 to index
      %368 = memref.load %arg1[%367] : memref<96xi32, #tpu.memory_space<smem>>
      %c1_i32_283 = arith.constant 1 : i32
      %c0_i32_284 = arith.constant 0 : i32
      %369 = tpu.memref_slice %arg3[%368, %c0_i32_284] : memref<7x128xf32, #tpu.memory_space<any>> -> memref<1x128xf32, #tpu.memory_space<any>>
      %c7_i32_285 = arith.constant 7 : i32
      %c128_i32_286 = arith.constant 128 : i32
      %370 = tpu.memref_slice %arg6[%10, %c7_i32_285, %c128_i32_286] : memref<2x8x384xf32, #tpu.memory_space<vmem>> -> memref<1x1x128xf32, #tpu.memory_space<vmem>>
      %371 = tpu.memref_squeeze %370 : memref<1x1x128xf32, #tpu.memory_space<vmem>> -> memref<1x128xf32, #tpu.memory_space<vmem>>
      %372 = tpu.memref_slice %arg7[%10, %c1_i32_283] : memref<2x3x!tpu.dma_semaphore, #tpu.memory_space<semaphore_mem>> -> memref<1x1x!tpu.dma_semaphore, #tpu.memory_space<semaphore_mem>>
      %373 = tpu.memref_squeeze %372 : memref<1x1x!tpu.dma_semaphore, #tpu.memory_space<semaphore_mem>> -> memref<!tpu.dma_semaphore, #tpu.memory_space<semaphore_mem>>
      tpu.enqueue_dma source(%369 : memref<1x128xf32, #tpu.memory_space<any>>) target(%371 : memref<1x128xf32, #tpu.memory_space<vmem>>) target_semaphore(%373 : memref<!tpu.dma_semaphore, #tpu.memory_space<semaphore_mem>>)
      %c7_i32_287 = arith.constant 7 : i32
      %374 = arith.addi %143, %c7_i32_287 : i32
      %c3_i32_288 = arith.constant 3 : i32
      %375 = arith.muli %374, %c3_i32_288 : i32
      %c2_i32_289 = arith.constant 2 : i32
      %376 = arith.addi %375, %c2_i32_289 : i32
      %377 = arith.index_cast %376 : i32 to index
      %378 = memref.load %arg1[%377] : memref<96xi32, #tpu.memory_space<smem>>
      %c2_i32_290 = arith.constant 2 : i32
      %c0_i32_291 = arith.constant 0 : i32
      %379 = tpu.memref_slice %arg4[%378, %c0_i32_291] : memref<11x128xf32, #tpu.memory_space<any>> -> memref<1x128xf32, #tpu.memory_space<any>>
      %c7_i32_292 = arith.constant 7 : i32
      %c256_i32_293 = arith.constant 256 : i32
      %380 = tpu.memref_slice %arg6[%10, %c7_i32_292, %c256_i32_293] : memref<2x8x384xf32, #tpu.memory_space<vmem>> -> memref<1x1x128xf32, #tpu.memory_space<vmem>>
      %381 = tpu.memref_squeeze %380 : memref<1x1x128xf32, #tpu.memory_space<vmem>> -> memref<1x128xf32, #tpu.memory_space<vmem>>
      %382 = tpu.memref_slice %arg7[%10, %c2_i32_290] : memref<2x3x!tpu.dma_semaphore, #tpu.memory_space<semaphore_mem>> -> memref<1x1x!tpu.dma_semaphore, #tpu.memory_space<semaphore_mem>>
      %383 = tpu.memref_squeeze %382 : memref<1x1x!tpu.dma_semaphore, #tpu.memory_space<semaphore_mem>> -> memref<!tpu.dma_semaphore, #tpu.memory_space<semaphore_mem>>
      tpu.enqueue_dma source(%379 : memref<1x128xf32, #tpu.memory_space<any>>) target(%381 : memref<1x128xf32, #tpu.memory_space<vmem>>) target_semaphore(%383 : memref<!tpu.dma_semaphore, #tpu.memory_space<semaphore_mem>>)
    } else {
    }
    %138 = arith.index_cast %9 : i32 to index
    %c0 = arith.constant 0 : index
    %c0_122 = arith.constant 0 : index
    %139 = vector.load %arg6[%138, %c0, %c0_122] : memref<2x8x384xf32, #tpu.memory_space<vmem>>, vector<1x8x384xf32>
    %140 = vector.shape_cast %139 : vector<1x8x384xf32> to vector<8x384xf32>
    %c0_123 = arith.constant 0 : index
    %c0_124 = arith.constant 0 : index
    %141 = vector.load %arg5[%c0_123, %c0_124] : memref<8x384xf32, #tpu.memory_space<vmem>>, vector<8x384xf32>
    tpu.vector_store %arg5[%c0_123, %c0_124], %140 {strides = array<i32>} : memref<8x384xf32, #tpu.memory_space<vmem>>, vector<8x384xf32>,
    return
  }
  func.func @transform_3(%arg0: i32, %arg1: memref<96xi32, #tpu.memory_space<smem>>) -> (i32, i32) {
    %c0_i32 = arith.constant 0 : i32
    %c0_i32_0 = arith.constant 0 : i32
    return %arg0, %c0_i32 : i32, i32
  }
}

</mosaic_0001>

<bundles_post_ra>
// kernel: tpu_custom_call.1
= control target key start
LH: loop header
LB: loop body
LE: loop exit
PB: predicated region body
PF: predicated region fallthrough
CT: control target
= control target key end

     0   :  { %s3900_s0 = inlined_call_operand.hbm [shape: s32[96], index: 0, kind: input, shape index: {}]   ;;  %s3901_s1 = inlined_call_operand.hbm [shape: f32[5,128], index: 1, kind: input, shape index: {}]   ;;  %s3902_s2 = inlined_call_operand.hbm [shape: f32[7,128], index: 2, kind: input, shape index: {}]   ;;  %s3903_s3 = inlined_call_operand.hbm [shape: f32[11,128], index: 3, kind: input, shape index: {}]   ;;  %s3904_s4 = inlined_call_operand.hbm [shape: f32[32,384], index: 4, kind: output, shape index: {}]  }
   0x1   :  { %3918 = sst [smem:[#allocation141_spill]] %s3904_s4  ;;  %s1451_s17 = scalar_lea.hbm %s3900_s0, 16 }
   0x2   :  { %p1452_p0 = scmp.ne.s32.totalorder %s3900_s0, %s1451_s17  ;;  %p1455_p1 = scmp.lt.u32.totalorder %s1451_s17, %s3900_s0 }
   0x4   :  { %p1457_p2 = pnand %p1455_p1, %p1452_p0 }
   0x6   :  { %1460 = shalt.err (!%p1457_p2)  }
   0x7   :  { %s2719_s22 = smov [#allocation5]  }
   0x8   :  { %10 = dma.hbm_to_smem %s3900_s0, 16, %s2719_s22, [#allocation4] }
   0x9   :  { %2653 = dma.done.wait [#allocation4], 16 }
   0xa   :  { %2654 = vsyncadd [#allocation4], 4294967280 }
   0xb   :  { %12 = sfence }
   0xc   :  { %13 = vsyncpa [#allocation7], 0 }
   0xd   :  { %15 = vsyncpa [#allocation7 + $0x1], 0  ;;  %s2760_s25 = smov 0   ;;  %s2762_s26 = smov 0  }
   0xe   :  { %s2764_s27 = smov 0  }
   0xf LB: > { %3919 = sst [smem:[#allocation132_spill]] %s2709_s25  ;;  %s1346_s0 = sadd.s32 4294967295, %s2717_s27   ;;  %s2717_s27 = sphi %s2764_s27, %s3948_s27   ;;  %s2713_s26 = sphi %s2762_s26, %s3950_s26   ;;  %s2709_s25 = sphi %s2760_s25, %s3949_s25  }
  0x10   : > { %3920 = sst [smem:[#allocation133_spill]] %s2713_s26  ;;  %s2777_s28 = sadd.s32 1, %s2717_s27  }
  0x11   : > { %3921 = sst [smem:[#allocation134_spill]] %s2717_s27  ;;  %s24_s29 = ssub.s32 %s2717_s27, %s2777_s28 }
  0x12   : > { %3922 = sst [smem:[#allocation135_spill]] %s2777_s28  ;;  %s27_s30 = sadd.s32 1, %s2713_s26 }
  0x13   : > { %p25_p3 = scmp.eq.s32.totalorder %s24_s29, 0  ;;  %p1347_p4 = scmp.ne.s32.totalorder %s24_s29, 0 }
  0x14   : > { %p31_p5 = scmp.eq.s32.totalorder %s2717_s27, 3  ;;  %p36_p6 = scmp.ne.s32.totalorder %s2713_s26, %s2709_s25 }
  0x15   : > { %s2786_s5 = scalar_select %p25_p3, %s2713_s26, %s27_s30  }
  0x16   : > { %p2788_p7 = por %p1347_p4, %p31_p5  ;;  %p37_p8 = scmp.eq.s32.totalorder %s1346_s0, 3 }
  0x17   : > { %3923 = sst [smem:[#allocation136_spill]] %s2786_s5  ;;  %p1348_p10 = scmp.ge.s32.totalorder %s2717_s27, 4 }
  0x18   : > { %s3924_s6 = scalar_select %p2788_p7, 1, 0 }
  0x19   : > { %p2792_p9 = por %p37_p8, %p36_p6  ;;  %46 = sbr.rel (%p1348_p10) target bundleno = 1240 (0x4d8), region = 12 }
  0x1a   : > { %3925 = sst [smem:[#allocation137_spill]] %s3924_s6 }
  0x1b   : > { %s3926_s7 = scalar_select %p2792_p9, 1, 0 }
  0x1d   : > { %3927 = sst [smem:[#allocation138_spill]] %s3926_s7 }
  0x20   : > { %s3905_s8 = sand.u32 1, %s2713_s26   ;;  %p54_p11 = scmp.lt.s32.totalorder %s2717_s27, 0 }
  0x21   : > { %s1417_s9 = smul.u32 24, %s3905_s8  ;;  %s55_s10 = ssub.s32 0, %s2717_s27 }
  0x22   : > { %s1349_s11 = smin.u32 %s2717_s27, %s55_s10  ;;  %p1352_p13 = scmp.ne.s32.totalorder %s2717_s27, 0 }
  0x23   : > { %s57_s12 = sand.u32 1, %s1349_s11   ;;  %s2806_s16 = scalar_lea.vmem [#allocation6], %s1417_s9 }
  0x24   : > { %s58_s13 = ssub.s32 0, %s57_s12  ;;  %3929 = sst [smem:[#allocation140_spill]] %s2806_s16 }
  0x25   : > { %s3952_s13 = smov (!%p54_p11, %s58_s13), %s57_s12  ;;  %70 = sbr.rel (%p1352_p13) target bundleno = 587 (0x24b), region = 16 }
  0x26   : > { %p1351_p12 = scmp.lt.s32.totalorder %s3952_s13, 0  ;;  %s64_s14 = sadd.s32 2, %s3952_s13 }
  0x27   : > { %s72_s17 = smul.u32 (!%p1352_p13), 24, %s2717_s27  ;;  %s2811_s18 = sshll.u32 (!%p1352_p13), %s2717_s27, 3 }
  0x28   : > { %s3954_s14 = smov (!%p1351_p12, %s64_s14), %s3952_s13 }
  0x29   : > { %3928 = sst [smem:[#allocation139_spill]] %s3954_s14  ;;  %s76_s19 = smul.u32 (!%p1352_p13), 24, %s3954_s14 }
  0x2a   : > { %s73_s21 = sld [smem:[#allocation5 + %s72_s17]] (!%p1352_p13)  ;;  %s78_s22 = smul.u32 (!%p1352_p13), 3, %s3954_s14 }
  0x2b   : > { %s91_s23 = sadd.s32 (!%p1352_p13), 1, %s72_s17  ;;  %s2816_s24 = scalar_lea.vmem (!%p1352_p13), [#allocation2], %s76_s19 }
  0x2c   : > { %s87_s0 = sshll.u32 %s2816_s24, 4  ;;  %s2821_s29 = sld [smem:[#allocation5 + %s91_s23]]  ;;  %s2819_s0 = int_to_ptr.vmem [resolvable:$true] %s87_s0 }
  0x2d   : > { %s1073_s30 = scalar_lea.vmem %s2816_s24, 8 [#allocation2]  ;;  %s2824_s9 = scalar_lea.sflag [#allocation3], %s78_s22 }
  0x2e   : > { %s2827_s10 = scalar_lea.sflag %s2824_s9, 1 [#allocation3]  ;;  %s106_s11 = sshll.u32 %s1073_s30, 4  ;;  %s2829_s11 = int_to_ptr.vmem [resolvable:$true] %s106_s11 }
  0x2f   : > { %s110_s12 = sadd.s32 2, %s72_s17  ;;  %s2839_s22 = scalar_lea.hbm %s3901_s1, 128 }
  0x30   : > { %s1354_s13 = sshll.u32 %s73_s21, 4  ;;  %s2834_s20 = sld [smem:[#allocation5 + %s110_s12]] }
  0x31   : > { %s75_s15 = scalar_lea.hbm %s3901_s1, %s1354_s13 }
  0x32   : > { %s1461_s5 = scalar_lea.hbm %s75_s15, 16  ;;  %p1464_p1 = scmp.lt.u32.totalorder %s75_s15, %s3901_s1 }
  0x33   : > { %p1462_p0 = scmp.ne.s32.totalorder %s75_s15, %s1461_s5  ;;  %p1465_p2 = scmp.lt.u32.totalorder %s2839_s22, %s1461_s5 }
  0x34   : > { %p1467_p4 = scmp.lt.u32.totalorder %s1461_s5, %s75_s15 }
  0x35   : > { %p1466_p3 = por %p1465_p2, %p1464_p1 }
  0x37   : > { %p1468_p5 = por %p1467_p4, %p1466_p3 }
  0x39   : > { %p1469_p6 = pnand %p1468_p5, %p1462_p0 }
  0x3b   : > { %1472 = shalt.err (!%p1469_p6)  }
  0x3c   : > { %s1473_s8 = scalar_lea.vmem %s2819_s0, 16  ;;  %s2720_s17 = smov [#allocation2]  }
  0x3d   : > { %p1474_p8 = scmp.ne.s32.totalorder %s2819_s0, %s1473_s8  ;;  %s1475_s7 = sshll.u32 %s2720_s17, 4  ;;  %s2847_s7 = int_to_ptr.vmem [resolvable:$false] %s1475_s7 }
  0x3e   : > { %s2850_s4 = scalar_lea.vmem %s2847_s7, 768  ;;  %p1478_p10 = scmp.lt.s32.totalorder %s2819_s0, %s2847_s7 }
  0x3f   : > { %p1479_p11 = scmp.lt.s32.totalorder %s2850_s4, %s1473_s8 }
  0x41   : > { %p1480_p12 = por %p1479_p11, %p1478_p10 }
  0x43   : > { %p1481_p13 = pnand %p1480_p12, %p1474_p8 }
  0x45   : > { %1484 = shalt.err (!%p1481_p13)  }
  0x46   : > { %90 = dma.hbm_to_vmem [thread:$0]  %s75_s15, 16, %s2819_s0, %s2824_s9 }
  0x47   : > { %s1355_s25 = sshll.u32 %s2821_s29, 4  ;;  %s1081_s5 = scalar_lea.vmem %s2816_s24, 16 [#allocation2] }
  0x48   : > { %s94_s12 = scalar_lea.hbm %s3902_s2, %s1355_s25  ;;  %s2863_s13 = scalar_lea.sflag %s2824_s9, 2 [#allocation3] }
  0x49   : > { %s1485_s19 = scalar_lea.hbm %s94_s12, 16  ;;  %s2868_s17 = scalar_lea.hbm %s3902_s2, 128 }
  0x4a   : > { %p1486_p0 = scmp.ne.s32.totalorder %s94_s12, %s1485_s19  ;;  %p1488_p1 = scmp.lt.u32.totalorder %s94_s12, %s3902_s2 }
  0x4b   : > { %p1489_p2 = scmp.lt.u32.totalorder %s2868_s17, %s1485_s19  ;;  %p1491_p4 = scmp.lt.u32.totalorder %s1485_s19, %s94_s12 }
  0x4d   : > { %p1490_p3 = por %p1489_p2, %p1488_p1 }
  0x4f   : > { %p1492_p5 = por %p1491_p4, %p1490_p3 }
  0x51   : > { %p1493_p6 = pnand %p1492_p5, %p1486_p0 }
  0x53   : > { %1496 = shalt.err (!%p1493_p6)  }
  0x54   : > { %s1497_s15 = scalar_lea.vmem %s2829_s11, 16  ;;  %p1502_p10 = scmp.lt.s32.totalorder %s2829_s11, %s2847_s7 }
  0x55   : > { %p1498_p8 = scmp.ne.s32.totalorder %s2829_s11, %s1497_s15  ;;  %p1503_p11 = scmp.lt.s32.totalorder %s2850_s4, %s1497_s15 }
  0x57   : > { %p1504_p12 = por %p1503_p11, %p1502_p10 }
  0x59   : > { %p1505_p13 = pnand %p1504_p12, %p1498_p8 }
  0x5b   : > { %1508 = shalt.err (!%p1505_p13)  }
  0x5c   : > { %109 = dma.hbm_to_vmem [thread:$0]  %s94_s12, 16, %s2829_s11, %s2827_s10 }
  0x5d   : > { %s125_s26 = sshll.u32 %s1081_s5, 4  ;;  %s3930_s6 = sadd.s32 1, %s2811_s18  ;;  %s126_s26 = int_to_ptr.vmem [resolvable:$true] %s125_s26 }
  0x5e   : > { %s2883_s0 = smul.u32 3, %s3930_s6  ;;  %s1356_s29 = sshll.u32 %s2834_s20, 4 }
  0x5f   : > { %s113_s30 = scalar_lea.hbm %s3903_s3, %s1356_s29  ;;  %s2895_s16 = scalar_lea.hbm %s3903_s3, 256 }
  0x60   : > { %s2890_s19 = sld [smem:[#allocation5 + %s2883_s0]]  ;;  %s1509_s23 = scalar_lea.hbm %s113_s30, 16 }
  0x61   : > { %p1510_p0 = scmp.ne.s32.totalorder %s113_s30, %s1509_s23  ;;  %p1512_p1 = scmp.lt.u32.totalorder %s113_s30, %s3903_s3 }
  0x62   : > { %p1513_p2 = scmp.lt.u32.totalorder %s2895_s16, %s1509_s23  ;;  %p1515_p4 = scmp.lt.u32.totalorder %s1509_s23, %s113_s30 }
  0x64   : > { %p1514_p3 = por %p1513_p2, %p1512_p1 }
  0x66   : > { %p1516_p5 = por %p1515_p4, %p1514_p3 }
  0x68   : > { %p1517_p6 = pnand %p1516_p5, %p1510_p0 }
  0x6a   : > { %1520 = shalt.err (!%p1517_p6)  }
  0x6b   : > { %s1521_s20 = scalar_lea.vmem %s126_s26, 16  ;;  %p1526_p10 = scmp.lt.s32.totalorder %s126_s26, %s2847_s7 }
  0x6c   : > { %p1522_p8 = scmp.ne.s32.totalorder %s126_s26, %s1521_s20  ;;  %p1527_p11 = scmp.lt.s32.totalorder %s2850_s4, %s1521_s20 }
  0x6e   : > { %p1528_p12 = por %p1527_p11, %p1526_p10 }
  0x70   : > { %p1529_p13 = pnand %p1528_p12, %p1522_p8 }
  0x72   : > { %1532 = shalt.err (!%p1529_p13)  }
  0x73   : > { %128 = dma.hbm_to_vmem [thread:$0]  %s113_s30, 16, %s126_s26, %s2863_s13 }
  0x74   : > { %s1089_s12 = scalar_lea.vmem %s2816_s24, 1 [#allocation2]  ;;  %s147_s6 = sadd.s32 1, %s2883_s0 }
  0x75   : > { %s143_s29 = sshll.u32 %s1089_s12, 4  ;;  %s2906_s25 = sld [smem:[#allocation5 + %s147_s6]]  ;;  %s144_s29 = int_to_ptr.vmem [resolvable:$true] %s143_s29 }
  0x76   : > { %s1094_s21 = scalar_lea.vmem %s2816_s24, 9 [#allocation2]  ;;  %s164_s8 = sadd.s32 2, %s2883_s0 }
  0x77   : > { %s160_s23 = sshll.u32 %s1094_s21, 4  ;;  %s1357_s15 = sshll.u32 %s2890_s19, 4  ;;  %s2911_s23 = int_to_ptr.vmem [resolvable:$true] %s160_s23 }
  0x78   : > { %s133_s20 = scalar_lea.hbm %s3901_s1, %s1357_s15  ;;  %s2916_s27 = sld [smem:[#allocation5 + %s164_s8]] }
  0x79   : > { %s1533_s26 = scalar_lea.hbm %s133_s20, 16  ;;  %p1536_p1 = scmp.lt.u32.totalorder %s133_s20, %s3901_s1 }
  0x7a   : > { %p1534_p0 = scmp.ne.s32.totalorder %s133_s20, %s1533_s26  ;;  %p1537_p2 = scmp.lt.u32.totalorder %s2839_s22, %s1533_s26 }
  0x7b   : > { %p1539_p4 = scmp.lt.u32.totalorder %s1533_s26, %s133_s20 }
  0x7c   : > { %p1538_p3 = por %p1537_p2, %p1536_p1 }
  0x7e   : > { %p1540_p5 = por %p1539_p4, %p1538_p3 }
  0x80   : > { %p1541_p6 = pnand %p1540_p5, %p1534_p0 }
  0x82   : > { %1544 = shalt.err (!%p1541_p6)  }
  0x83   : > { %s1545_s0 = scalar_lea.vmem %s144_s29, 16  ;;  %p1550_p10 = scmp.lt.s32.totalorder %s144_s29, %s2847_s7 }
  0x84   : > { %p1546_p8 = scmp.ne.s32.totalorder %s144_s29, %s1545_s0  ;;  %p1551_p11 = scmp.lt.s32.totalorder %s2850_s4, %s1545_s0 }
  0x86   : > { %p1552_p12 = por %p1551_p11, %p1550_p10 }
  0x88   : > { %p1553_p13 = pnand %p1552_p12, %p1546_p8 }
  0x8a   : > { %1556 = shalt.err (!%p1553_p13)  }
  0x8b   : > { %146 = dma.hbm_to_vmem [thread:$0]  %s133_s20, 16, %s144_s29, %s2824_s9 }
  0x8c   : > { %s1358_s28 = sshll.u32 %s2906_s25, 4  ;;  %s1099_s19 = scalar_lea.vmem %s2816_s24, 17 [#allocation2] }
  0x8d   : > { %s150_s21 = scalar_lea.hbm %s3902_s2, %s1358_s28  ;;  %s177_s8 = sshll.u32 %s1099_s19, 4  ;;  %s178_s8 = int_to_ptr.vmem [resolvable:$true] %s177_s8 }
  0x8e   : > { %s1557_s15 = scalar_lea.hbm %s150_s21, 16  ;;  %p1560_p1 = scmp.lt.u32.totalorder %s150_s21, %s3902_s2 }
  0x8f   : > { %p1558_p0 = scmp.ne.s32.totalorder %s150_s21, %s1557_s15  ;;  %p1561_p2 = scmp.lt.u32.totalorder %s2868_s17, %s1557_s15 }
  0x90   : > { %p1563_p4 = scmp.lt.u32.totalorder %s1557_s15, %s150_s21 }
  0x91   : > { %p1562_p3 = por %p1561_p2, %p1560_p1 }
  0x93   : > { %p1564_p5 = por %p1563_p4, %p1562_p3 }
  0x95   : > { %p1565_p6 = pnand %p1564_p5, %p1558_p0 }
  0x97   : > { %1568 = shalt.err (!%p1565_p6)  }
  0x98   : > { %s1569_s29 = scalar_lea.vmem %s2911_s23, 16  ;;  %p1574_p10 = scmp.lt.s32.totalorder %s2911_s23, %s2847_s7 }
  0x99   : > { %p1570_p8 = scmp.ne.s32.totalorder %s2911_s23, %s1569_s29  ;;  %p1575_p11 = scmp.lt.s32.totalorder %s2850_s4, %s1569_s29 }
  0x9b   : > { %p1576_p12 = por %p1575_p11, %p1574_p10 }
  0x9d   : > { %p1577_p13 = pnand %p1576_p12, %p1570_p8 }
  0x9f   : > { %1580 = shalt.err (!%p1577_p13)  }
  0xa0   : > { %163 = dma.hbm_to_vmem [thread:$0]  %s150_s21, 16, %s2911_s23, %s2827_s10 }
  0xa1   : > { %s181_s25 = sadd.s32 2, %s2811_s18  ;;  %s1359_s20 = sshll.u32 %s2916_s27, 4 }
  0xa2   : > { %s2943_s26 = smul.u32 3, %s181_s25  ;;  %s167_s28 = scalar_lea.hbm %s3903_s3, %s1359_s20 }
  0xa3   : > { %s1104_s19 = scalar_lea.vmem %s2816_s24, 2 [#allocation2]  ;;  %s1581_s12 = scalar_lea.hbm %s167_s28, 16 }
  0xa4   : > { %p1582_p0 = scmp.ne.s32.totalorder %s167_s28, %s1581_s12  ;;  %p1584_p1 = scmp.lt.u32.totalorder %s167_s28, %s3903_s3 }
  0xa5   : > { %p1585_p2 = scmp.lt.u32.totalorder %s2895_s16, %s1581_s12  ;;  %p1587_p4 = scmp.lt.u32.totalorder %s1581_s12, %s167_s28 }
  0xa7   : > { %p1586_p3 = por %p1585_p2, %p1584_p1 }
  0xa9   : > { %p1588_p5 = por %p1587_p4, %p1586_p3 }
  0xab   : > { %p1589_p6 = pnand %p1588_p5, %p1582_p0 }
  0xad   : > { %1592 = shalt.err (!%p1589_p6)  }
  0xae   : > { %s1593_s27 = scalar_lea.vmem %s178_s8, 16  ;;  %p1598_p10 = scmp.lt.s32.totalorder %s178_s8, %s2847_s7 }
  0xaf   : > { %p1594_p8 = scmp.ne.s32.totalorder %s178_s8, %s1593_s27  ;;  %p1599_p11 = scmp.lt.s32.totalorder %s2850_s4, %s1593_s27 }
  0xb1   : > { %p1600_p12 = por %p1599_p11, %p1598_p10 }
  0xb3   : > { %p1601_p13 = pnand %p1600_p12, %p1594_p8 }
  0xb5   : > { %1604 = shalt.err (!%p1601_p13)  }
  0xb6   : > { %180 = dma.hbm_to_vmem [thread:$0]  %s167_s28, 16, %s178_s8, %s2863_s13 }
  0xb7   : > { %s183_s23 = sld [smem:[#allocation5 + %s2943_s26]]  ;;  %s195_s21 = sshll.u32 %s1104_s19, 4  ;;  %s2957_s21 = int_to_ptr.vmem [resolvable:$true] %s195_s21 }
  0xb8   : > { %s199_s11 = sadd.s32 1, %s2943_s26  ;;  %s1109_s29 = scalar_lea.vmem %s2816_s24, 10 [#allocation2] }
  0xb9   : > { %s2960_s5 = sld [smem:[#allocation5 + %s199_s11]]  ;;  %s212_s25 = sshll.u32 %s1109_s29, 4  ;;  %s2964_s25 = int_to_ptr.vmem [resolvable:$true] %s212_s25 }
  0xba   : > { %s216_s20 = sadd.s32 2, %s2943_s26  ;;  %s1114_s0 = scalar_lea.vmem %s2816_s24, 18 [#allocation2] }
  0xbb   : > { %s2966_s30 = sld [smem:[#allocation5 + %s216_s20]]  ;;  %s233_s12 = sadd.s32 3, %s2811_s18 }
  0xbc   : > { %s229_s15 = sshll.u32 %s1114_s0, 4  ;;  %s2973_s15 = int_to_ptr.vmem [resolvable:$true] %s229_s15 }
  0xbd   : > { %s1360_s6 = sshll.u32 %s183_s23, 4 }
  0xbe   : > { %s185_s19 = scalar_lea.hbm %s3901_s1, %s1360_s6 }
  0xbf   : > { %s1605_s27 = scalar_lea.hbm %s185_s19, 16  ;;  %p1608_p1 = scmp.lt.u32.totalorder %s185_s19, %s3901_s1 }
  0xc0   : > { %p1606_p0 = scmp.ne.s32.totalorder %s185_s19, %s1605_s27  ;;  %p1609_p2 = scmp.lt.u32.totalorder %s2839_s22, %s1605_s27 }
  0xc1   : > { %p1611_p4 = scmp.lt.u32.totalorder %s1605_s27, %s185_s19 }
  0xc2   : > { %p1610_p3 = por %p1609_p2, %p1608_p1 }
  0xc4   : > { %p1612_p5 = por %p1611_p4, %p1610_p3 }
  0xc6   : > { %p1613_p6 = pnand %p1612_p5, %p1606_p0 }
  0xc8   : > { %1616 = shalt.err (!%p1613_p6)  }
  0xc9   : > { %s1617_s26 = scalar_lea.vmem %s2957_s21, 16  ;;  %p1622_p10 = scmp.lt.s32.totalorder %s2957_s21, %s2847_s7 }
  0xca   : > { %p1618_p8 = scmp.ne.s32.totalorder %s2957_s21, %s1617_s26  ;;  %p1623_p11 = scmp.lt.s32.totalorder %s2850_s4, %s1617_s26 }
  0xcc   : > { %p1624_p12 = por %p1623_p11, %p1622_p10 }
  0xce   : > { %p1625_p13 = pnand %p1624_p12, %p1618_p8 }
  0xd0   : > { %1628 = shalt.err (!%p1625_p13)  }
  0xd1   : > { %198 = dma.hbm_to_vmem [thread:$0]  %s185_s19, 16, %s2957_s21, %s2824_s9 }
  0xd2   : > { %s1361_s14 = sshll.u32 %s2960_s5, 4  ;;  %s2987_s23 = smul.u32 3, %s233_s12 }
  0xd3   : > { %s202_s0 = scalar_lea.hbm %s3902_s2, %s1361_s14  ;;  %s1362_s6 = sshll.u32 %s2966_s30, 4 }
  0xd4   : > { %s1629_s8 = scalar_lea.hbm %s202_s0, 16  ;;  %p1632_p1 = scmp.lt.u32.totalorder %s202_s0, %s3902_s2 }
  0xd5   : > { %p1630_p0 = scmp.ne.s32.totalorder %s202_s0, %s1629_s8  ;;  %p1633_p2 = scmp.lt.u32.totalorder %s2868_s17, %s1629_s8 }
  0xd6   : > { %p1635_p4 = scmp.lt.u32.totalorder %s1629_s8, %s202_s0 }
  0xd7   : > { %p1634_p3 = por %p1633_p2, %p1632_p1 }
  0xd9   : > { %p1636_p5 = por %p1635_p4, %p1634_p3 }
  0xdb   : > { %p1637_p6 = pnand %p1636_p5, %p1630_p0 }
  0xdd   : > { %1640 = shalt.err (!%p1637_p6)  }
  0xde   : > { %s1641_s21 = scalar_lea.vmem %s2964_s25, 16  ;;  %p1646_p10 = scmp.lt.s32.totalorder %s2964_s25, %s2847_s7 }
  0xdf   : > { %p1642_p8 = scmp.ne.s32.totalorder %s2964_s25, %s1641_s21  ;;  %p1647_p11 = scmp.lt.s32.totalorder %s2850_s4, %s1641_s21 }
  0xe1   : > { %p1648_p12 = por %p1647_p11, %p1646_p10 }
  0xe3   : > { %p1649_p13 = pnand %p1648_p12, %p1642_p8 }
  0xe5   : > { %1652 = shalt.err (!%p1649_p13)  }
  0xe6   : > { %215 = dma.hbm_to_vmem [thread:$0]  %s202_s0, 16, %s2964_s25, %s2827_s10 }
  0xe7   : > { %s219_s12 = scalar_lea.hbm %s3903_s3, %s1362_s6  ;;  %s3008_s19 = sld [smem:[#allocation5 + %s2987_s23]] }
  0xe8   : > { %s1653_s11 = scalar_lea.hbm %s219_s12, 16  ;;  %p1656_p1 = scmp.lt.u32.totalorder %s219_s12, %s3903_s3 }
  0xe9   : > { %p1654_p0 = scmp.ne.s32.totalorder %s219_s12, %s1653_s11  ;;  %p1657_p2 = scmp.lt.u32.totalorder %s2895_s16, %s1653_s11 }
  0xea   : > { %p1659_p4 = scmp.lt.u32.totalorder %s1653_s11, %s219_s12 }
  0xeb   : > { %p1658_p3 = por %p1657_p2, %p1656_p1 }
  0xed   : > { %p1660_p5 = por %p1659_p4, %p1658_p3 }
  0xef   : > { %p1661_p6 = pnand %p1660_p5, %p1654_p0 }
  0xf1   : > { %1664 = shalt.err (!%p1661_p6)  }
  0xf2   : > { %s1665_s25 = scalar_lea.vmem %s2973_s15, 16  ;;  %p1670_p10 = scmp.lt.s32.totalorder %s2973_s15, %s2847_s7 }
  0xf3   : > { %p1666_p8 = scmp.ne.s32.totalorder %s2973_s15, %s1665_s25  ;;  %p1671_p11 = scmp.lt.s32.totalorder %s2850_s4, %s1665_s25 }
  0xf5   : > { %p1672_p12 = por %p1671_p11, %p1670_p10 }
  0xf7   : > { %p1673_p13 = pnand %p1672_p12, %p1666_p8 }
  0xf9   : > { %1676 = shalt.err (!%p1673_p13)  }
  0xfa   : > { %232 = dma.hbm_to_vmem [thread:$0]  %s219_s12, 16, %s2973_s15, %s2863_s13 }
  0xfb   : > { %s1119_s29 = scalar_lea.vmem %s2816_s24, 3 [#allocation2]  ;;  %s251_s20 = sadd.s32 1, %s2987_s23 }
  0xfc   : > { %s247_s0 = sshll.u32 %s1119_s29, 4  ;;  %s3023_s6 = sld [smem:[#allocation5 + %s251_s20]]  ;;  %s248_s0 = int_to_ptr.vmem [resolvable:$true] %s247_s0 }
  0xfd   : > { %s1124_s8 = scalar_lea.vmem %s2816_s24, 11 [#allocation2]  ;;  %s268_s27 = sadd.s32 2, %s2987_s23 }
  0xfe   : > { %s264_s28 = sshll.u32 %s1124_s8, 4  ;;  %s1363_s21 = sshll.u32 %s3008_s19, 4  ;;  %s3028_s28 = int_to_ptr.vmem [resolvable:$true] %s264_s28 }
  0xff   : > { %s237_s11 = scalar_lea.hbm %s3901_s1, %s1363_s21  ;;  %s3033_s26 = sld [smem:[#allocation5 + %s268_s27]] }
 0x100   : > { %s1677_s15 = scalar_lea.hbm %s237_s11, 16  ;;  %p1680_p1 = scmp.lt.u32.totalorder %s237_s11, %s3901_s1 }
 0x101   : > { %p1678_p0 = scmp.ne.s32.totalorder %s237_s11, %s1677_s15  ;;  %p1681_p2 = scmp.lt.u32.totalorder %s2839_s22, %s1677_s15 }
 0x102   : > { %p1683_p4 = scmp.lt.u32.totalorder %s1677_s15, %s237_s11 }
 0x103   : > { %p1682_p3 = por %p1681_p2, %p1680_p1 }
 0x105   : > { %p1684_p5 = por %p1683_p4, %p1682_p3 }
 0x107   : > { %p1685_p6 = pnand %p1684_p5, %p1678_p0 }
 0x109   : > { %1688 = shalt.err (!%p1685_p6)  }
 0x10a   : > { %s1689_s23 = scalar_lea.vmem %s248_s0, 16  ;;  %p1694_p10 = scmp.lt.s32.totalorder %s248_s0, %s2847_s7 }
 0x10b   : > { %p1690_p8 = scmp.ne.s32.totalorder %s248_s0, %s1689_s23  ;;  %p1695_p11 = scmp.lt.s32.totalorder %s2850_s4, %s1689_s23 }
 0x10d   : > { %p1696_p12 = por %p1695_p11, %p1694_p10 }
 0x10f   : > { %p1697_p13 = pnand %p1696_p12, %p1690_p8 }
 0x111   : > { %1700 = shalt.err (!%p1697_p13)  }
 0x112   : > { %250 = dma.hbm_to_vmem [thread:$0]  %s237_s11, 16, %s248_s0, %s2824_s9 }
 0x113   : > { %s1364_s19 = sshll.u32 %s3023_s6, 4  ;;  %s1129_s25 = scalar_lea.vmem %s2816_s24, 19 [#allocation2] }
 0x114   : > { %s254_s8 = scalar_lea.hbm %s3902_s2, %s1364_s19  ;;  %s281_s27 = sshll.u32 %s1129_s25, 4  ;;  %s282_s27 = int_to_ptr.vmem [resolvable:$true] %s281_s27 }
 0x115   : > { %s1701_s21 = scalar_lea.hbm %s254_s8, 16  ;;  %p1704_p1 = scmp.lt.u32.totalorder %s254_s8, %s3902_s2 }
 0x116   : > { %p1702_p0 = scmp.ne.s32.totalorder %s254_s8, %s1701_s21  ;;  %p1705_p2 = scmp.lt.u32.totalorder %s2868_s17, %s1701_s21 }
 0x117   : > { %p1707_p4 = scmp.lt.u32.totalorder %s1701_s21, %s254_s8 }
 0x118   : > { %p1706_p3 = por %p1705_p2, %p1704_p1 }
 0x11a   : > { %p1708_p5 = por %p1707_p4, %p1706_p3 }
 0x11c   : > { %p1709_p6 = pnand %p1708_p5, %p1702_p0 }
 0x11e   : > { %1712 = shalt.err (!%p1709_p6)  }
 0x11f   : > { %s1713_s0 = scalar_lea.vmem %s3028_s28, 16  ;;  %p1718_p10 = scmp.lt.s32.totalorder %s3028_s28, %s2847_s7 }
 0x120   : > { %p1714_p8 = scmp.ne.s32.totalorder %s3028_s28, %s1713_s0  ;;  %p1719_p11 = scmp.lt.s32.totalorder %s2850_s4, %s1713_s0 }
 0x122   : > { %p1720_p12 = por %p1719_p11, %p1718_p10 }
 0x124   : > { %p1721_p13 = pnand %p1720_p12, %p1714_p8 }
 0x126   : > { %1724 = shalt.err (!%p1721_p13)  }
 0x127   : > { %267 = dma.hbm_to_vmem [thread:$0]  %s254_s8, 16, %s3028_s28, %s2827_s10 }
 0x128   : > { %s285_s6 = sadd.s32 4, %s2811_s18  ;;  %s1365_s11 = sshll.u32 %s3033_s26, 4 }
 0x129   : > { %s3060_s15 = smul.u32 3, %s285_s6  ;;  %s271_s23 = scalar_lea.hbm %s3903_s3, %s1365_s11 }
 0x12a   : > { %s1134_s19 = scalar_lea.vmem %s2816_s24, 4 [#allocation2]  ;;  %s1725_s25 = scalar_lea.hbm %s271_s23, 16 }
 0x12b   : > { %p1726_p0 = scmp.ne.s32.totalorder %s271_s23, %s1725_s25  ;;  %p1728_p1 = scmp.lt.u32.totalorder %s271_s23, %s3903_s3 }
 0x12c   : > { %p1729_p2 = scmp.lt.u32.totalorder %s2895_s16, %s1725_s25  ;;  %p1731_p4 = scmp.lt.u32.totalorder %s1725_s25, %s271_s23 }
 0x12e   : > { %p1730_p3 = por %p1729_p2, %p1728_p1 }
 0x130   : > { %p1732_p5 = por %p1731_p4, %p1730_p3 }
 0x132   : > { %p1733_p6 = pnand %p1732_p5, %p1726_p0 }
 0x134   : > { %1736 = shalt.err (!%p1733_p6)  }
 0x135   : > { %s1737_s28 = scalar_lea.vmem %s282_s27, 16  ;;  %p1742_p10 = scmp.lt.s32.totalorder %s282_s27, %s2847_s7 }
 0x136   : > { %p1738_p8 = scmp.ne.s32.totalorder %s282_s27, %s1737_s28  ;;  %p1743_p11 = scmp.lt.s32.totalorder %s2850_s4, %s1737_s28 }
 0x138   : > { %p1744_p12 = por %p1743_p11, %p1742_p10 }
 0x13a   : > { %p1745_p13 = pnand %p1744_p12, %p1738_p8 }
 0x13c   : > { %1748 = shalt.err (!%p1745_p13)  }
 0x13d   : > { %284 = dma.hbm_to_vmem [thread:$0]  %s271_s23, 16, %s282_s27, %s2863_s13 }
 0x13e   : > { %s287_s26 = sld [smem:[#allocation5 + %s3060_s15]]  ;;  %s299_s8 = sshll.u32 %s1134_s19, 4  ;;  %s3074_s8 = int_to_ptr.vmem [resolvable:$true] %s299_s8 }
 0x13f   : > { %s303_s21 = sadd.s32 1, %s3060_s15  ;;  %s1139_s30 = scalar_lea.vmem %s2816_s24, 12 [#allocation2] }
 0x140   : > { %s3077_s5 = sld [smem:[#allocation5 + %s303_s21]]  ;;  %s316_s0 = sshll.u32 %s1139_s30, 4  ;;  %s3081_s0 = int_to_ptr.vmem [resolvable:$true] %s316_s0 }
 0x141   : > { %s320_s6 = sadd.s32 2, %s3060_s15  ;;  %s1144_s12 = scalar_lea.vmem %s2816_s24, 20 [#allocation2] }
 0x142   : > { %s3083_s11 = sld [smem:[#allocation5 + %s320_s6]]  ;;  %s337_s14 = sadd.s32 5, %s2811_s18 }
 0x143   : > { %s333_s29 = sshll.u32 %s1144_s12, 4  ;;  %s3090_s29 = int_to_ptr.vmem [resolvable:$true] %s333_s29 }
 0x144   : > { %s1366_s25 = sshll.u32 %s287_s26, 4 }
 0x145   : > { %s289_s19 = scalar_lea.hbm %s3901_s1, %s1366_s25 }
 0x146   : > { %s1749_s20 = scalar_lea.hbm %s289_s19, 16  ;;  %p1752_p1 = scmp.lt.u32.totalorder %s289_s19, %s3901_s1 }
 0x147   : > { %p1750_p0 = scmp.ne.s32.totalorder %s289_s19, %s1749_s20  ;;  %p1753_p2 = scmp.lt.u32.totalorder %s2839_s22, %s1749_s20 }
 0x148   : > { %p1755_p4 = scmp.lt.u32.totalorder %s1749_s20, %s289_s19 }
 0x149   : > { %p1754_p3 = por %p1753_p2, %p1752_p1 }
 0x14b   : > { %p1756_p5 = por %p1755_p4, %p1754_p3 }
 0x14d   : > { %p1757_p6 = pnand %p1756_p5, %p1750_p0 }
 0x14f   : > { %1760 = shalt.err (!%p1757_p6)  }
 0x150   : > { %s1761_s15 = scalar_lea.vmem %s3074_s8, 16  ;;  %p1766_p10 = scmp.lt.s32.totalorder %s3074_s8, %s2847_s7 }
 0x151   : > { %p1762_p8 = scmp.ne.s32.totalorder %s3074_s8, %s1761_s15  ;;  %p1767_p11 = scmp.lt.s32.totalorder %s2850_s4, %s1761_s15 }
 0x153   : > { %p1768_p12 = por %p1767_p11, %p1766_p10 }
 0x155   : > { %p1769_p13 = pnand %p1768_p12, %p1762_p8 }
 0x157   : > { %1772 = shalt.err (!%p1769_p13)  }
 0x158   : > { %302 = dma.hbm_to_vmem [thread:$0]  %s289_s19, 16, %s3074_s8, %s2824_s9 }
 0x159   : > { %s1367_s26 = sshll.u32 %s3077_s5, 4  ;;  %s3104_s30 = smul.u32 3, %s337_s14 }
 0x15a   : > { %s306_s25 = scalar_lea.hbm %s3902_s2, %s1367_s26  ;;  %s1368_s27 = sshll.u32 %s3083_s11, 4 }
 0x15b   : > { %s1773_s23 = scalar_lea.hbm %s306_s25, 16  ;;  %p1776_p1 = scmp.lt.u32.totalorder %s306_s25, %s3902_s2 }
 0x15c   : > { %p1774_p0 = scmp.ne.s32.totalorder %s306_s25, %s1773_s23  ;;  %p1777_p2 = scmp.lt.u32.totalorder %s2868_s17, %s1773_s23 }
 0x15d   : > { %p1779_p4 = scmp.lt.u32.totalorder %s1773_s23, %s306_s25 }
 0x15e   : > { %p1778_p3 = por %p1777_p2, %p1776_p1 }
 0x160   : > { %p1780_p5 = por %p1779_p4, %p1778_p3 }
 0x162   : > { %p1781_p6 = pnand %p1780_p5, %p1774_p0 }
 0x164   : > { %1784 = shalt.err (!%p1781_p6)  }
 0x165   : > { %s1785_s8 = scalar_lea.vmem %s3081_s0, 16  ;;  %p1790_p10 = scmp.lt.s32.totalorder %s3081_s0, %s2847_s7 }
 0x166   : > { %p1786_p8 = scmp.ne.s32.totalorder %s3081_s0, %s1785_s8  ;;  %p1791_p11 = scmp.lt.s32.totalorder %s2850_s4, %s1785_s8 }
 0x168   : > { %p1792_p12 = por %p1791_p11, %p1790_p10 }
 0x16a   : > { %p1793_p13 = pnand %p1792_p12, %p1786_p8 }
 0x16c   : > { %1796 = shalt.err (!%p1793_p13)  }
 0x16d   : > { %319 = dma.hbm_to_vmem [thread:$0]  %s306_s25, 16, %s3081_s0, %s2827_s10 }
 0x16e   : > { %s323_s14 = scalar_lea.hbm %s3903_s3, %s1368_s27  ;;  %s3125_s19 = sld [smem:[#allocation5 + %s3104_s30]] }
 0x16f   : > { %s1797_s21 = scalar_lea.hbm %s323_s14, 16  ;;  %p1800_p1 = scmp.lt.u32.totalorder %s323_s14, %s3903_s3 }
 0x170   : > { %p1798_p0 = scmp.ne.s32.totalorder %s323_s14, %s1797_s21  ;;  %p1801_p2 = scmp.lt.u32.totalorder %s2895_s16, %s1797_s21 }
 0x171   : > { %p1803_p4 = scmp.lt.u32.totalorder %s1797_s21, %s323_s14 }
 0x172   : > { %p1802_p3 = por %p1801_p2, %p1800_p1 }
 0x174   : > { %p1804_p5 = por %p1803_p4, %p1802_p3 }
 0x176   : > { %p1805_p6 = pnand %p1804_p5, %p1798_p0 }
 0x178   : > { %1808 = shalt.err (!%p1805_p6)  }
 0x179   : > { %s1809_s0 = scalar_lea.vmem %s3090_s29, 16  ;;  %p1814_p10 = scmp.lt.s32.totalorder %s3090_s29, %s2847_s7 }
 0x17a   : > { %p1810_p8 = scmp.ne.s32.totalorder %s3090_s29, %s1809_s0  ;;  %p1815_p11 = scmp.lt.s32.totalorder %s2850_s4, %s1809_s0 }
 0x17c   : > { %p1816_p12 = por %p1815_p11, %p1814_p10 }
 0x17e   : > { %p1817_p13 = pnand %p1816_p12, %p1810_p8 }
 0x180   : > { %1820 = shalt.err (!%p1817_p13)  }
 0x181   : > { %336 = dma.hbm_to_vmem [thread:$0]  %s323_s14, 16, %s3090_s29, %s2863_s13 }
 0x182   : > { %s1149_s6 = scalar_lea.vmem %s2816_s24, 5 [#allocation2]  ;;  %s355_s12 = sadd.s32 1, %s3104_s30 }
 0x183   : > { %s351_s25 = sshll.u32 %s1149_s6, 4  ;;  %s3140_s27 = sld [smem:[#allocation5 + %s355_s12]]  ;;  %s352_s25 = int_to_ptr.vmem [resolvable:$true] %s351_s25 }
 0x184   : > { %s1154_s23 = scalar_lea.vmem %s2816_s24, 13 [#allocation2]  ;;  %s372_s28 = sadd.s32 2, %s3104_s30 }
 0x185   : > { %s368_s20 = sshll.u32 %s1154_s23, 4  ;;  %s1369_s8 = sshll.u32 %s3125_s19, 4  ;;  %s3145_s20 = int_to_ptr.vmem [resolvable:$true] %s368_s20 }
 0x186   : > { %s341_s21 = scalar_lea.hbm %s3901_s1, %s1369_s8  ;;  %s3150_s15 = sld [smem:[#allocation5 + %s372_s28]] }
 0x187   : > { %s1821_s29 = scalar_lea.hbm %s341_s21, 16  ;;  %p1824_p1 = scmp.lt.u32.totalorder %s341_s21, %s3901_s1 }
 0x188   : > { %p1822_p0 = scmp.ne.s32.totalorder %s341_s21, %s1821_s29  ;;  %p1825_p2 = scmp.lt.u32.totalorder %s2839_s22, %s1821_s29 }
 0x189   : > { %p1827_p4 = scmp.lt.u32.totalorder %s1821_s29, %s341_s21 }
 0x18a   : > { %p1826_p3 = por %p1825_p2, %p1824_p1 }
 0x18c   : > { %p1828_p5 = por %p1827_p4, %p1826_p3 }
 0x18e   : > { %p1829_p6 = pnand %p1828_p5, %p1822_p0 }
 0x190   : > { %1832 = shalt.err (!%p1829_p6)  }
 0x191   : > { %s1833_s30 = scalar_lea.vmem %s352_s25, 16  ;;  %p1838_p10 = scmp.lt.s32.totalorder %s352_s25, %s2847_s7 }
 0x192   : > { %p1834_p8 = scmp.ne.s32.totalorder %s352_s25, %s1833_s30  ;;  %p1839_p11 = scmp.lt.s32.totalorder %s2850_s4, %s1833_s30 }
 0x194   : > { %p1840_p12 = por %p1839_p11, %p1838_p10 }
 0x196   : > { %p1841_p13 = pnand %p1840_p12, %p1834_p8 }
 0x198   : > { %1844 = shalt.err (!%p1841_p13)  }
 0x199   : > { %354 = dma.hbm_to_vmem [thread:$0]  %s341_s21, 16, %s352_s25, %s2824_s9 }
 0x19a   : > { %s1370_s19 = sshll.u32 %s3140_s27, 4  ;;  %s1159_s0 = scalar_lea.vmem %s2816_s24, 21 [#allocation2] }
 0x19b   : > { %s358_s23 = scalar_lea.hbm %s3902_s2, %s1370_s19  ;;  %s385_s28 = sshll.u32 %s1159_s0, 4  ;;  %s386_s28 = int_to_ptr.vmem [resolvable:$true] %s385_s28 }
 0x19c   : > { %s1845_s8 = scalar_lea.hbm %s358_s23, 16  ;;  %p1848_p1 = scmp.lt.u32.totalorder %s358_s23, %s3902_s2 }
 0x19d   : > { %p1846_p0 = scmp.ne.s32.totalorder %s358_s23, %s1845_s8  ;;  %p1849_p2 = scmp.lt.u32.totalorder %s2868_s17, %s1845_s8 }
 0x19e   : > { %p1851_p4 = scmp.lt.u32.totalorder %s1845_s8, %s358_s23 }
 0x19f   : > { %p1850_p3 = por %p1849_p2, %p1848_p1 }
 0x1a1   : > { %p1852_p5 = por %p1851_p4, %p1850_p3 }
 0x1a3   : > { %p1853_p6 = pnand %p1852_p5, %p1846_p0 }
 0x1a5   : > { %1856 = shalt.err (!%p1853_p6)  }
 0x1a6   : > { %s1857_s25 = scalar_lea.vmem %s3145_s20, 16  ;;  %p1862_p10 = scmp.lt.s32.totalorder %s3145_s20, %s2847_s7 }
 0x1a7   : > { %p1858_p8 = scmp.ne.s32.totalorder %s3145_s20, %s1857_s25  ;;  %p1863_p11 = scmp.lt.s32.totalorder %s2850_s4, %s1857_s25 }
 0x1a9   : > { %p1864_p12 = por %p1863_p11, %p1862_p10 }
 0x1ab   : > { %p1865_p13 = pnand %p1864_p12, %p1858_p8 }
 0x1ad   : > { %1868 = shalt.err (!%p1865_p13)  }
 0x1ae   : > { %371 = dma.hbm_to_vmem [thread:$0]  %s358_s23, 16, %s3145_s20, %s2827_s10 }
 0x1af   : > { %s389_s27 = sadd.s32 6, %s2811_s18  ;;  %s1371_s21 = sshll.u32 %s3150_s15, 4 }
 0x1b0   : > { %s3177_s29 = smul.u32 3, %s389_s27  ;;  %s375_s30 = scalar_lea.hbm %s3903_s3, %s1371_s21 }
 0x1b1   : > { %s1164_s19 = scalar_lea.vmem %s2816_s24, 6 [#allocation2]  ;;  %s1869_s0 = scalar_lea.hbm %s375_s30, 16 }
 0x1b2   : > { %p1870_p0 = scmp.ne.s32.totalorder %s375_s30, %s1869_s0  ;;  %p1872_p1 = scmp.lt.u32.totalorder %s375_s30, %s3903_s3 }
 0x1b3   : > { %p1873_p2 = scmp.lt.u32.totalorder %s2895_s16, %s1869_s0  ;;  %p1875_p4 = scmp.lt.u32.totalorder %s1869_s0, %s375_s30 }
 0x1b5   : > { %p1874_p3 = por %p1873_p2, %p1872_p1 }
 0x1b7   : > { %p1876_p5 = por %p1875_p4, %p1874_p3 }
 0x1b9   : > { %p1877_p6 = pnand %p1876_p5, %p1870_p0 }
 0x1bb   : > { %1880 = shalt.err (!%p1877_p6)  }
 0x1bc   : > { %s1881_s20 = scalar_lea.vmem %s386_s28, 16  ;;  %p1886_p10 = scmp.lt.s32.totalorder %s386_s28, %s2847_s7 }
 0x1bd   : > { %p1882_p8 = scmp.ne.s32.totalorder %s386_s28, %s1881_s20  ;;  %p1887_p11 = scmp.lt.s32.totalorder %s2850_s4, %s1881_s20 }
 0x1bf   : > { %p1888_p12 = por %p1887_p11, %p1886_p10 }
 0x1c1   : > { %p1889_p13 = pnand %p1888_p12, %p1882_p8 }
 0x1c3   : > { %1892 = shalt.err (!%p1889_p13)  }
 0x1c4   : > { %388 = dma.hbm_to_vmem [thread:$0]  %s375_s30, 16, %s386_s28, %s2863_s13 }
 0x1c5   : > { %s391_s15 = sld [smem:[#allocation5 + %s3177_s29]]  ;;  %s403_s23 = sshll.u32 %s1164_s19, 4  ;;  %s3191_s23 = int_to_ptr.vmem [resolvable:$true] %s403_s23 }
 0x1c6   : > { %s407_s8 = sadd.s32 1, %s3177_s29  ;;  %s1169_s11 = scalar_lea.vmem %s2816_s24, 14 [#allocation2] }
 0x1c7   : > { %s3194_s5 = sld [smem:[#allocation5 + %s407_s8]]  ;;  %s420_s25 = sshll.u32 %s1169_s11, 4  ;;  %s3198_s25 = int_to_ptr.vmem [resolvable:$true] %s420_s25 }
 0x1c8   : > { %s424_s27 = sadd.s32 2, %s3177_s29  ;;  %s1174_s14 = scalar_lea.vmem %s2816_s24, 22 [#allocation2] }
 0x1c9   : > { %s3200_s21 = sld [smem:[#allocation5 + %s424_s27]]  ;;  %s441_s26 = sadd.s32 7, %s2811_s18 }
 0x1ca   : > { %s437_s6 = sshll.u32 %s1174_s14, 4  ;;  %s3207_s6 = int_to_ptr.vmem [resolvable:$true] %s437_s6 }
 0x1cb   : > { %s1372_s0 = sshll.u32 %s391_s15, 4 }
 0x1cc   : > { %s393_s19 = scalar_lea.hbm %s3901_s1, %s1372_s0 }
 0x1cd   : > { %s1893_s12 = scalar_lea.hbm %s393_s19, 16  ;;  %p1896_p1 = scmp.lt.u32.totalorder %s393_s19, %s3901_s1 }
 0x1ce   : > { %p1894_p0 = scmp.ne.s32.totalorder %s393_s19, %s1893_s12  ;;  %p1897_p2 = scmp.lt.u32.totalorder %s2839_s22, %s1893_s12 }
 0x1cf   : > { %p1899_p4 = scmp.lt.u32.totalorder %s1893_s12, %s393_s19 }
 0x1d0   : > { %p1898_p3 = por %p1897_p2, %p1896_p1 }
 0x1d2   : > { %p1900_p5 = por %p1899_p4, %p1898_p3 }
 0x1d4   : > { %p1901_p6 = pnand %p1900_p5, %p1894_p0 }
 0x1d6   : > { %1904 = shalt.err (!%p1901_p6)  }
 0x1d7   : > { %s1905_s18 = scalar_lea.vmem %s3191_s23, 16  ;;  %p1910_p10 = scmp.lt.s32.totalorder %s3191_s23, %s2847_s7 }
 0x1d8   : > { %p1906_p8 = scmp.ne.s32.totalorder %s3191_s23, %s1905_s18  ;;  %p1911_p11 = scmp.lt.s32.totalorder %s2850_s4, %s1905_s18 }
 0x1da   : > { %p1912_p12 = por %p1911_p11, %p1910_p10 }
 0x1dc   : > { %p1913_p13 = pnand %p1912_p12, %p1906_p8 }
 0x1de   : > { %1916 = shalt.err (!%p1913_p13)  }
 0x1df   : > { %406 = dma.hbm_to_vmem [thread:$0]  %s393_s19, 16, %s3191_s23, %s2824_s9 }
 0x1e0   : > { %s1373_s29 = sshll.u32 %s3194_s5, 4  ;;  %s3221_s15 = smul.u32 3, %s441_s26 }
 0x1e1   : > { %s410_s14 = scalar_lea.hbm %s3902_s2, %s1373_s29  ;;  %s1374_s0 = sshll.u32 %s3200_s21, 4 }
 0x1e2   : > { %s1917_s28 = scalar_lea.hbm %s410_s14, 16  ;;  %p1920_p1 = scmp.lt.u32.totalorder %s410_s14, %s3902_s2 }
 0x1e3   : > { %p1918_p0 = scmp.ne.s32.totalorder %s410_s14, %s1917_s28  ;;  %p1921_p2 = scmp.lt.u32.totalorder %s2868_s17, %s1917_s28 }
 0x1e4   : > { %p1923_p4 = scmp.lt.u32.totalorder %s1917_s28, %s410_s14 }
 0x1e5   : > { %p1922_p3 = por %p1921_p2, %p1920_p1 }
 0x1e7   : > { %p1924_p5 = por %p1923_p4, %p1922_p3 }
 0x1e9   : > { %p1925_p6 = pnand %p1924_p5, %p1918_p0 }
 0x1eb   : > { %1928 = shalt.err (!%p1925_p6)  }
 0x1ec   : > { %s1929_s23 = scalar_lea.vmem %s3198_s25, 16  ;;  %p1934_p10 = scmp.lt.s32.totalorder %s3198_s25, %s2847_s7 }
 0x1ed   : > { %p1930_p8 = scmp.ne.s32.totalorder %s3198_s25, %s1929_s23  ;;  %p1935_p11 = scmp.lt.s32.totalorder %s2850_s4, %s1929_s23 }
 0x1ef   : > { %p1936_p12 = por %p1935_p11, %p1934_p10 }
 0x1f1   : > { %p1937_p13 = pnand %p1936_p12, %p1930_p8 }
 0x1f3   : > { %1940 = shalt.err (!%p1937_p13)  }
 0x1f4   : > { %423 = dma.hbm_to_vmem [thread:$0]  %s410_s14, 16, %s3198_s25, %s2827_s10 }
 0x1f5   : > { %s427_s26 = scalar_lea.hbm %s3903_s3, %s1374_s0  ;;  %s3242_s19 = sld [smem:[#allocation5 + %s3221_s15]] }
 0x1f6   : > { %s1941_s20 = scalar_lea.hbm %s427_s26, 16  ;;  %p1944_p1 = scmp.lt.u32.totalorder %s427_s26, %s3903_s3 }
 0x1f7   : > { %p1942_p0 = scmp.ne.s32.totalorder %s427_s26, %s1941_s20  ;;  %p1945_p2 = scmp.lt.u32.totalorder %s2895_s16, %s1941_s20 }
 0x1f8   : > { %p1947_p4 = scmp.lt.u32.totalorder %s1941_s20, %s427_s26 }
 0x1f9   : > { %p1946_p3 = por %p1945_p2, %p1944_p1 }
 0x1fb   : > { %p1948_p5 = por %p1947_p4, %p1946_p3 }
 0x1fd   : > { %p1949_p6 = pnand %p1948_p5, %p1942_p0 }
 0x1ff   : > { %1952 = shalt.err (!%p1949_p6)  }
 0x200   : > { %s1953_s25 = scalar_lea.vmem %s3207_s6, 16  ;;  %p1958_p10 = scmp.lt.s32.totalorder %s3207_s6, %s2847_s7 }
 0x201   : > { %p1954_p8 = scmp.ne.s32.totalorder %s3207_s6, %s1953_s25  ;;  %p1959_p11 = scmp.lt.s32.totalorder %s2850_s4, %s1953_s25 }
 0x203   : > { %p1960_p12 = por %p1959_p11, %p1958_p10 }
 0x205   : > { %p1961_p13 = pnand %p1960_p12, %p1954_p8 }
 0x207   : > { %1964 = shalt.err (!%p1961_p13)  }
 0x208   : > { %440 = dma.hbm_to_vmem [thread:$0]  %s427_s26, 16, %s3207_s6, %s2863_s13 }
 0x209   : > { %s1179_s29 = scalar_lea.vmem %s2816_s24, 7 [#allocation2]  ;;  %s459_s11 = sadd.s32 1, %s3221_s15 }
 0x20a   : > { %s455_s27 = sshll.u32 %s1179_s29, 4  ;;  %s3257_s14 = sld [smem:[#allocation5 + %s459_s11]]  ;;  %s456_s27 = int_to_ptr.vmem [resolvable:$true] %s455_s27 }
 0x20b   : > { %s1184_s0 = scalar_lea.vmem %s2816_s24, 15 [#allocation2]  ;;  %s476_s30 = sadd.s32 2, %s3221_s15 }
 0x20c   : > { %s472_s28 = sshll.u32 %s1184_s0, 4  ;;  %s1375_s12 = sshll.u32 %s3242_s19, 4  ;;  %s3262_s28 = int_to_ptr.vmem [resolvable:$true] %s472_s28 }
 0x20d   : > { %s445_s21 = scalar_lea.hbm %s3901_s1, %s1375_s12  ;;  %s3267_s20 = sld [smem:[#allocation5 + %s476_s30]] }
 0x20e   : > { %s1965_s6 = scalar_lea.hbm %s445_s21, 16  ;;  %p1968_p1 = scmp.lt.u32.totalorder %s445_s21, %s3901_s1 }
 0x20f   : > { %p1966_p0 = scmp.ne.s32.totalorder %s445_s21, %s1965_s6  ;;  %p1969_p2 = scmp.lt.u32.totalorder %s2839_s22, %s1965_s6 }
 0x210   : > { %p1971_p4 = scmp.lt.u32.totalorder %s1965_s6, %s445_s21 }
 0x211   : > { %p1970_p3 = por %p1969_p2, %p1968_p1 }
 0x213   : > { %p1972_p5 = por %p1971_p4, %p1970_p3 }
 0x215   : > { %p1973_p6 = pnand %p1972_p5, %p1966_p0 }
 0x217   : > { %1976 = shalt.err (!%p1973_p6)  }
 0x218   : > { %s1977_s15 = scalar_lea.vmem %s456_s27, 16  ;;  %p1982_p10 = scmp.lt.s32.totalorder %s456_s27, %s2847_s7 }
 0x219   : > { %p1978_p8 = scmp.ne.s32.totalorder %s456_s27, %s1977_s15  ;;  %p1983_p11 = scmp.lt.s32.totalorder %s2850_s4, %s1977_s15 }
 0x21b   : > { %p1984_p12 = por %p1983_p11, %p1982_p10 }
 0x21d   : > { %p1985_p13 = pnand %p1984_p12, %p1978_p8 }
 0x21f   : > { %1988 = shalt.err (!%p1985_p13)  }
 0x220   : > { %458 = dma.hbm_to_vmem [thread:$0]  %s445_s21, 16, %s456_s27, %s2824_s9 }
 0x221   : > { %s1376_s22 = sshll.u32 %s3257_s14, 4  ;;  %s1189_s19 = scalar_lea.vmem %s2816_s24, 23 [#allocation2] }
 0x222   : > { %s462_s29 = scalar_lea.hbm %s3902_s2, %s1376_s22  ;;  %s489_s11 = sshll.u32 %s1189_s19, 4  ;;  %s490_s11 = int_to_ptr.vmem [resolvable:$true] %s489_s11 }
 0x223   : > { %s1989_s0 = scalar_lea.hbm %s462_s29, 16  ;;  %p1992_p1 = scmp.lt.u32.totalorder %s462_s29, %s3902_s2 }
 0x224   : > { %p1990_p0 = scmp.ne.s32.totalorder %s462_s29, %s1989_s0  ;;  %p1993_p2 = scmp.lt.u32.totalorder %s2868_s17, %s1989_s0 }
 0x225   : > { %p1995_p4 = scmp.lt.u32.totalorder %s1989_s0, %s462_s29 }
 0x226   : > { %p1994_p3 = por %p1993_p2, %p1992_p1 }
 0x228   : > { %p1996_p5 = por %p1995_p4, %p1994_p3 }
 0x22a   : > { %p1997_p6 = pnand %p1996_p5, %p1990_p0 }
 0x22c   : > { %2000 = shalt.err (!%p1997_p6)  }
 0x22d   : > { %s2001_s24 = scalar_lea.vmem %s3262_s28, 16  ;;  %p2006_p10 = scmp.lt.s32.totalorder %s3262_s28, %s2847_s7 }
 0x22e   : > { %p2002_p8 = scmp.ne.s32.totalorder %s3262_s28, %s2001_s24  ;;  %p2007_p11 = scmp.lt.s32.totalorder %s2850_s4, %s2001_s24 }
 0x230   : > { %p2008_p12 = por %p2007_p11, %p2006_p10 }
 0x232   : > { %p2009_p13 = pnand %p2008_p12, %p2002_p8 }
 0x234   : > { %2012 = shalt.err (!%p2009_p13)  }
 0x235   : > { %475 = dma.hbm_to_vmem [thread:$0]  %s462_s29, 16, %s3262_s28, %s2827_s10 }
 0x236   : > { %s1377_s9 = sshll.u32 %s3267_s20, 4 }
 0x237   : > { %s479_s14 = scalar_lea.hbm %s3903_s3, %s1377_s9 }
 0x238   : > { %s2013_s23 = scalar_lea.hbm %s479_s14, 16  ;;  %p2016_p1 = scmp.lt.u32.totalorder %s479_s14, %s3903_s3 }
 0x239   : > { %p2014_p0 = scmp.ne.s32.totalorder %s479_s14, %s2013_s23  ;;  %p2017_p2 = scmp.lt.u32.totalorder %s2895_s16, %s2013_s23 }
 0x23a   : > { %p2019_p4 = scmp.lt.u32.totalorder %s2013_s23, %s479_s14 }
 0x23b   : > { %p2018_p3 = por %p2017_p2, %p2016_p1 }
 0x23d   : > { %p2020_p5 = por %p2019_p4, %p2018_p3 }
 0x23f   : > { %p2021_p6 = pnand %p2020_p5, %p2014_p0 }
 0x241   : > { %2024 = shalt.err (!%p2021_p6)  }
 0x242   : > { %s2025_s6 = scalar_lea.vmem %s490_s11, 16  ;;  %p2030_p10 = scmp.lt.s32.totalorder %s490_s11, %s2847_s7 }
 0x243   : > { %p2026_p8 = scmp.ne.s32.totalorder %s490_s11, %s2025_s6  ;;  %p2031_p11 = scmp.lt.s32.totalorder %s2850_s4, %s2025_s6 }
 0x245   : > { %p2032_p12 = por %p2031_p11, %p2030_p10 }
 0x247   : > { %p2033_p13 = pnand %p2032_p12, %p2026_p8 }
 0x249   : > { %2036 = shalt.err (!%p2033_p13)  }
 0x24a   : > { %492 = dma.hbm_to_vmem [thread:$0]  %s479_s14, 16, %s490_s11, %s2863_s13 }
 0x24b PF: > { %s3931_s10 = sld [smem:[#allocation139_spill]] }
 0x251   : > { %s493_s28 = smul.u32 3, %s3931_s10 }
 0x253   : > { %s3304_s16 = scalar_lea.sflag [#allocation3], %s493_s28 }
 0x254   : > { %2655 = dma.done.wait %s3304_s16, 16 }
 0x255   : > { %2656 = vsyncadd %s3304_s16, 4294967280  ;;  %s3309_s20 = scalar_lea.sflag %s3304_s16, 1 [#allocation3] }
 0x256   : > { %2657 = dma.done.wait %s3309_s20, 16 }
 0x257   : > { %2658 = vsyncadd %s3309_s20, 4294967280  ;;  %s3314_s7 = scalar_lea.sflag %s3304_s16, 2 [#allocation3] }
 0x258   : > { %2659 = dma.done.wait %s3314_s7, 16 }
 0x259   : > { %2660 = vsyncadd %s3314_s7, 4294967280 }
 0x25a   : > { %2661 = dma.done.wait %s3304_s16, 16 }
 0x25b   : > { %2662 = vsyncadd %s3304_s16, 4294967280 }
 0x25c   : > { %2663 = dma.done.wait %s3309_s20, 16 }
 0x25d   : > { %2664 = vsyncadd %s3309_s20, 4294967280 }
 0x25e   : > { %2665 = dma.done.wait %s3314_s7, 16 }
 0x25f   : > { %2666 = vsyncadd %s3314_s7, 4294967280 }
 0x260   : > { %2667 = dma.done.wait %s3304_s16, 16 }
 0x261   : > { %2668 = vsyncadd %s3304_s16, 4294967280 }
 0x262   : > { %2669 = dma.done.wait %s3309_s20, 16 }
 0x263   : > { %2670 = vsyncadd %s3309_s20, 4294967280 }
 0x264   : > { %2671 = dma.done.wait %s3314_s7, 16 }
 0x265   : > { %2672 = vsyncadd %s3314_s7, 4294967280 }
 0x266   : > { %2673 = dma.done.wait %s3304_s16, 16 }
 0x267   : > { %2674 = vsyncadd %s3304_s16, 4294967280 }
 0x268   : > { %2675 = dma.done.wait %s3309_s20, 16 }
 0x269   : > { %2676 = vsyncadd %s3309_s20, 4294967280 }
 0x26a   : > { %2677 = dma.done.wait %s3314_s7, 16 }
 0x26b   : > { %2678 = vsyncadd %s3314_s7, 4294967280 }
 0x26c   : > { %2679 = dma.done.wait %s3304_s16, 16 }
 0x26d   : > { %2680 = vsyncadd %s3304_s16, 4294967280 }
 0x26e   : > { %2681 = dma.done.wait %s3309_s20, 16 }
 0x26f   : > { %2682 = vsyncadd %s3309_s20, 4294967280 }
 0x270   : > { %2683 = dma.done.wait %s3314_s7, 16 }
 0x271   : > { %2684 = vsyncadd %s3314_s7, 4294967280 }
 0x272   : > { %2685 = dma.done.wait %s3304_s16, 16 }
 0x273   : > { %2686 = vsyncadd %s3304_s16, 4294967280 }
 0x274   : > { %2687 = dma.done.wait %s3309_s20, 16 }
 0x275   : > { %2688 = vsyncadd %s3309_s20, 4294967280 }
 0x276   : > { %2689 = dma.done.wait %s3314_s7, 16 }
 0x277   : > { %2690 = vsyncadd %s3314_s7, 4294967280 }
 0x278   : > { %2691 = dma.done.wait %s3304_s16, 16 }
 0x279   : > { %2692 = vsyncadd %s3304_s16, 4294967280 }
 0x27a   : > { %2693 = dma.done.wait %s3309_s20, 16 }
 0x27b   : > { %2694 = vsyncadd %s3309_s20, 4294967280 }
 0x27c   : > { %2695 = dma.done.wait %s3314_s7, 16 }
 0x27d   : > { %2696 = vsyncadd %s3314_s7, 4294967280 }
 0x27e   : > { %2697 = dma.done.wait %s3304_s16, 16 }
 0x27f   : > { %2698 = vsyncadd %s3304_s16, 4294967280 }
 0x280   : > { %2699 = dma.done.wait %s3309_s20, 16 }
 0x281   : > { %2700 = vsyncadd %s3309_s20, 4294967280 }
 0x282   : > { %2701 = dma.done.wait %s3314_s7, 16 }
 0x283   : > { %2702 = vsyncadd %s3314_s7, 4294967280  ;;  %s3932_s4 = sld [smem:[#allocation135_spill]] }
 0x289   : > { %p1378_p0 = scmp.ge.s32.totalorder %s3932_s4, 4 }
 0x28a   : > { %s3933_s13 = sld [smem:[#allocation135_spill]] (!%p1378_p0)  ;;  %s3934_s26 = sld [smem:[#allocation134_spill]] (!%p1378_p0) }
 0x28b   : > { %552 = sbr.rel (%p1378_p0) target bundleno = 1208 (0x4b8), region = 116  ;;  %s3935_s8 = sld [smem:[#allocation139_spill]] (!%p1378_p0) }
 0x290   : > { %s554_s15 = smul.u32 (!%p1378_p0), 24, %s3933_s13  ;;  %s1414_s22 = sshll.u32 (!%p1378_p0), %s3934_s26, 3 }
 0x291   : > { %s3936_s19 = ssub.s32 (!%p1378_p0), 1, %s3935_s8  ;;  %s3365_s25 = sadd.s32 (!%p1378_p0), 8, %s1414_s22 }
 0x292   : > { %s558_s18 = smul.u32 24, %s3936_s19  ;;  %s555_s29 = sld [smem:[#allocation5 + %s554_s15]] }
 0x293   : > { %s3937_s11 = smov %s3936_s19  ;;  %s573_s30 = sadd.s32 1, %s554_s15 }
 0x294   : > { %s560_s0 = smul.u32 3, %s3937_s11  ;;  %s3369_s12 = scalar_lea.vmem [#allocation2], %s558_s18 }
 0x295   : > { %s569_s24 = sshll.u32 %s3369_s12, 4  ;;  %s3374_s9 = sld [smem:[#allocation5 + %s573_s30]]  ;;  %s3372_s24 = int_to_ptr.vmem [resolvable:$true] %s569_s24 }
 0x296   : > { %s1208_s17 = scalar_lea.vmem %s3369_s12, 8 [#allocation2]  ;;  %s3377_s27 = scalar_lea.sflag [#allocation3], %s560_s0 }
 0x297   : > { %s3380_s14 = scalar_lea.sflag %s3377_s27, 1 [#allocation3]  ;;  %s588_s23 = sshll.u32 %s1208_s17, 4  ;;  %s3382_s23 = int_to_ptr.vmem [resolvable:$true] %s588_s23 }
 0x298   : > { %s592_s5 = sadd.s32 2, %s554_s15  ;;  %s1380_s21 = sshll.u32 %s555_s29, 4 }
 0x299   : > { %s557_s28 = scalar_lea.hbm %s3901_s1, %s1380_s21  ;;  %s3387_s16 = sld [smem:[#allocation5 + %s592_s5]] }
 0x29a   : > { %s2037_s20 = scalar_lea.hbm %s557_s28, 16  ;;  %s3392_s13 = scalar_lea.hbm %s3901_s1, 128 }
 0x29b   : > { %p2038_p1 = scmp.ne.s32.totalorder %s557_s28, %s2037_s20  ;;  %p2040_p2 = scmp.lt.u32.totalorder %s557_s28, %s3901_s1 }
 0x29c   : > { %p2041_p3 = scmp.lt.u32.totalorder %s3392_s13, %s2037_s20  ;;  %p2043_p5 = scmp.lt.u32.totalorder %s2037_s20, %s557_s28 }
 0x29e   : > { %p2042_p4 = por %p2041_p3, %p2040_p2 }
 0x2a0   : > { %p2044_p6 = por %p2043_p5, %p2042_p4 }
 0x2a2   : > { %p2045_p8 = pnand %p2044_p6, %p2038_p1 }
 0x2a4   : > { %2048 = shalt.err (!%p2045_p8)  }
 0x2a5   : > { %s2049_s15 = scalar_lea.vmem %s3372_s24, 16  ;;  %s2721_s22 = smov [#allocation2]  }
 0x2a6   : > { %p2050_p10 = scmp.ne.s32.totalorder %s3372_s24, %s2049_s15  ;;  %s2051_s19 = sshll.u32 %s2721_s22, 4  ;;  %s3400_s19 = int_to_ptr.vmem [resolvable:$false] %s2051_s19 }
 0x2a7   : > { %s3403_s18 = scalar_lea.vmem %s3400_s19, 768  ;;  %p2054_p11 = scmp.lt.s32.totalorder %s3372_s24, %s3400_s19 }
 0x2a8   : > { %p2055_p12 = scmp.lt.s32.totalorder %s3403_s18, %s2049_s15 }
 0x2aa   : > { %p2056_p13 = por %p2055_p12, %p2054_p11 }
 0x2ac   : > { %p2057_p0 = pnand %p2056_p13, %p2050_p10 }
 0x2ae   : > { %2060 = shalt.err (!%p2057_p0)  }
 0x2af   : > { %572 = dma.hbm_to_vmem [thread:$0]  %s557_s28, 16, %s3372_s24, %s3377_s27 }
 0x2b0   : > { %s1381_s29 = sshll.u32 %s3374_s9, 4  ;;  %s1216_s11 = scalar_lea.vmem %s3369_s12, 16 [#allocation2] }
 0x2b1   : > { %s576_s17 = scalar_lea.hbm %s3902_s2, %s1381_s29  ;;  %s3416_s5 = scalar_lea.sflag %s3377_s27, 2 [#allocation3] }
 0x2b2   : > { %s2061_s21 = scalar_lea.hbm %s576_s17, 16  ;;  %s3421_s20 = scalar_lea.hbm %s3902_s2, 128 }
 0x2b3   : > { %p2062_p1 = scmp.ne.s32.totalorder %s576_s17, %s2061_s21  ;;  %p2064_p2 = scmp.lt.u32.totalorder %s576_s17, %s3902_s2 }
 0x2b4   : > { %p2065_p3 = scmp.lt.u32.totalorder %s3421_s20, %s2061_s21  ;;  %p2067_p5 = scmp.lt.u32.totalorder %s2061_s21, %s576_s17 }
 0x2b6   : > { %p2066_p4 = por %p2065_p3, %p2064_p2 }
 0x2b8   : > { %p2068_p6 = por %p2067_p5, %p2066_p4 }
 0x2ba   : > { %p2069_p8 = pnand %p2068_p6, %p2062_p1 }
 0x2bc   : > { %2072 = shalt.err (!%p2069_p8)  }
 0x2bd   : > { %s2073_s24 = scalar_lea.vmem %s3382_s23, 16  ;;  %p2078_p11 = scmp.lt.s32.totalorder %s3382_s23, %s3400_s19 }
 0x2be   : > { %p2074_p10 = scmp.ne.s32.totalorder %s3382_s23, %s2073_s24  ;;  %p2079_p12 = scmp.lt.s32.totalorder %s3403_s18, %s2073_s24 }
 0x2c0   : > { %p2080_p13 = por %p2079_p12, %p2078_p11 }
 0x2c2   : > { %p2081_p0 = pnand %p2080_p13, %p2074_p10 }
 0x2c4   : > { %2084 = shalt.err (!%p2081_p0)  }
 0x2c5   : > { %591 = dma.hbm_to_vmem [thread:$0]  %s576_s17, 16, %s3382_s23, %s3380_s14 }
 0x2c6   : > { %s607_s9 = sshll.u32 %s1216_s11, 4  ;;  %s611_s28 = sadd.s32 1, %s3365_s25  ;;  %s608_s9 = int_to_ptr.vmem [resolvable:$true] %s607_s9 }
 0x2c7   : > { %s1382_s26 = sshll.u32 %s3387_s16, 4  ;;  %s612_s29 = smul.u32 3, %s611_s28 }
 0x2c8   : > { %s595_s22 = scalar_lea.hbm %s3903_s3, %s1382_s26  ;;  %s3442_s6 = scalar_lea.hbm %s3903_s3, 256 }
 0x2c9   : > { %s2085_s0 = scalar_lea.hbm %s595_s22, 16  ;;  %p2088_p2 = scmp.lt.u32.totalorder %s595_s22, %s3903_s3 }
 0x2ca   : > { %p2086_p1 = scmp.ne.s32.totalorder %s595_s22, %s2085_s0  ;;  %p2089_p3 = scmp.lt.u32.totalorder %s3442_s6, %s2085_s0 }
 0x2cb   : > { %p2091_p5 = scmp.lt.u32.totalorder %s2085_s0, %s595_s22 }
 0x2cc   : > { %p2090_p4 = por %p2089_p3, %p2088_p2 }
 0x2ce   : > { %p2092_p6 = por %p2091_p5, %p2090_p4 }
 0x2d0   : > { %p2093_p8 = pnand %p2092_p6, %p2086_p1 }
 0x2d2   : > { %2096 = shalt.err (!%p2093_p8)  }
 0x2d3   : > { %s2097_s23 = scalar_lea.vmem %s608_s9, 16  ;;  %p2102_p11 = scmp.lt.s32.totalorder %s608_s9, %s3400_s19 }
 0x2d4   : > { %p2098_p10 = scmp.ne.s32.totalorder %s608_s9, %s2097_s23  ;;  %p2103_p12 = scmp.lt.s32.totalorder %s3403_s18, %s2097_s23 }
 0x2d6   : > { %p2104_p13 = por %p2103_p12, %p2102_p11 }
 0x2d8   : > { %p2105_p0 = pnand %p2104_p13, %p2098_p10 }
 0x2da   : > { %2108 = shalt.err (!%p2105_p0)  }
 0x2db   : > { %610 = dma.hbm_to_vmem [thread:$0]  %s595_s22, 16, %s608_s9, %s3416_s5 }
 0x2dc   : > { %s613_s16 = sld [smem:[#allocation5 + %s612_s29]]  ;;  %s1224_s11 = scalar_lea.vmem %s3369_s12, 1 [#allocation2] }
 0x2dd   : > { %s625_s17 = sshll.u32 %s1224_s11, 4  ;;  %s629_s4 = sadd.s32 1, %s612_s29  ;;  %s3452_s17 = int_to_ptr.vmem [resolvable:$true] %s625_s17 }
 0x2de   : > { %s3454_s24 = sld [smem:[#allocation5 + %s629_s4]]  ;;  %s1229_s28 = scalar_lea.vmem %s3369_s12, 9 [#allocation2] }
 0x2df   : > { %s646_s26 = sadd.s32 2, %s612_s29  ;;  %s642_s8 = sshll.u32 %s1229_s28, 4  ;;  %s3459_s8 = int_to_ptr.vmem [resolvable:$true] %s642_s8 }
 0x2e0   : > { %s3457_s15 = sld [smem:[#allocation5 + %s646_s26]]  ;;  %s1234_s0 = scalar_lea.vmem %s3369_s12, 17 [#allocation2] }
 0x2e1   : > { %s659_s21 = sshll.u32 %s1234_s0, 4  ;;  %s3465_s21 = int_to_ptr.vmem [resolvable:$true] %s659_s21 }
 0x2e2   : > { %s1383_s30 = sshll.u32 %s613_s16, 4 }
 0x2e3   : > { %s615_s10 = scalar_lea.hbm %s3901_s1, %s1383_s30 }
 0x2e4   : > { %s2109_s7 = scalar_lea.hbm %s615_s10, 16  ;;  %p2112_p2 = scmp.lt.u32.totalorder %s615_s10, %s3901_s1 }
 0x2e5   : > { %p2110_p1 = scmp.ne.s32.totalorder %s615_s10, %s2109_s7  ;;  %p2113_p3 = scmp.lt.u32.totalorder %s3392_s13, %s2109_s7 }
 0x2e6   : > { %p2115_p5 = scmp.lt.u32.totalorder %s2109_s7, %s615_s10 }
 0x2e7   : > { %p2114_p4 = por %p2113_p3, %p2112_p2 }
 0x2e9   : > { %p2116_p6 = por %p2115_p5, %p2114_p4 }
 0x2eb   : > { %p2117_p8 = pnand %p2116_p6, %p2110_p1 }
 0x2ed   : > { %2120 = shalt.err (!%p2117_p8)  }
 0x2ee   : > { %s2121_s29 = scalar_lea.vmem %s3452_s17, 16  ;;  %p2126_p11 = scmp.lt.s32.totalorder %s3452_s17, %s3400_s19 }
 0x2ef   : > { %p2122_p10 = scmp.ne.s32.totalorder %s3452_s17, %s2121_s29  ;;  %p2127_p12 = scmp.lt.s32.totalorder %s3403_s18, %s2121_s29 }
 0x2f1   : > { %p2128_p13 = por %p2127_p12, %p2126_p11 }
 0x2f3   : > { %p2129_p0 = pnand %p2128_p13, %p2122_p10 }
 0x2f5   : > { %2132 = shalt.err (!%p2129_p0)  }
 0x2f6   : > { %628 = dma.hbm_to_vmem [thread:$0]  %s615_s10, 16, %s3452_s17, %s3377_s27 }
 0x2f7   : > { %s1384_s16 = sshll.u32 %s3454_s24, 4  ;;  %s663_s4 = sadd.s32 2, %s3365_s25 }
 0x2f8   : > { %s632_s0 = scalar_lea.hbm %s3902_s2, %s1384_s16  ;;  %s1385_s30 = sshll.u32 %s3457_s15, 4 }
 0x2f9   : > { %s2133_s9 = scalar_lea.hbm %s632_s0, 16  ;;  %p2136_p2 = scmp.lt.u32.totalorder %s632_s0, %s3902_s2 }
 0x2fa   : > { %p2134_p1 = scmp.ne.s32.totalorder %s632_s0, %s2133_s9  ;;  %p2137_p3 = scmp.lt.u32.totalorder %s3421_s20, %s2133_s9 }
 0x2fb   : > { %p2139_p5 = scmp.lt.u32.totalorder %s2133_s9, %s632_s0 }
 0x2fc   : > { %p2138_p4 = por %p2137_p3, %p2136_p2 }
 0x2fe   : > { %p2140_p6 = por %p2139_p5, %p2138_p4 }
 0x300   : > { %p2141_p8 = pnand %p2140_p6, %p2134_p1 }
 0x302   : > { %2144 = shalt.err (!%p2141_p8)  }
 0x303   : > { %s2145_s17 = scalar_lea.vmem %s3459_s8, 16  ;;  %p2150_p11 = scmp.lt.s32.totalorder %s3459_s8, %s3400_s19 }
 0x304   : > { %p2146_p10 = scmp.ne.s32.totalorder %s3459_s8, %s2145_s17  ;;  %p2151_p12 = scmp.lt.s32.totalorder %s3403_s18, %s2145_s17 }
 0x306   : > { %p2152_p13 = por %p2151_p12, %p2150_p11 }
 0x308   : > { %p2153_p0 = pnand %p2152_p13, %p2146_p10 }
 0x30a   : > { %2156 = shalt.err (!%p2153_p0)  }
 0x30b   : > { %645 = dma.hbm_to_vmem [thread:$0]  %s632_s0, 16, %s3459_s8, %s3380_s14 }
 0x30c   : > { %s649_s10 = scalar_lea.hbm %s3903_s3, %s1385_s30  ;;  %s664_s23 = smul.u32 3, %s663_s4 }
 0x30d   : > { %s2157_s11 = scalar_lea.hbm %s649_s10, 16  ;;  %p2160_p2 = scmp.lt.u32.totalorder %s649_s10, %s3903_s3 }
 0x30e   : > { %p2158_p1 = scmp.ne.s32.totalorder %s649_s10, %s2157_s11  ;;  %p2161_p3 = scmp.lt.u32.totalorder %s3442_s6, %s2157_s11 }
 0x30f   : > { %p2163_p5 = scmp.lt.u32.totalorder %s2157_s11, %s649_s10 }
 0x310   : > { %p2162_p4 = por %p2161_p3, %p2160_p2 }
 0x312   : > { %p2164_p6 = por %p2163_p5, %p2162_p4 }
 0x314   : > { %p2165_p8 = pnand %p2164_p6, %p2158_p1 }
 0x316   : > { %2168 = shalt.err (!%p2165_p8)  }
 0x317   : > { %s2169_s8 = scalar_lea.vmem %s3465_s21, 16  ;;  %p2174_p11 = scmp.lt.s32.totalorder %s3465_s21, %s3400_s19 }
 0x318   : > { %p2170_p10 = scmp.ne.s32.totalorder %s3465_s21, %s2169_s8  ;;  %p2175_p12 = scmp.lt.s32.totalorder %s3403_s18, %s2169_s8 }
 0x31a   : > { %p2176_p13 = por %p2175_p12, %p2174_p11 }
 0x31c   : > { %p2177_p0 = pnand %p2176_p13, %p2170_p10 }
 0x31e   : > { %2180 = shalt.err (!%p2177_p0)  }
 0x31f   : > { %662 = dma.hbm_to_vmem [thread:$0]  %s649_s10, 16, %s3465_s21, %s3416_s5 }
 0x320   : > { %s665_s4 = sld [smem:[#allocation5 + %s664_s23]]  ;;  %s1239_s28 = scalar_lea.vmem %s3369_s12, 2 [#allocation2] }
 0x321   : > { %s677_s26 = sshll.u32 %s1239_s28, 4  ;;  %s681_s0 = sadd.s32 1, %s664_s23  ;;  %s3510_s26 = int_to_ptr.vmem [resolvable:$true] %s677_s26 }
 0x322   : > { %s3512_s30 = sld [smem:[#allocation5 + %s681_s0]]  ;;  %s1244_s9 = scalar_lea.vmem %s3369_s12, 10 [#allocation2] }
 0x323   : > { %s698_s22 = sadd.s32 2, %s664_s23  ;;  %s694_s7 = sshll.u32 %s1244_s9, 4  ;;  %s3517_s7 = int_to_ptr.vmem [resolvable:$true] %s694_s7 }
 0x324   : > { %s3515_s17 = sld [smem:[#allocation5 + %s698_s22]]  ;;  %s1249_s24 = scalar_lea.vmem %s3369_s12, 18 [#allocation2] }
 0x325   : > { %s711_s11 = sshll.u32 %s1249_s24, 4  ;;  %s3523_s11 = int_to_ptr.vmem [resolvable:$true] %s711_s11 }
 0x326   : > { %s1386_s15 = sshll.u32 %s665_s4, 4 }
 0x327   : > { %s667_s29 = scalar_lea.hbm %s3901_s1, %s1386_s15 }
 0x328   : > { %s2181_s16 = scalar_lea.hbm %s667_s29, 16  ;;  %p2184_p2 = scmp.lt.u32.totalorder %s667_s29, %s3901_s1 }
 0x329   : > { %p2182_p1 = scmp.ne.s32.totalorder %s667_s29, %s2181_s16  ;;  %p2185_p3 = scmp.lt.u32.totalorder %s3392_s13, %s2181_s16 }
 0x32a   : > { %p2187_p5 = scmp.lt.u32.totalorder %s2181_s16, %s667_s29 }
 0x32b   : > { %p2186_p4 = por %p2185_p3, %p2184_p2 }
 0x32d   : > { %p2188_p6 = por %p2187_p5, %p2186_p4 }
 0x32f   : > { %p2189_p8 = pnand %p2188_p6, %p2182_p1 }
 0x331   : > { %2192 = shalt.err (!%p2189_p8)  }
 0x332   : > { %s2193_s23 = scalar_lea.vmem %s3510_s26, 16  ;;  %p2198_p11 = scmp.lt.s32.totalorder %s3510_s26, %s3400_s19 }
 0x333   : > { %p2194_p10 = scmp.ne.s32.totalorder %s3510_s26, %s2193_s23  ;;  %p2199_p12 = scmp.lt.s32.totalorder %s3403_s18, %s2193_s23 }
 0x335   : > { %p2200_p13 = por %p2199_p12, %p2198_p11 }
 0x337   : > { %p2201_p0 = pnand %p2200_p13, %p2194_p10 }
 0x339   : > { %2204 = shalt.err (!%p2201_p0)  }
 0x33a   : > { %680 = dma.hbm_to_vmem [thread:$0]  %s667_s29, 16, %s3510_s26, %s3377_s27 }
 0x33b   : > { %s1387_s4 = sshll.u32 %s3512_s30, 4  ;;  %s715_s0 = sadd.s32 3, %s3365_s25 }
 0x33c   : > { %s684_s24 = scalar_lea.hbm %s3902_s2, %s1387_s4  ;;  %s1388_s15 = sshll.u32 %s3515_s17, 4 }
 0x33d   : > { %s2205_s21 = scalar_lea.hbm %s684_s24, 16  ;;  %p2208_p2 = scmp.lt.u32.totalorder %s684_s24, %s3902_s2 }
 0x33e   : > { %p2206_p1 = scmp.ne.s32.totalorder %s684_s24, %s2205_s21  ;;  %p2209_p3 = scmp.lt.u32.totalorder %s3421_s20, %s2205_s21 }
 0x33f   : > { %p2211_p5 = scmp.lt.u32.totalorder %s2205_s21, %s684_s24 }
 0x340   : > { %p2210_p4 = por %p2209_p3, %p2208_p2 }
 0x342   : > { %p2212_p6 = por %p2211_p5, %p2210_p4 }
 0x344   : > { %p2213_p8 = pnand %p2212_p6, %p2206_p1 }
 0x346   : > { %2216 = shalt.err (!%p2213_p8)  }
 0x347   : > { %s2217_s26 = scalar_lea.vmem %s3517_s7, 16  ;;  %p2222_p11 = scmp.lt.s32.totalorder %s3517_s7, %s3400_s19 }
 0x348   : > { %p2218_p10 = scmp.ne.s32.totalorder %s3517_s7, %s2217_s26  ;;  %p2223_p12 = scmp.lt.s32.totalorder %s3403_s18, %s2217_s26 }
 0x34a   : > { %p2224_p13 = por %p2223_p12, %p2222_p11 }
 0x34c   : > { %p2225_p0 = pnand %p2224_p13, %p2218_p10 }
 0x34e   : > { %2228 = shalt.err (!%p2225_p0)  }
 0x34f   : > { %697 = dma.hbm_to_vmem [thread:$0]  %s684_s24, 16, %s3517_s7, %s3380_s14 }
 0x350   : > { %s701_s29 = scalar_lea.hbm %s3903_s3, %s1388_s15  ;;  %s716_s8 = smul.u32 3, %s715_s0 }
 0x351   : > { %s2229_s28 = scalar_lea.hbm %s701_s29, 16  ;;  %p2232_p2 = scmp.lt.u32.totalorder %s701_s29, %s3903_s3 }
 0x352   : > { %p2230_p1 = scmp.ne.s32.totalorder %s701_s29, %s2229_s28  ;;  %p2233_p3 = scmp.lt.u32.totalorder %s3442_s6, %s2229_s28 }
 0x353   : > { %p2235_p5 = scmp.lt.u32.totalorder %s2229_s28, %s701_s29 }
 0x354   : > { %p2234_p4 = por %p2233_p3, %p2232_p2 }
 0x356   : > { %p2236_p6 = por %p2235_p5, %p2234_p4 }
 0x358   : > { %p2237_p8 = pnand %p2236_p6, %p2230_p1 }
 0x35a   : > { %2240 = shalt.err (!%p2237_p8)  }
 0x35b   : > { %s2241_s7 = scalar_lea.vmem %s3523_s11, 16  ;;  %p2246_p11 = scmp.lt.s32.totalorder %s3523_s11, %s3400_s19 }
 0x35c   : > { %p2242_p10 = scmp.ne.s32.totalorder %s3523_s11, %s2241_s7  ;;  %p2247_p12 = scmp.lt.s32.totalorder %s3403_s18, %s2241_s7 }
 0x35e   : > { %p2248_p13 = por %p2247_p12, %p2246_p11 }
 0x360   : > { %p2249_p0 = pnand %p2248_p13, %p2242_p10 }
 0x362   : > { %2252 = shalt.err (!%p2249_p0)  }
 0x363   : > { %714 = dma.hbm_to_vmem [thread:$0]  %s701_s29, 16, %s3523_s11, %s3416_s5 }
 0x364   : > { %s717_s0 = sld [smem:[#allocation5 + %s716_s8]]  ;;  %s1254_s9 = scalar_lea.vmem %s3369_s12, 3 [#allocation2] }
 0x365   : > { %s729_s22 = sshll.u32 %s1254_s9, 4  ;;  %s733_s24 = sadd.s32 1, %s716_s8  ;;  %s3568_s22 = int_to_ptr.vmem [resolvable:$true] %s729_s22 }
 0x366   : > { %s3570_s15 = sld [smem:[#allocation5 + %s733_s24]]  ;;  %s1259_s21 = scalar_lea.vmem %s3369_s12, 11 [#allocation2] }
 0x367   : > { %s750_s10 = sadd.s32 2, %s716_s8  ;;  %s746_s16 = sshll.u32 %s1259_s21, 4  ;;  %s3575_s16 = int_to_ptr.vmem [resolvable:$true] %s746_s16 }
 0x368   : > { %s3573_s26 = sld [smem:[#allocation5 + %s750_s10]]  ;;  %s1264_s30 = scalar_lea.vmem %s3369_s12, 19 [#allocation2] }
 0x369   : > { %s763_s28 = sshll.u32 %s1264_s30, 4  ;;  %s3581_s28 = int_to_ptr.vmem [resolvable:$true] %s763_s28 }
 0x36a   : > { %s1389_s17 = sshll.u32 %s717_s0, 4 }
 0x36b   : > { %s719_s23 = scalar_lea.hbm %s3901_s1, %s1389_s17 }
 0x36c   : > { %s2253_s4 = scalar_lea.hbm %s719_s23, 16  ;;  %p2256_p2 = scmp.lt.u32.totalorder %s719_s23, %s3901_s1 }
 0x36d   : > { %p2254_p1 = scmp.ne.s32.totalorder %s719_s23, %s2253_s4  ;;  %p2257_p3 = scmp.lt.u32.totalorder %s3392_s13, %s2253_s4 }
 0x36e   : > { %p2259_p5 = scmp.lt.u32.totalorder %s2253_s4, %s719_s23 }
 0x36f   : > { %p2258_p4 = por %p2257_p3, %p2256_p2 }
 0x371   : > { %p2260_p6 = por %p2259_p5, %p2258_p4 }
 0x373   : > { %p2261_p8 = pnand %p2260_p6, %p2254_p1 }
 0x375   : > { %2264 = shalt.err (!%p2261_p8)  }
 0x376   : > { %s2265_s8 = scalar_lea.vmem %s3568_s22, 16  ;;  %p2270_p11 = scmp.lt.s32.totalorder %s3568_s22, %s3400_s19 }
 0x377   : > { %p2266_p10 = scmp.ne.s32.totalorder %s3568_s22, %s2265_s8  ;;  %p2271_p12 = scmp.lt.s32.totalorder %s3403_s18, %s2265_s8 }
 0x379   : > { %p2272_p13 = por %p2271_p12, %p2270_p11 }
 0x37b   : > { %p2273_p0 = pnand %p2272_p13, %p2266_p10 }
 0x37d   : > { %2276 = shalt.err (!%p2273_p0)  }
 0x37e   : > { %732 = dma.hbm_to_vmem [thread:$0]  %s719_s23, 16, %s3568_s22, %s3377_s27 }
 0x37f   : > { %s1390_s0 = sshll.u32 %s3570_s15, 4  ;;  %s767_s24 = sadd.s32 4, %s3365_s25 }
 0x380   : > { %s736_s30 = scalar_lea.hbm %s3902_s2, %s1390_s0  ;;  %s1391_s17 = sshll.u32 %s3573_s26, 4 }
 0x381   : > { %s2277_s11 = scalar_lea.hbm %s736_s30, 16  ;;  %p2280_p2 = scmp.lt.u32.totalorder %s736_s30, %s3902_s2 }
 0x382   : > { %p2278_p1 = scmp.ne.s32.totalorder %s736_s30, %s2277_s11  ;;  %p2281_p3 = scmp.lt.u32.totalorder %s3421_s20, %s2277_s11 }
 0x383   : > { %p2283_p5 = scmp.lt.u32.totalorder %s2277_s11, %s736_s30 }
 0x384   : > { %p2282_p4 = por %p2281_p3, %p2280_p2 }
 0x386   : > { %p2284_p6 = por %p2283_p5, %p2282_p4 }
 0x388   : > { %p2285_p8 = pnand %p2284_p6, %p2278_p1 }
 0x38a   : > { %2288 = shalt.err (!%p2285_p8)  }
 0x38b   : > { %s2289_s22 = scalar_lea.vmem %s3575_s16, 16  ;;  %p2294_p11 = scmp.lt.s32.totalorder %s3575_s16, %s3400_s19 }
 0x38c   : > { %p2290_p10 = scmp.ne.s32.totalorder %s3575_s16, %s2289_s22  ;;  %p2295_p12 = scmp.lt.s32.totalorder %s3403_s18, %s2289_s22 }
 0x38e   : > { %p2296_p13 = por %p2295_p12, %p2294_p11 }
 0x390   : > { %p2297_p0 = pnand %p2296_p13, %p2290_p10 }
 0x392   : > { %2300 = shalt.err (!%p2297_p0)  }
 0x393   : > { %749 = dma.hbm_to_vmem [thread:$0]  %s736_s30, 16, %s3575_s16, %s3380_s14 }
 0x394   : > { %s753_s23 = scalar_lea.hbm %s3903_s3, %s1391_s17  ;;  %s768_s7 = smul.u32 3, %s767_s24 }
 0x395   : > { %s2301_s9 = scalar_lea.hbm %s753_s23, 16  ;;  %p2304_p2 = scmp.lt.u32.totalorder %s753_s23, %s3903_s3 }
 0x396   : > { %p2302_p1 = scmp.ne.s32.totalorder %s753_s23, %s2301_s9  ;;  %p2305_p3 = scmp.lt.u32.totalorder %s3442_s6, %s2301_s9 }
 0x397   : > { %p2307_p5 = scmp.lt.u32.totalorder %s2301_s9, %s753_s23 }
 0x398   : > { %p2306_p4 = por %p2305_p3, %p2304_p2 }
 0x39a   : > { %p2308_p6 = por %p2307_p5, %p2306_p4 }
 0x39c   : > { %p2309_p8 = pnand %p2308_p6, %p2302_p1 }
 0x39e   : > { %2312 = shalt.err (!%p2309_p8)  }
 0x39f   : > { %s2313_s16 = scalar_lea.vmem %s3581_s28, 16  ;;  %p2318_p11 = scmp.lt.s32.totalorder %s3581_s28, %s3400_s19 }
 0x3a0   : > { %p2314_p10 = scmp.ne.s32.totalorder %s3581_s28, %s2313_s16  ;;  %p2319_p12 = scmp.lt.s32.totalorder %s3403_s18, %s2313_s16 }
 0x3a2   : > { %p2320_p13 = por %p2319_p12, %p2318_p11 }
 0x3a4   : > { %p2321_p0 = pnand %p2320_p13, %p2314_p10 }
 0x3a6   : > { %2324 = shalt.err (!%p2321_p0)  }
 0x3a7   : > { %766 = dma.hbm_to_vmem [thread:$0]  %s753_s23, 16, %s3581_s28, %s3416_s5 }
 0x3a8   : > { %s769_s24 = sld [smem:[#allocation5 + %s768_s7]]  ;;  %s1269_s21 = scalar_lea.vmem %s3369_s12, 4 [#allocation2] }
 0x3a9   : > { %s781_s10 = sshll.u32 %s1269_s21, 4  ;;  %s785_s30 = sadd.s32 1, %s768_s7  ;;  %s3626_s10 = int_to_ptr.vmem [resolvable:$true] %s781_s10 }
 0x3aa   : > { %s3628_s17 = sld [smem:[#allocation5 + %s785_s30]]  ;;  %s1274_s11 = scalar_lea.vmem %s3369_s12, 12 [#allocation2] }
 0x3ab   : > { %s802_s29 = sadd.s32 2, %s768_s7  ;;  %s798_s4 = sshll.u32 %s1274_s11, 4  ;;  %s3633_s4 = int_to_ptr.vmem [resolvable:$true] %s798_s4 }
 0x3ac   : > { %s3631_s22 = sld [smem:[#allocation5 + %s802_s29]]  ;;  %s1279_s15 = scalar_lea.vmem %s3369_s12, 20 [#allocation2] }
 0x3ad   : > { %s815_s9 = sshll.u32 %s1279_s15, 4  ;;  %s3639_s9 = int_to_ptr.vmem [resolvable:$true] %s815_s9 }
 0x3ae   : > { %s1392_s26 = sshll.u32 %s769_s24, 4 }
 0x3af   : > { %s771_s8 = scalar_lea.hbm %s3901_s1, %s1392_s26 }
 0x3b0   : > { %s2325_s0 = scalar_lea.hbm %s771_s8, 16  ;;  %p2328_p2 = scmp.lt.u32.totalorder %s771_s8, %s3901_s1 }
 0x3b1   : > { %p2326_p1 = scmp.ne.s32.totalorder %s771_s8, %s2325_s0  ;;  %p2329_p3 = scmp.lt.u32.totalorder %s3392_s13, %s2325_s0 }
 0x3b2   : > { %p2331_p5 = scmp.lt.u32.totalorder %s2325_s0, %s771_s8 }
 0x3b3   : > { %p2330_p4 = por %p2329_p3, %p2328_p2 }
 0x3b5   : > { %p2332_p6 = por %p2331_p5, %p2330_p4 }
 0x3b7   : > { %p2333_p8 = pnand %p2332_p6, %p2326_p1 }
 0x3b9   : > { %2336 = shalt.err (!%p2333_p8)  }
 0x3ba   : > { %s2337_s7 = scalar_lea.vmem %s3626_s10, 16  ;;  %p2342_p11 = scmp.lt.s32.totalorder %s3626_s10, %s3400_s19 }
 0x3bb   : > { %p2338_p10 = scmp.ne.s32.totalorder %s3626_s10, %s2337_s7  ;;  %p2343_p12 = scmp.lt.s32.totalorder %s3403_s18, %s2337_s7 }
 0x3bd   : > { %p2344_p13 = por %p2343_p12, %p2342_p11 }
 0x3bf   : > { %p2345_p0 = pnand %p2344_p13, %p2338_p10 }
 0x3c1   : > { %2348 = shalt.err (!%p2345_p0)  }
 0x3c2   : > { %784 = dma.hbm_to_vmem [thread:$0]  %s771_s8, 16, %s3626_s10, %s3377_s27 }
 0x3c3   : > { %s1393_s24 = sshll.u32 %s3628_s17, 4  ;;  %s819_s30 = sadd.s32 5, %s3365_s25 }
 0x3c4   : > { %s788_s15 = scalar_lea.hbm %s3902_s2, %s1393_s24  ;;  %s1394_s26 = sshll.u32 %s3631_s22, 4 }
 0x3c5   : > { %s2349_s28 = scalar_lea.hbm %s788_s15, 16  ;;  %p2352_p2 = scmp.lt.u32.totalorder %s788_s15, %s3902_s2 }
 0x3c6   : > { %p2350_p1 = scmp.ne.s32.totalorder %s788_s15, %s2349_s28  ;;  %p2353_p3 = scmp.lt.u32.totalorder %s3421_s20, %s2349_s28 }
 0x3c7   : > { %p2355_p5 = scmp.lt.u32.totalorder %s2349_s28, %s788_s15 }
 0x3c8   : > { %p2354_p4 = por %p2353_p3, %p2352_p2 }
 0x3ca   : > { %p2356_p6 = por %p2355_p5, %p2354_p4 }
 0x3cc   : > { %p2357_p8 = pnand %p2356_p6, %p2350_p1 }
 0x3ce   : > { %2360 = shalt.err (!%p2357_p8)  }
 0x3cf   : > { %s2361_s10 = scalar_lea.vmem %s3633_s4, 16  ;;  %p2366_p11 = scmp.lt.s32.totalorder %s3633_s4, %s3400_s19 }
 0x3d0   : > { %p2362_p10 = scmp.ne.s32.totalorder %s3633_s4, %s2361_s10  ;;  %p2367_p12 = scmp.lt.s32.totalorder %s3403_s18, %s2361_s10 }
 0x3d2   : > { %p2368_p13 = por %p2367_p12, %p2366_p11 }
 0x3d4   : > { %p2369_p0 = pnand %p2368_p13, %p2362_p10 }
 0x3d6   : > { %2372 = shalt.err (!%p2369_p0)  }
 0x3d7   : > { %801 = dma.hbm_to_vmem [thread:$0]  %s788_s15, 16, %s3633_s4, %s3380_s14 }
 0x3d8   : > { %s805_s8 = scalar_lea.hbm %s3903_s3, %s1394_s26  ;;  %s820_s16 = smul.u32 3, %s819_s30 }
 0x3d9   : > { %s2373_s21 = scalar_lea.hbm %s805_s8, 16  ;;  %p2376_p2 = scmp.lt.u32.totalorder %s805_s8, %s3903_s3 }
 0x3da   : > { %p2374_p1 = scmp.ne.s32.totalorder %s805_s8, %s2373_s21  ;;  %p2377_p3 = scmp.lt.u32.totalorder %s3442_s6, %s2373_s21 }
 0x3db   : > { %p2379_p5 = scmp.lt.u32.totalorder %s2373_s21, %s805_s8 }
 0x3dc   : > { %p2378_p4 = por %p2377_p3, %p2376_p2 }
 0x3de   : > { %p2380_p6 = por %p2379_p5, %p2378_p4 }
 0x3e0   : > { %p2381_p8 = pnand %p2380_p6, %p2374_p1 }
 0x3e2   : > { %2384 = shalt.err (!%p2381_p8)  }
 0x3e3   : > { %s2385_s4 = scalar_lea.vmem %s3639_s9, 16  ;;  %p2390_p11 = scmp.lt.s32.totalorder %s3639_s9, %s3400_s19 }
 0x3e4   : > { %p2386_p10 = scmp.ne.s32.totalorder %s3639_s9, %s2385_s4  ;;  %p2391_p12 = scmp.lt.s32.totalorder %s3403_s18, %s2385_s4 }
 0x3e6   : > { %p2392_p13 = por %p2391_p12, %p2390_p11 }
 0x3e8   : > { %p2393_p0 = pnand %p2392_p13, %p2386_p10 }
 0x3ea   : > { %2396 = shalt.err (!%p2393_p0)  }
 0x3eb   : > { %818 = dma.hbm_to_vmem [thread:$0]  %s805_s8, 16, %s3639_s9, %s3416_s5 }
 0x3ec   : > { %s821_s30 = sld [smem:[#allocation5 + %s820_s16]]  ;;  %s1284_s11 = scalar_lea.vmem %s3369_s12, 5 [#allocation2] }
 0x3ed   : > { %s833_s29 = sshll.u32 %s1284_s11, 4  ;;  %s837_s15 = sadd.s32 1, %s820_s16  ;;  %s3684_s29 = int_to_ptr.vmem [resolvable:$true] %s833_s29 }
 0x3ee   : > { %s3686_s26 = sld [smem:[#allocation5 + %s837_s15]]  ;;  %s1289_s28 = scalar_lea.vmem %s3369_s12, 13 [#allocation2] }
 0x3ef   : > { %s854_s23 = sadd.s32 2, %s820_s16  ;;  %s850_s0 = sshll.u32 %s1289_s28, 4  ;;  %s3691_s0 = int_to_ptr.vmem [resolvable:$true] %s850_s0 }
 0x3f0   : > { %s3689_s10 = sld [smem:[#allocation5 + %s854_s23]]  ;;  %s1294_s17 = scalar_lea.vmem %s3369_s12, 21 [#allocation2] }
 0x3f1   : > { %s867_s21 = sshll.u32 %s1294_s17, 4  ;;  %s3697_s21 = int_to_ptr.vmem [resolvable:$true] %s867_s21 }
 0x3f2   : > { %s1395_s22 = sshll.u32 %s821_s30, 4 }
 0x3f3   : > { %s823_s7 = scalar_lea.hbm %s3901_s1, %s1395_s22 }
 0x3f4   : > { %s2397_s24 = scalar_lea.hbm %s823_s7, 16  ;;  %p2400_p2 = scmp.lt.u32.totalorder %s823_s7, %s3901_s1 }
 0x3f5   : > { %p2398_p1 = scmp.ne.s32.totalorder %s823_s7, %s2397_s24  ;;  %p2401_p3 = scmp.lt.u32.totalorder %s3392_s13, %s2397_s24 }
 0x3f6   : > { %p2403_p5 = scmp.lt.u32.totalorder %s2397_s24, %s823_s7 }
 0x3f7   : > { %p2402_p4 = por %p2401_p3, %p2400_p2 }
 0x3f9   : > { %p2404_p6 = por %p2403_p5, %p2402_p4 }
 0x3fb   : > { %p2405_p8 = pnand %p2404_p6, %p2398_p1 }
 0x3fd   : > { %2408 = shalt.err (!%p2405_p8)  }
 0x3fe   : > { %s2409_s16 = scalar_lea.vmem %s3684_s29, 16  ;;  %p2414_p11 = scmp.lt.s32.totalorder %s3684_s29, %s3400_s19 }
 0x3ff   : > { %p2410_p10 = scmp.ne.s32.totalorder %s3684_s29, %s2409_s16  ;;  %p2415_p12 = scmp.lt.s32.totalorder %s3403_s18, %s2409_s16 }
 0x401   : > { %p2416_p13 = por %p2415_p12, %p2414_p11 }
 0x403   : > { %p2417_p0 = pnand %p2416_p13, %p2410_p10 }
 0x405   : > { %2420 = shalt.err (!%p2417_p0)  }
 0x406   : > { %836 = dma.hbm_to_vmem [thread:$0]  %s823_s7, 16, %s3684_s29, %s3377_s27 }
 0x407   : > { %s1396_s30 = sshll.u32 %s3686_s26, 4  ;;  %s871_s15 = sadd.s32 6, %s3365_s25 }
 0x408   : > { %s840_s17 = scalar_lea.hbm %s3902_s2, %s1396_s30  ;;  %s1397_s22 = sshll.u32 %s3689_s10, 4 }
 0x409   : > { %s2421_s9 = scalar_lea.hbm %s840_s17, 16  ;;  %p2424_p2 = scmp.lt.u32.totalorder %s840_s17, %s3902_s2 }
 0x40a   : > { %p2422_p1 = scmp.ne.s32.totalorder %s840_s17, %s2421_s9  ;;  %p2425_p3 = scmp.lt.u32.totalorder %s3421_s20, %s2421_s9 }
 0x40b   : > { %p2427_p5 = scmp.lt.u32.totalorder %s2421_s9, %s840_s17 }
 0x40c   : > { %p2426_p4 = por %p2425_p3, %p2424_p2 }
 0x40e   : > { %p2428_p6 = por %p2427_p5, %p2426_p4 }
 0x410   : > { %p2429_p8 = pnand %p2428_p6, %p2422_p1 }
 0x412   : > { %2432 = shalt.err (!%p2429_p8)  }
 0x413   : > { %s2433_s29 = scalar_lea.vmem %s3691_s0, 16  ;;  %p2438_p11 = scmp.lt.s32.totalorder %s3691_s0, %s3400_s19 }
 0x414   : > { %p2434_p10 = scmp.ne.s32.totalorder %s3691_s0, %s2433_s29  ;;  %p2439_p12 = scmp.lt.s32.totalorder %s3403_s18, %s2433_s29 }
 0x416   : > { %p2440_p13 = por %p2439_p12, %p2438_p11 }
 0x418   : > { %p2441_p0 = pnand %p2440_p13, %p2434_p10 }
 0x41a   : > { %2444 = shalt.err (!%p2441_p0)  }
 0x41b   : > { %853 = dma.hbm_to_vmem [thread:$0]  %s840_s17, 16, %s3691_s0, %s3380_s14 }
 0x41c   : > { %s857_s7 = scalar_lea.hbm %s3903_s3, %s1397_s22  ;;  %s872_s4 = smul.u32 3, %s871_s15 }
 0x41d   : > { %s2445_s11 = scalar_lea.hbm %s857_s7, 16  ;;  %p2448_p2 = scmp.lt.u32.totalorder %s857_s7, %s3903_s3 }
 0x41e   : > { %p2446_p1 = scmp.ne.s32.totalorder %s857_s7, %s2445_s11  ;;  %p2449_p3 = scmp.lt.u32.totalorder %s3442_s6, %s2445_s11 }
 0x41f   : > { %p2451_p5 = scmp.lt.u32.totalorder %s2445_s11, %s857_s7 }
 0x420   : > { %p2450_p4 = por %p2449_p3, %p2448_p2 }
 0x422   : > { %p2452_p6 = por %p2451_p5, %p2450_p4 }
 0x424   : > { %p2453_p8 = pnand %p2452_p6, %p2446_p1 }
 0x426   : > { %2456 = shalt.err (!%p2453_p8)  }
 0x427   : > { %s2457_s0 = scalar_lea.vmem %s3697_s21, 16  ;;  %p2462_p11 = scmp.lt.s32.totalorder %s3697_s21, %s3400_s19 }
 0x428   : > { %p2458_p10 = scmp.ne.s32.totalorder %s3697_s21, %s2457_s0  ;;  %p2463_p12 = scmp.lt.s32.totalorder %s3403_s18, %s2457_s0 }
 0x42a   : > { %p2464_p13 = por %p2463_p12, %p2462_p11 }
 0x42c   : > { %p2465_p0 = pnand %p2464_p13, %p2458_p10 }
 0x42e   : > { %2468 = shalt.err (!%p2465_p0)  }
 0x42f   : > { %870 = dma.hbm_to_vmem [thread:$0]  %s857_s7, 16, %s3697_s21, %s3416_s5 }
 0x430   : > { %s873_s15 = sld [smem:[#allocation5 + %s872_s4]]  ;;  %s1299_s28 = scalar_lea.vmem %s3369_s12, 6 [#allocation2] }
 0x431   : > { %s885_s23 = sshll.u32 %s1299_s28, 4  ;;  %s889_s17 = sadd.s32 1, %s872_s4  ;;  %s3742_s23 = int_to_ptr.vmem [resolvable:$true] %s885_s23 }
 0x432   : > { %s3744_s22 = sld [smem:[#allocation5 + %s889_s17]]  ;;  %s1304_s9 = scalar_lea.vmem %s3369_s12, 14 [#allocation2] }
 0x433   : > { %s906_s8 = sadd.s32 2, %s872_s4  ;;  %s902_s24 = sshll.u32 %s1304_s9, 4  ;;  %s3749_s24 = int_to_ptr.vmem [resolvable:$true] %s902_s24 }
 0x434   : > { %s3747_s29 = sld [smem:[#allocation5 + %s906_s8]]  ;;  %s1309_s26 = scalar_lea.vmem %s3369_s12, 22 [#allocation2] }
 0x435   : > { %s919_s11 = sshll.u32 %s1309_s26, 4  ;;  %s3755_s11 = int_to_ptr.vmem [resolvable:$true] %s919_s11 }
 0x436   : > { %s1398_s10 = sshll.u32 %s873_s15, 4 }
 0x437   : > { %s875_s16 = scalar_lea.hbm %s3901_s1, %s1398_s10 }
 0x438   : > { %s2469_s30 = scalar_lea.hbm %s875_s16, 16  ;;  %p2472_p2 = scmp.lt.u32.totalorder %s875_s16, %s3901_s1 }
 0x439   : > { %p2470_p1 = scmp.ne.s32.totalorder %s875_s16, %s2469_s30  ;;  %p2473_p3 = scmp.lt.u32.totalorder %s3392_s13, %s2469_s30 }
 0x43a   : > { %p2475_p5 = scmp.lt.u32.totalorder %s2469_s30, %s875_s16 }
 0x43b   : > { %p2474_p4 = por %p2473_p3, %p2472_p2 }
 0x43d   : > { %p2476_p6 = por %p2475_p5, %p2474_p4 }
 0x43f   : > { %p2477_p8 = pnand %p2476_p6, %p2470_p1 }
 0x441   : > { %2480 = shalt.err (!%p2477_p8)  }
 0x442   : > { %s2481_s4 = scalar_lea.vmem %s3742_s23, 16  ;;  %p2486_p11 = scmp.lt.s32.totalorder %s3742_s23, %s3400_s19 }
 0x443   : > { %p2482_p10 = scmp.ne.s32.totalorder %s3742_s23, %s2481_s4  ;;  %p2487_p12 = scmp.lt.s32.totalorder %s3403_s18, %s2481_s4 }
 0x445   : > { %p2488_p13 = por %p2487_p12, %p2486_p11 }
 0x447   : > { %p2489_p0 = pnand %p2488_p13, %p2482_p10 }
 0x449   : > { %2492 = shalt.err (!%p2489_p0)  }
 0x44a   : > { %888 = dma.hbm_to_vmem [thread:$0]  %s875_s16, 16, %s3742_s23, %s3377_s27 }
 0x44b   : > { %s1399_s15 = sshll.u32 %s3744_s22, 4  ;;  %s923_s17 = sadd.s32 7, %s3365_s25 }
 0x44c   : > { %s892_s26 = scalar_lea.hbm %s3902_s2, %s1399_s15  ;;  %s1400_s10 = sshll.u32 %s3747_s29, 4 }
 0x44d   : > { %s2493_s21 = scalar_lea.hbm %s892_s26, 16  ;;  %p2496_p2 = scmp.lt.u32.totalorder %s892_s26, %s3902_s2 }
 0x44e   : > { %p2494_p1 = scmp.ne.s32.totalorder %s892_s26, %s2493_s21  ;;  %p2497_p3 = scmp.lt.u32.totalorder %s3421_s20, %s2493_s21 }
 0x44f   : > { %p2499_p5 = scmp.lt.u32.totalorder %s2493_s21, %s892_s26 }
 0x450   : > { %p2498_p4 = por %p2497_p3, %p2496_p2 }
 0x452   : > { %p2500_p6 = por %p2499_p5, %p2498_p4 }
 0x454   : > { %p2501_p8 = pnand %p2500_p6, %p2494_p1 }
 0x456   : > { %2504 = shalt.err (!%p2501_p8)  }
 0x457   : > { %s2505_s25 = scalar_lea.vmem %s3749_s24, 16  ;;  %p2510_p11 = scmp.lt.s32.totalorder %s3749_s24, %s3400_s19 }
 0x458   : > { %p2506_p10 = scmp.ne.s32.totalorder %s3749_s24, %s2505_s25  ;;  %p2511_p12 = scmp.lt.s32.totalorder %s3403_s18, %s2505_s25 }
 0x45a   : > { %p2512_p13 = por %p2511_p12, %p2510_p11 }
 0x45c   : > { %p2513_p0 = pnand %p2512_p13, %p2506_p10 }
 0x45e   : > { %2516 = shalt.err (!%p2513_p0)  }
 0x45f   : > { %905 = dma.hbm_to_vmem [thread:$0]  %s892_s26, 16, %s3749_s24, %s3380_s14 }
 0x460   : > { %s909_s29 = scalar_lea.hbm %s3903_s3, %s1400_s10  ;;  %s924_s16 = smul.u32 3, %s923_s17 }
 0x461   : > { %s2517_s0 = scalar_lea.hbm %s909_s29, 16  ;;  %p2520_p2 = scmp.lt.u32.totalorder %s909_s29, %s3903_s3 }
 0x462   : > { %p2518_p1 = scmp.ne.s32.totalorder %s909_s29, %s2517_s0  ;;  %p2521_p3 = scmp.lt.u32.totalorder %s3442_s6, %s2517_s0 }
 0x463   : > { %p2523_p5 = scmp.lt.u32.totalorder %s2517_s0, %s909_s29 }
 0x464   : > { %p2522_p4 = por %p2521_p3, %p2520_p2 }
 0x466   : > { %p2524_p6 = por %p2523_p5, %p2522_p4 }
 0x468   : > { %p2525_p8 = pnand %p2524_p6, %p2518_p1 }
 0x46a   : > { %2528 = shalt.err (!%p2525_p8)  }
 0x46b   : > { %s2529_s24 = scalar_lea.vmem %s3755_s11, 16  ;;  %p2534_p11 = scmp.lt.s32.totalorder %s3755_s11, %s3400_s19 }
 0x46c   : > { %p2530_p10 = scmp.ne.s32.totalorder %s3755_s11, %s2529_s24  ;;  %p2535_p12 = scmp.lt.s32.totalorder %s3403_s18, %s2529_s24 }
 0x46e   : > { %p2536_p13 = por %p2535_p12, %p2534_p11 }
 0x470   : > { %p2537_p0 = pnand %p2536_p13, %p2530_p10 }
 0x472   : > { %2540 = shalt.err (!%p2537_p0)  }
 0x473   : > { %922 = dma.hbm_to_vmem [thread:$0]  %s909_s29, 16, %s3755_s11, %s3416_s5 }
 0x474   : > { %s925_s15 = sld [smem:[#allocation5 + %s924_s16]]  ;;  %s1314_s17 = scalar_lea.vmem %s3369_s12, 7 [#allocation2] }
 0x475   : > { %s941_s9 = sadd.s32 1, %s924_s16  ;;  %s937_s8 = sshll.u32 %s1314_s17, 4  ;;  %s938_s8 = int_to_ptr.vmem [resolvable:$true] %s937_s8 }
 0x476   : > { %s3800_s26 = sld [smem:[#allocation5 + %s941_s9]]  ;;  %s1319_s10 = scalar_lea.vmem %s3369_s12, 15 [#allocation2] }
 0x477   : > { %s958_s21 = sadd.s32 2, %s924_s16  ;;  %s954_s7 = sshll.u32 %s1319_s10, 4  ;;  %s3809_s7 = int_to_ptr.vmem [resolvable:$true] %s954_s7 }
 0x478   : > { %s3803_s30 = sld [smem:[#allocation5 + %s958_s21]]  ;;  %s1324_s25 = scalar_lea.vmem %s3369_s12, 23 [#allocation2] }
 0x479   : > { %s971_s22 = sshll.u32 %s1324_s25, 4  ;;  %s3819_s22 = int_to_ptr.vmem [resolvable:$true] %s971_s22 }
 0x47a   : > { %s1401_s23 = sshll.u32 %s925_s15, 4 }
 0x47b   : > { %s927_s11 = scalar_lea.hbm %s3901_s1, %s1401_s23 }
 0x47c   : > { %s2541_s29 = scalar_lea.hbm %s927_s11, 16  ;;  %p2544_p2 = scmp.lt.u32.totalorder %s927_s11, %s3901_s1 }
 0x47d   : > { %p2542_p1 = scmp.ne.s32.totalorder %s927_s11, %s2541_s29  ;;  %p2545_p3 = scmp.lt.u32.totalorder %s3392_s13, %s2541_s29 }
 0x47e   : > { %p2547_p5 = scmp.lt.u32.totalorder %s2541_s29, %s927_s11 }
 0x47f   : > { %p2546_p4 = por %p2545_p3, %p2544_p2 }
 0x481   : > { %p2548_p6 = por %p2547_p5, %p2546_p4 }
 0x483   : > { %p2549_p8 = pnand %p2548_p6, %p2542_p1 }
 0x485   : > { %2552 = shalt.err (!%p2549_p8)  }
 0x486   : > { %s2553_s12 = scalar_lea.vmem %s938_s8, 16  ;;  %p2558_p11 = scmp.lt.s32.totalorder %s938_s8, %s3400_s19 }
 0x487   : > { %p2554_p10 = scmp.ne.s32.totalorder %s938_s8, %s2553_s12  ;;  %p2559_p12 = scmp.lt.s32.totalorder %s3403_s18, %s2553_s12 }
 0x489   : > { %p2560_p13 = por %p2559_p12, %p2558_p11 }
 0x48b   : > { %p2561_p0 = pnand %p2560_p13, %p2554_p10 }
 0x48d   : > { %2564 = shalt.err (!%p2561_p0)  }
 0x48e   : > { %940 = dma.hbm_to_vmem [thread:$0]  %s927_s11, 16, %s938_s8, %s3377_s27 }
 0x48f   : > { %s1402_s13 = sshll.u32 %s3800_s26, 4  ;;  %s1403_s9 = sshll.u32 %s3803_s30, 4 }
 0x490   : > { %s944_s17 = scalar_lea.hbm %s3902_s2, %s1402_s13 }
 0x491   : > { %s2565_s10 = scalar_lea.hbm %s944_s17, 16  ;;  %p2568_p2 = scmp.lt.u32.totalorder %s944_s17, %s3902_s2 }
 0x492   : > { %p2566_p1 = scmp.ne.s32.totalorder %s944_s17, %s2565_s10  ;;  %p2569_p3 = scmp.lt.u32.totalorder %s3421_s20, %s2565_s10 }
 0x493   : > { %p2571_p5 = scmp.lt.u32.totalorder %s2565_s10, %s944_s17 }
 0x494   : > { %p2570_p4 = por %p2569_p3, %p2568_p2 }
 0x496   : > { %p2572_p6 = por %p2571_p5, %p2570_p4 }
 0x498   : > { %p2573_p8 = pnand %p2572_p6, %p2566_p1 }
 0x49a   : > { %2576 = shalt.err (!%p2573_p8)  }
 0x49b   : > { %s2577_s27 = scalar_lea.vmem %s3809_s7, 16  ;;  %p2582_p11 = scmp.lt.s32.totalorder %s3809_s7, %s3400_s19 }
 0x49c   : > { %p2578_p10 = scmp.ne.s32.totalorder %s3809_s7, %s2577_s27  ;;  %p2583_p12 = scmp.lt.s32.totalorder %s3403_s18, %s2577_s27 }
 0x49e   : > { %p2584_p13 = por %p2583_p12, %p2582_p11 }
 0x4a0   : > { %p2585_p0 = pnand %p2584_p13, %p2578_p10 }
 0x4a2   : > { %2588 = shalt.err (!%p2585_p0)  }
 0x4a3   : > { %957 = dma.hbm_to_vmem [thread:$0]  %s944_s17, 16, %s3809_s7, %s3380_s14 }
 0x4a4   : > { %s961_s26 = scalar_lea.hbm %s3903_s3, %s1403_s9 }
 0x4a5   : > { %s2589_s30 = scalar_lea.hbm %s961_s26, 16  ;;  %p2592_p2 = scmp.lt.u32.totalorder %s961_s26, %s3903_s3 }
 0x4a6   : > { %p2590_p1 = scmp.ne.s32.totalorder %s961_s26, %s2589_s30  ;;  %p2593_p3 = scmp.lt.u32.totalorder %s3442_s6, %s2589_s30 }
 0x4a7   : > { %p2595_p5 = scmp.lt.u32.totalorder %s2589_s30, %s961_s26 }
 0x4a8   : > { %p2594_p4 = por %p2593_p3, %p2592_p2 }
 0x4aa   : > { %p2596_p6 = por %p2595_p5, %p2594_p4 }
 0x4ac   : > { %p2597_p8 = pnand %p2596_p6, %p2590_p1 }
 0x4ae   : > { %2600 = shalt.err (!%p2597_p8)  }
 0x4af   : > { %s2601_s14 = scalar_lea.vmem %s3819_s22, 16  ;;  %p2606_p11 = scmp.lt.s32.totalorder %s3819_s22, %s3400_s19 }
 0x4b0   : > { %p2602_p10 = scmp.ne.s32.totalorder %s3819_s22, %s2601_s14  ;;  %p2607_p12 = scmp.lt.s32.totalorder %s3403_s18, %s2601_s14 }
 0x4b2   : > { %p2608_p13 = por %p2607_p12, %p2606_p11 }
 0x4b4   : > { %p2609_p0 = pnand %p2608_p13, %p2602_p10 }
 0x4b6   : > { %2612 = shalt.err (!%p2609_p0)  }
 0x4b7   : > { %974 = dma.hbm_to_vmem [thread:$0]  %s961_s26, 16, %s3819_s22, %s3416_s5 }
 0x4b8 PF: > { %s3938_s6 = sld [smem:[#allocation139_spill]]  ;;  %s3939_s7 = sld [smem:[#allocation134_spill]] }
 0x4b9   : > { %s3940_s28 = sld [smem:[#allocation140_spill]]  ;;  %s3943_s22 = sld [smem:[#allocation141_spill]] }
 0x4ba   : > { %s3941_s11 = sld [smem:[#allocation133_spill]]  ;;  %s2722_s9 = smov [#allocation6]  }
 0x4bb   : > { %s2617_s10 = sshll.u32 %s2722_s9, 4  ;;  %s2618_s10 = int_to_ptr.vmem [resolvable:$false] %s2617_s10 }
 0x4bc   : > { %s2619_s21 = scalar_lea.vmem %s2618_s10, 768 }
 0x4be   : > { %s1416_s4 = smul.u32 24, %s3938_s6 }
 0x4bf   : > { %s1418_s24 = smul.u32 384, %s3939_s7  ;;  %s998_s12 = sshll.u32 %s3940_s28, 4  ;;  %s3853_s12 = int_to_ptr.vmem [resolvable:$true] %s998_s12 }
 0x4c0   : > { %s976_s19 = scalar_lea.vmem [#allocation2], %s1416_s4  ;;  %s3944_s16 = sand.u32 1, %s3941_s11  }
 0x4c1   : > { %v977_v0 = vld [vmem:[%s976_s19] sm:$0xff]  ;;  %v978_v1 = vld [vmem:[%s976_s19 + $0x8] sm:$0xff]  ;;  %v979_v2 = vld [vmem:[%s976_s19 + $0x10] sm:$0xff]  ;;  %s3858_s13 = scalar_lea.hbm %s3943_s22, %s1418_s24  ;;  %s984_s15 = scalar_lea.sflag [#allocation7], %s3944_s16 }
 0x4c2   : > { %980 = vst [vmem:[%s3940_s28] sm:$0xff] %v977_v0  ;;  %981 = vst [vmem:[%s3940_s28 + $0x8] sm:$0xff] %v978_v1  ;;  %s2613_s17 = scalar_lea.vmem %s3853_s12, 384  ;;  %p2620_p4 = scmp.lt.s32.totalorder %s3853_s12, %s2618_s10 }
 0x4c3   : > { %982 = vst [vmem:[%s3940_s28 + $0x10] sm:$0xff] %v979_v2  ;;  %p2614_p1 = scmp.ne.s32.totalorder %s3853_s12, %s2613_s17  ;;  %p2621_p5 = scmp.lt.s32.totalorder %s2619_s21, %s2613_s17 }
 0x4c5   : > { %p2615_p2 = pnand %p2614_p1, %p2788_p7  ;;  %p2622_p6 = por %p2621_p5, %p2620_p4 }
 0x4c7   : > { %p2616_p3 = pneg %p2615_p2 }
 0x4c9   : > { %p2623_p8 = pnand %p2622_p6, %p2616_p3 }
 0x4cb   : > { %2626 = shalt.err (!%p2623_p8)
}
 0x4cc   : > { %s2627_s25 = scalar_lea.hbm %s3858_s13, 384  ;;  %s2631_s8 = scalar_lea.hbm %s3943_s22, 1536 }
 0x4cd   : > { %p2628_p10 = scmp.ne.s32.totalorder %s3858_s13, %s2627_s25  ;;  %p2632_p13 = scmp.lt.u32.totalorder %s3858_s13, %s3943_s22 }
 0x4ce   : > { %p2633_p0 = scmp.lt.u32.totalorder %s2631_s8, %s2627_s25  ;;  %p2635_p2 = scmp.lt.u32.totalorder %s2627_s25, %s3858_s13 }
 0x4cf   : > { %p2629_p11 = pnand %p2628_p10, %p2788_p7 }
 0x4d0   : > { %p2634_p1 = por %p2633_p0, %p2632_p13 }
 0x4d1   : > { %p2630_p12 = pneg %p2629_p11 }
 0x4d2   : > { %p2636_p3 = por %p2635_p2, %p2634_p1 }
 0x4d4   : > { %p2637_p4 = pnand %p2636_p3, %p2630_p12 }
 0x4d6   : > { %2640 = shalt.err (!%p2637_p4)
}
 0x4d7   : > { %1419 = dma.vmem_to_hbm [thread:$0]  (%p2788_p7), %s3853_s12, 384, %s3858_s13, %s984_s15  }
 0x4d8 PF: > { %s3945_s23 = sld [smem:[#allocation134_spill]]  ;;  %s3946_s0 = sld [smem:[#allocation132_spill]] }
 0x4de   : > { %p1425_p5 = scmp.ge.s32.totalorder %s3945_s23, 1  ;;  %s1010_s6 = sand.u32 1, %s3946_s0  }
 0x4df   : > { %s1011_s7 = scalar_lea.sflag [#allocation7], %s1010_s6 }
 0x4e0   : > { %p1422_p6 = pnand %p1425_p5, %p2792_p9 }
 0x4e2   : > { %2704 = dma.done.wait (!%p1422_p6), %s1011_s7, 384  }
 0x4e3   : > { %2706 = vsyncadd (!%p1422_p6), %s1011_s7, 4294966912  ;;  %s3948_s27 = sld [smem:[#allocation135_spill]]  ;;  %s3949_s25 = sld [smem:[#allocation133_spill]] }
 0x4e4   : > { %s3950_s26 = sld [smem:[#allocation136_spill]] }
 0x4e9   : > { %p18_p8 = scmp.ge.s32.totalorder %s3948_s27, 5  }
 0x4eb   :  { %20 = sbr.rel (!%p18_p8) target bundleno = 15 (0xf), region = 355 }
 0x4f2   :  { %1016 = vsyncpa [#allocation7], 1 }
 0x4f3   :  { %1018 = vsyncpa [#allocation7 + $0x1], 1 }
 0x4f4   :  { %1019 = vsyncmov [#allocation3] }
 0x4f7   :  { %s1020_s28 = vpop.sfrf %1019 }
 0x4f8   :  { %p1408_p7 = scmp.ne.s32.totalorder %s1020_s28, 0 }
 0x4fa   :  { %1024 = shalt.err (%p1408_p7)  }
 0x4fb   :  { %1026 = vsyncmov [#allocation3 + $0x1] }
 0x4fe   :  { %s1027_s11 = vpop.sfrf %1026 }
 0x4ff   :  { %p1409_p9 = scmp.ne.s32.totalorder %s1027_s11, 0 }
 0x501   :  { %1031 = shalt.err (%p1409_p9)  }
 0x502   :  { %1033 = vsyncmov [#allocation3 + $0x2] }
 0x505   :  { %s1034_s29 = vpop.sfrf %1033 }
 0x506   :  { %p1410_p10 = scmp.ne.s32.totalorder %s1034_s29, 0 }
 0x508   :  { %1038 = shalt.err (%p1410_p10)  }
 0x509   :  { %1040 = vsyncmov [#allocation3 + $0x3] }
 0x50c   :  { %s1041_s4 = vpop.sfrf %1040 }
 0x50d   :  { %p1411_p11 = scmp.ne.s32.totalorder %s1041_s4, 0 }
 0x50f   :  { %1045 = shalt.err (%p1411_p11)  }
 0x510   :  { %1047 = vsyncmov [#allocation3 + $0x4] }
 0x513   :  { %s1048_s24 = vpop.sfrf %1047 }
 0x514   :  { %p1412_p12 = scmp.ne.s32.totalorder %s1048_s24, 0 }
 0x516   :  { %1052 = shalt.err (%p1412_p12)  }
 0x517   :  { %1054 = vsyncmov [#allocation3 + $0x5] }
 0x51a   :  { %s1055_s1 = vpop.sfrf %1054 }
 0x51b   :  { %p1413_p13 = scmp.ne.s32.totalorder %s1055_s1, 0 }
 0x51d   :  { %1059 = shalt.err (%p1413_p13)  }

</bundles_post_ra>
